<compile_context>
chip_gen: v7x
topology: tpu7x:2x2x1
jax: 0.10.0
libtpu: 0.0.40
codegen_flags: <defaults>
</compile_context>

<pallas_src>
from functools import partial
import math

import jax
import jax.numpy as jnp
from jax.experimental import pallas as pl
from jax.experimental.pallas import tpu as pltpu


# ----------------------------- glue: window partition / reverse ----------------------------- #

def _window_partition(x, window_size):
    # x: (B, T, H, W, C) -> (num_windows*B, wt, wh, ww, C)
    B, T, H, W, C = x.shape
    wt, wh, ww = window_size
    x = x.reshape(B, T // wt, wt, H // wh, wh, W // ww, ww, C)
    x = jnp.einsum('btmhywxc->bthwmyxc', x)
    return x.reshape(-1, wt, wh, ww, C)


def _window_reverse(windows, window_size, T, H, W):
    # windows: (num_windows*B, wt, wh, ww, C) -> (B, T, H, W, C)
    wt, wh, ww = window_size
    B = windows.shape[0] // (T * H * W // (wt * wh * ww))
    x = windows.reshape(B, T // wt, H // wh, W // ww, wt, wh, ww, -1)
    x = jnp.einsum('bthwmyxc->btmhywxc', x)
    return x.reshape(B, T, H, W, -1)


def _get_window_and_shift_size(ind, window_size, video_size):
    # TODO(synk): reference get_window_and_shift_size raises NotImplementedError; we use the
    # standard Swin convention: clip window to the video size, even ind -> no shift,
    # odd ind -> negative half-window shift (reverse shift is the negation).
    ws = tuple(min(w, v) for w, v in zip(window_size, video_size))
    if ind % 2 == 0:
        shift = (0, 0, 0)
    else:
        shift = tuple(-(w // 2) if w < v else 0 for w, v in zip(ws, video_size))
    rev = tuple(-s for s in shift)
    return ws, shift, rev


# ----------------------------- VMEM sizing helpers ----------------------------- #

def _vmem_capacity_bytes():
    try:
        info = pltpu.get_tpu_info()
        cap = getattr(info, "vmem_capacity_bytes", None)
        if cap:
            return int(cap)
    except Exception:
        pass
    return 64 * 1024 * 1024   # conservative fallback == v7x per-TensorCore VMEM


def _pick_windows_per_block(num_windows, nw, d, num_heads, in_itemsize, cdt_itemsize,
                            budget_bytes, min_steps=4):
    """Largest windows-per-block whose working set fits `budget_bytes`, while keeping the
    block sublane dim a multiple of 8 and (when there is enough work) at least `min_steps`
    grid steps, so both v7x TensorCores stay busy and the DMA pipeline has a steady state.
    The window count may be padded up to a multiple of the result (never grid=1 fallback)."""
    step = 8 // math.gcd(nw, 8)            # WB multiple of step -> (WB*nw) % 8 == 0
    per_win = (
        nw * d * in_itemsize * 4                       # in + out blocks, double-buffered
        + nw * d * cdt_itemsize                        # cast input slab
        + nw * 3 * d * (4 + 2 * cdt_itemsize)          # fused qkv f32 + cast + head-split relayout
        + num_heads * nw * nw * (8 + cdt_itemsize)     # scores f32 + probs f32 + probs cast
        + nw * d * (8 + 2 * cdt_itemsize)              # attn out f32, merged cdt, y f32
    )
    cap = max(1, int(budget_bytes // per_win))
    if num_windows >= min_steps * step:
        cap = min(cap, num_windows // min_steps)       # keep >= min_steps grid steps
    cap = min(cap, num_windows)
    cap = max(step, (cap // step) * step)

    best = None
    for wb in range(cap, 0, -step):
        g = -(-num_windows // wb)                      # grid length after padding
        score = (
            g >= min_steps or wb == step,              # enough pipeline steps
            (num_windows % wb) == 0,                   # no padded (wasted) windows
            g % 2 == 0,                                # even grid: balanced across 2 TCs
            wb,                                        # then: as large as fits
        )
        if best is None or score > best[0]:
            best = (score, wb)
    return best[1]


# ----------------------------- Pallas kernel: fused window attention ----------------------------- #

def _window_attn_kernel(x_ref, wqkv_ref, wp_ref, bp_ref, o_ref, *,
                        num_heads, wb, nw, cdt):
    # x_ref:    (wb*nw, D) lane-dense slab of wb windows (nw tokens each), input dtype
    # wqkv_ref: (D, 3D) fused pre-transposed qkv weight (scale folded into the q columns)
    # wp_ref:   (D, D) pre-transposed output-projection weight
    # bp_ref:   (1, D) f32 proj bias
    M, D = x_ref.shape
    nh = num_heads
    hd = D // nh

    xc = x_ref[...].astype(cdt)                                            # (M, D)

    # One fused qkv projection (single MXU stream over the slab); f32 accumulation.
    qkv = jnp.dot(xc, wqkv_ref[...], preferred_element_type=jnp.float32)   # (M, 3D)

    # Single head-split relayout for q, k, v together, done in the narrow compute dtype.
    # Column order of wqkv_t is (t, h, e) with t in {q, k, v}, so axis 2 below is t*nh + h.
    qkv = qkv.astype(cdt).reshape(wb, nw, 3 * nh, hd)
    qkv = jnp.transpose(qkv, (0, 2, 1, 3))                                 # (wb, 3nh, nw, hd)
    q = qkv[:, 0:nh].reshape(wb * nh, nw, hd)
    k = qkv[:, nh:2 * nh].reshape(wb * nh, nw, hd)
    v = qkv[:, 2 * nh:3 * nh].reshape(wb * nh, nw, hd)

    # Head-batched attention (batch dim = windows x heads); softmax statistics in f32.
    s = jnp.einsum('bqe,bke->bqk', q, k, preferred_element_type=jnp.float32)   # (wb*nh, nw, nw)
    s = s - jnp.max(s, axis=-1, keepdims=True)
    p = jnp.exp(s)
    inv = pl.reciprocal(jnp.sum(p, axis=-1, keepdims=True), approx=True)       # EUP reciprocal
    o = jnp.einsum('bqk,bke->bqe', p.astype(cdt), v, preferred_element_type=jnp.float32)
    o = o * inv                                                                # normalize Nw x hd

    # Merge heads (cast first -> half the relayout bytes) and apply output projection + bias.
    oc = o.astype(cdt).reshape(wb, nh, nw, hd)
    oc = jnp.transpose(oc, (0, 2, 1, 3)).reshape(M, D)
    y = jnp.dot(oc, wp_ref[...], preferred_element_type=jnp.float32) + bp_ref[...]
    o_ref[...] = y.astype(o_ref.dtype)


def window_attention(x_windows, wqkv, wproj, bproj, *, num_heads, scale,
                     windows_per_block=None, compute_dtype=None):
    """x_windows: (BW, Nw, D). wqkv: (3D, D), wproj: (D, D), bproj: (D,) in PyTorch layout."""
    BW, Nw, D = x_windows.shape
    assert D % num_heads == 0
    in_dt = x_windows.dtype
    # MXU-native bf16 operands when fed f32 activations; f32 accumulation, f32 softmax.
    if compute_dtype is None:
        compute_dtype = jnp.bfloat16 if in_dt == jnp.float32 else in_dt
    cdt = jnp.dtype(compute_dtype)

    vmem_cap = _vmem_capacity_bytes()
    vmem_limit = int(vmem_cap * 3 // 4)                      # headroom for Mosaic temps
    weight_bytes = 4 * D * D * cdt.itemsize * 2 + D * 4 * 2  # conservatively assume double-buffered
    budget = max(vmem_limit - weight_bytes - (2 << 20), 1 << 20)

    step = 8 // math.gcd(Nw, 8)
    if windows_per_block is None:
        WB = _pick_windows_per_block(BW, Nw, D, num_heads,
                                     jnp.dtype(in_dt).itemsize, cdt.itemsize, budget)
    else:
        WB = max(1, int(windows_per_block))
        WB = ((WB + step - 1) // step) * step                # keep (WB*Nw) % 8 == 0

    pad_w = (-BW) % WB
    grid_len = (BW + pad_w) // WB
    M = WB * Nw

    # PyTorch nn.Linear: y = x @ W.T.  wqkv rows [0:D)=q, [D:2D)=k, [2D:3D)=v.
    # Fold the attention scale into the q columns and fuse q|k|v into one (D, 3D) weight.
    wqkv_t = jnp.concatenate(
        [jnp.transpose(wqkv[0:D]) * scale, jnp.transpose(wqkv[D:3 * D])], axis=1
    ).astype(cdt)
    wp_t = jnp.transpose(wproj).astype(cdt)
    b2 = bproj.reshape(1, D).astype(jnp.float32)

    x2 = x_windows.reshape(BW * Nw, D)                       # lane-dense 2D slab
    if pad_w:
        # Zero-padded windows are independent (per-window attention) and dropped below.
        x2 = jnp.pad(x2, ((0, pad_w * Nw), (0, 0)))

    kernel = partial(_window_attn_kernel, num_heads=num_heads, wb=WB, nw=Nw, cdt=cdt)

    def _call(weight_pipeline_mode):
        wkw = {} if weight_pipeline_mode is None else {"pipeline_mode": weight_pipeline_mode}
        return pl.pallas_call(
            kernel,
            out_shape=jax.ShapeDtypeStruct((grid_len * M, D), in_dt),
            grid_spec=pltpu.PrefetchScalarGridSpec(
                num_scalar_prefetch=0,
                grid=(grid_len,),
                in_specs=[
                    pl.BlockSpec((M, D), lambda i: (i, 0)),
                    pl.BlockSpec((D, 3 * D), lambda i: (0, 0), **wkw),
                    pl.BlockSpec((D, D), lambda i: (0, 0), **wkw),
                    pl.BlockSpec((1, D), lambda i: (0, 0), **wkw),
                ],
                out_specs=pl.BlockSpec((M, D), lambda i: (i, 0)),
            ),
            compiler_params=pltpu.CompilerParams(
                dimension_semantics=("parallel",),
                vmem_limit_bytes=vmem_limit,
            ),
        )(x2, wqkv_t, wp_t, b2)

    try:
        # Grid-invariant weights/bias: single-buffer them (double-buffering only wastes VMEM).
        y2 = _call(pl.Buffered(1))
    except Exception:
        # pipeline_mode / Buffered(1) not supported on this jax version -> default buffering.
        y2 = _call(None)

    return y2[: BW * Nw].reshape(BW, Nw, D)


# ----------------------------- full module forward ----------------------------- #

def attention_swin_ind(x, wqkv, wproj, bproj, *, num_heads, ind, window_size,
                       windows_per_block=None, compute_dtype=None):
    N, T, S, D = x.shape
    H = W = int(S ** 0.5)
    assert H * W == S
    head_dim = D // num_heads
    scale = head_dim ** (-0.5)

    x5 = x.reshape(N, T, H, W, D)
    ws, shift, rev = _get_window_and_shift_size(ind, window_size, (T, H, W))

    # Note: like the reference module's attn(), no cross-boundary attention mask is applied
    # after the cyclic shift (the PyTorch forward has none either).
    # TODO(synk): roll + window partition/reverse are kept as XLA reshape glue; fusing them
    # into the Pallas pipeline (gather/scatter index maps) would remove ~4 HBM passes.
    shifted_x = jnp.roll(x5, shift=shift, axis=(1, 2, 3))
    x_windows = _window_partition(shifted_x, ws)
    Nw = ws[0] * ws[1] * ws[2]
    x_windows = x_windows.reshape(-1, Nw, D)

    attn_windows = window_attention(x_windows, wqkv, wproj, bproj,
                                    num_heads=num_heads, scale=scale,
                                    windows_per_block=windows_per_block,
                                    compute_dtype=compute_dtype)

    attn_windows = attn_windows.reshape(-1, ws[0], ws[1], ws[2], D)
    shifted_x = _window_reverse(attn_windows, ws, T, H, W)
    out = jnp.roll(shifted_x, shift=rev, axis=(1, 2, 3))
    # TODO(synk): proj_drop is identity (p=0.0 / eval mode), so it is intentionally omitted.
    return out.reshape(N, T, S, D)


# ----------------------------- pure-JAX reference (for sanity checking) ----------------------------- #

def _attention_swin_ind_reference(x, wqkv, wproj, bproj, *, num_heads, ind, window_size):
    N, T, S, D = x.shape
    H = W = int(S ** 0.5)
    hd = D // num_heads
    scale = hd ** (-0.5)
    x5 = x.reshape(N, T, H, W, D)
    ws, shift, rev = _get_window_and_shift_size(ind, window_size, (T, H, W))
    xw = _window_partition(jnp.roll(x5, shift=shift, axis=(1, 2, 3)), ws)
    Nw = ws[0] * ws[1] * ws[2]
    xw = xw.reshape(-1, Nw, D)
    qkv = (xw @ wqkv.T).reshape(-1, Nw, 3, num_heads, hd).transpose(2, 0, 3, 1, 4)
    q, k, v = qkv[0], qkv[1], qkv[2]
    attn = jax.nn.softmax((q @ jnp.swapaxes(k, -2, -1)) * scale, axis=-1)
    o = (attn @ v).transpose(0, 2, 1, 3).reshape(-1, Nw, D)
    o = o @ wproj.T + bproj
    o = _window_reverse(o.reshape(-1, ws[0], ws[1], ws[2], D), ws, T, H, W)
    return jnp.roll(o, shift=rev, axis=(1, 2, 3)).reshape(N, T, S, D)


# ----------------------------- demo ----------------------------- #

if __name__ == "__main__":
    # Small shapes consistent with the module's forward: x is (N, T, S, D), S = H*W.
    N, T, H, W, D = 2, 4, 4, 4, 32
    S = H * W
    num_heads = 4
    window_size = (2, 2, 2)
    ind = 1  # odd -> exercises the shifted-window path

    key = jax.random.PRNGKey(0)
    kx, kqkv, kproj, kb = jax.random.split(key, 4)

    x = jax.random.normal(kx, (N, T, S, D), dtype=jnp.float32)
    # nn.Linear(dim, dim*3, bias=False) -> weight (3D, D); nn.Linear(dim, dim) -> (D, D) + bias (D,)
    wqkv = 0.02 * jax.random.normal(kqkv, (3 * D, D), dtype=jnp.float32)
    wproj = 0.02 * jax.random.normal(kproj, (D, D), dtype=jnp.float32)
    bproj = 0.02 * jax.random.normal(kb, (D,), dtype=jnp.float32)

    out = attention_swin_ind(x, wqkv, wproj, bproj,
                             num_heads=num_heads, ind=ind, window_size=window_size)
    out = jax.block_until_ready(out)
    assert out.shape == (N, T, S, D)
    assert jnp.all(jnp.isfinite(out))

    # Loose sanity check against a pure-JAX f32 reference (kernel uses bf16 matmul operands
    # and an approx EUP reciprocal, so exact equality is not expected).
    ref = _attention_swin_ind_reference(x, wqkv, wproj, bproj,
                                        num_heads=num_heads, ind=ind, window_size=window_size)
    assert jnp.max(jnp.abs(out - ref)) < 3e-2

    print("KERNEL_OK")
</pallas_src>

<mosaic_0001>
module attributes {stable_mosaic.version = 11 : i64} {
  func.func @_window_attn_kernel(%arg0: i32, %arg1: memref<32x32xf32, #tpu.memory_space<vmem>>, %arg2: memref<32x96xbf16, #tpu.memory_space<vmem>>, %arg3: memref<32x32xbf16, #tpu.memory_space<vmem>>, %arg4: memref<1x32xf32, #tpu.memory_space<vmem>>, %arg5: memref<32x32xf32, #tpu.memory_space<vmem>>) attributes {dimension_semantics = [#tpu.dimension_semantics<parallel>], iteration_bounds = array<i64: 4>, scalar_prefetch = 0 : i64, scratch_operands = 0 : i64, tpu.core_type = #tpu.core_type<tc>, window_params = [{transform_indices = @transform_0, window_bounds = array<i64: 32, 32>}, {pipeline_mode = #tpu.pipeline_mode<synchronous>, transform_indices = @transform_1, window_bounds = array<i64: 32, 96>}, {pipeline_mode = #tpu.pipeline_mode<synchronous>, transform_indices = @transform_2, window_bounds = array<i64: 32, 32>}, {pipeline_mode = #tpu.pipeline_mode<synchronous>, transform_indices = @transform_3, window_bounds = array<i64: 1, 32>}, {transform_indices = @transform_4, window_bounds = array<i64: 32, 32>}]} {
    %c0 = arith.constant 0 : index
    %c0_0 = arith.constant 0 : index
    %0 = vector.load %arg1[%c0, %c0_0] : memref<32x32xf32, #tpu.memory_space<vmem>>, vector<32x32xf32>
    %1 = arith.truncf %0 : vector<32x32xf32> to vector<32x32xbf16>
    %c0_1 = arith.constant 0 : index
    %c0_2 = arith.constant 0 : index
    %2 = vector.load %arg2[%c0_1, %c0_2] : memref<32x96xbf16, #tpu.memory_space<vmem>>, vector<32x96xbf16>
    %cst = arith.constant dense<0.000000e+00> : vector<32x96xf32>
    %3 = tpu.matmul %1, %2, %cst {dimension_numbers = #tpu.dot_dimension_numbers<[1], [0], [0], [1], [0, 0, 1, 1], [], []>} : vector<32x32xbf16>, vector<32x96xbf16>, vector<32x96xf32> -> vector<32x96xf32>
    %4 = arith.truncf %3 : vector<32x96xf32> to vector<32x96xbf16>
    %5 = vector.shape_cast %4 : vector<32x96xbf16> to vector<4x8x12x8xbf16>
    %6 = tpu.transpose %5, [0, 2, 1, 3] : vector<4x8x12x8xbf16> -> vector<4x12x8x8xbf16>
    %7 = vector.extract_strided_slice %6 {offsets = [0, 0, 0, 0], sizes = [4, 4, 8, 8], strides = [1, 1, 1, 1]} : vector<4x12x8x8xbf16> to vector<4x4x8x8xbf16>
    %8 = vector.shape_cast %7 : vector<4x4x8x8xbf16> to vector<16x8x8xbf16>
    %9 = vector.extract_strided_slice %6 {offsets = [0, 4, 0, 0], sizes = [4, 4, 8, 8], strides = [1, 1, 1, 1]} : vector<4x12x8x8xbf16> to vector<4x4x8x8xbf16>
    %10 = vector.shape_cast %9 : vector<4x4x8x8xbf16> to vector<16x8x8xbf16>
    %11 = vector.extract_strided_slice %6 {offsets = [0, 8, 0, 0], sizes = [4, 4, 8, 8], strides = [1, 1, 1, 1]} : vector<4x12x8x8xbf16> to vector<4x4x8x8xbf16>
    %12 = vector.shape_cast %11 : vector<4x4x8x8xbf16> to vector<16x8x8xbf16>
    "tpu.trace_start"() <{level = 10 : i32, message = "bqe,bke->bqk"}> : () -> ()
    %cst_3 = arith.constant dense<0.000000e+00> : vector<16x8x8xf32>
    %13 = tpu.matmul %8, %10, %cst_3 {dimension_numbers = #tpu.dot_dimension_numbers<[2], [2], [1], [1], [0, 0, 0, 1, 1, 1], [0], [0]>} : vector<16x8x8xbf16>, vector<16x8x8xbf16>, vector<16x8x8xf32> -> vector<16x8x8xf32>
    "tpu.trace_stop"() : () -> ()
    %cst_4 = arith.constant dense<0xFF800000> : vector<16x8xf32>
    %14 = vector.multi_reduction <maximumf>, %13, %cst_4 [2] : vector<16x8x8xf32> to vector<16x8xf32>
    %15 = vector.shape_cast %14 : vector<16x8xf32> to vector<16x8x1xf32>
    %16 = vector.broadcast %15 : vector<16x8x1xf32> to vector<16x8x8xf32>
    %17 = arith.subf %13, %16 : vector<16x8x8xf32>
    %18 = math.exp %17 : vector<16x8x8xf32>
    %cst_5 = arith.constant dense<0.000000e+00> : vector<16x8xf32>
    %19 = vector.multi_reduction <add>, %18, %cst_5 [2] : vector<16x8x8xf32> to vector<16x8xf32>
    %20 = vector.shape_cast %19 : vector<16x8xf32> to vector<16x8x1xf32>
    %21 = tpu.reciprocal %20 {approx = true} : vector<16x8x1xf32> -> vector<16x8x1xf32>
    %22 = arith.truncf %18 : vector<16x8x8xf32> to vector<16x8x8xbf16>
    "tpu.trace_start"() <{level = 10 : i32, message = "bqk,bke->bqe"}> : () -> ()
    %cst_6 = arith.constant dense<0.000000e+00> : vector<16x8x8xf32>
    %23 = tpu.matmul %22, %12, %cst_6 {dimension_numbers = #tpu.dot_dimension_numbers<[2], [1], [1], [2], [0, 0, 0, 1, 1, 2], [0], [0]>} : vector<16x8x8xbf16>, vector<16x8x8xbf16>, vector<16x8x8xf32> -> vector<16x8x8xf32>
    "tpu.trace_stop"() : () -> ()
    %24 = vector.broadcast %21 : vector<16x8x1xf32> to vector<16x8x8xf32>
    %25 = arith.mulf %23, %24 : vector<16x8x8xf32>
    %26 = arith.truncf %25 : vector<16x8x8xf32> to vector<16x8x8xbf16>
    %27 = vector.shape_cast %26 : vector<16x8x8xbf16> to vector<4x4x8x8xbf16>
    %28 = tpu.transpose %27, [0, 2, 1, 3] : vector<4x4x8x8xbf16> -> vector<4x8x4x8xbf16>
    %29 = vector.shape_cast %28 : vector<4x8x4x8xbf16> to vector<32x32xbf16>
    %c0_7 = arith.constant 0 : index
    %c0_8 = arith.constant 0 : index
    %30 = vector.load %arg3[%c0_7, %c0_8] : memref<32x32xbf16, #tpu.memory_space<vmem>>, vector<32x32xbf16>
    %cst_9 = arith.constant dense<0.000000e+00> : vector<32x32xf32>
    %31 = tpu.matmul %29, %30, %cst_9 {dimension_numbers = #tpu.dot_dimension_numbers<[1], [0], [0], [1], [0, 0, 1, 1], [], []>} : vector<32x32xbf16>, vector<32x32xbf16>, vector<32x32xf32> -> vector<32x32xf32>
    %c0_10 = arith.constant 0 : index
    %c0_11 = arith.constant 0 : index
    %32 = vector.load %arg4[%c0_10, %c0_11] : memref<1x32xf32, #tpu.memory_space<vmem>>, vector<1x32xf32>
    %33 = vector.broadcast %32 : vector<1x32xf32> to vector<32x32xf32>
    %34 = arith.addf %31, %33 : vector<32x32xf32>
    %c0_12 = arith.constant 0 : index
    %c0_13 = arith.constant 0 : index
    %35 = vector.load %arg5[%c0_12, %c0_13] : memref<32x32xf32, #tpu.memory_space<vmem>>, vector<32x32xf32>
    tpu.vector_store %arg5[%c0_12, %c0_13], %34 {strides = array<i32>} : memref<32x32xf32, #tpu.memory_space<vmem>>, vector<32x32xf32>,
    return
  }
  func.func @transform_0(%arg0: i32) -> (i32, i32) {
    %c0_i32 = arith.constant 0 : i32
    %c0_i32_0 = arith.constant 0 : i32
    return %arg0, %c0_i32 : i32, i32
  }
  func.func @transform_1(%arg0: i32) -> (i32, i32) {
    %c0_i32 = arith.constant 0 : i32
    %c0_i32_0 = arith.constant 0 : i32
    %c0_i32_1 = arith.constant 0 : i32
    return %c0_i32, %c0_i32_0 : i32, i32
  }
  func.func @transform_2(%arg0: i32) -> (i32, i32) {
    %c0_i32 = arith.constant 0 : i32
    %c0_i32_0 = arith.constant 0 : i32
    %c0_i32_1 = arith.constant 0 : i32
    return %c0_i32, %c0_i32_0 : i32, i32
  }
  func.func @transform_3(%arg0: i32) -> (i32, i32) {
    %c0_i32 = arith.constant 0 : i32
    %c0_i32_0 = arith.constant 0 : i32
    %c0_i32_1 = arith.constant 0 : i32
    return %c0_i32, %c0_i32_0 : i32, i32
  }
  func.func @transform_4(%arg0: i32) -> (i32, i32) {
    %c0_i32 = arith.constant 0 : i32
    %c0_i32_0 = arith.constant 0 : i32
    return %arg0, %c0_i32 : i32, i32
  }
}

module attributes {stable_mosaic.version = 11 : i64} {
  func.func @_window_attn_kernel(%arg0: i32, %arg1: memref<32x32xf32, #tpu.memory_space<vmem>>, %arg2: memref<32x96xbf16, #tpu.memory_space<vmem>>, %arg3: memref<32x32xbf16, #tpu.memory_space<vmem>>, %arg4: memref<1x32xf32, #tpu.memory_space<vmem>>, %arg5: memref<32x32xf32, #tpu.memory_space<vmem>>) attributes {dimension_semantics = [#tpu.dimension_semantics<parallel>], iteration_bounds = array<i64: 4>, scalar_prefetch = 0 : i64, scratch_operands = 0 : i64, tpu.core_type = #tpu.core_type<tc>, window_params = [{transform_indices = @transform_0, window_bounds = array<i64: 32, 32>}, {pipeline_mode = #tpu.pipeline_mode<synchronous>, transform_indices = @transform_1, window_bounds = array<i64: 32, 96>}, {pipeline_mode = #tpu.pipeline_mode<synchronous>, transform_indices = @transform_2, window_bounds = array<i64: 32, 32>}, {pipeline_mode = #tpu.pipeline_mode<synchronous>, transform_indices = @transform_3, window_bounds = array<i64: 1, 32>}, {transform_indices = @transform_4, window_bounds = array<i64: 32, 32>}]} {
    %c0 = arith.constant 0 : index
    %c0_0 = arith.constant 0 : index
    %0 = vector.load %arg1[%c0, %c0_0] : memref<32x32xf32, #tpu.memory_space<vmem>>, vector<32x32xf32>
    %1 = arith.truncf %0 : vector<32x32xf32> to vector<32x32xbf16>
    %c0_1 = arith.constant 0 : index
    %c0_2 = arith.constant 0 : index
    %2 = vector.load %arg2[%c0_1, %c0_2] : memref<32x96xbf16, #tpu.memory_space<vmem>>, vector<32x96xbf16>
    %cst = arith.constant dense<0.000000e+00> : vector<32x96xf32>
    %3 = tpu.matmul %1, %2, %cst {dimension_numbers = #tpu.dot_dimension_numbers<[1], [0], [0], [1], [0, 0, 1, 1], [], []>} : vector<32x32xbf16>, vector<32x96xbf16>, vector<32x96xf32> -> vector<32x96xf32>
    %4 = arith.truncf %3 : vector<32x96xf32> to vector<32x96xbf16>
    %5 = vector.shape_cast %4 : vector<32x96xbf16> to vector<4x8x12x8xbf16>
    %6 = tpu.transpose %5, [0, 2, 1, 3] : vector<4x8x12x8xbf16> -> vector<4x12x8x8xbf16>
    %7 = vector.extract_strided_slice %6 {offsets = [0, 0, 0, 0], sizes = [4, 4, 8, 8], strides = [1, 1, 1, 1]} : vector<4x12x8x8xbf16> to vector<4x4x8x8xbf16>
    %8 = vector.shape_cast %7 : vector<4x4x8x8xbf16> to vector<16x8x8xbf16>
    %9 = vector.extract_strided_slice %6 {offsets = [0, 4, 0, 0], sizes = [4, 4, 8, 8], strides = [1, 1, 1, 1]} : vector<4x12x8x8xbf16> to vector<4x4x8x8xbf16>
    %10 = vector.shape_cast %9 : vector<4x4x8x8xbf16> to vector<16x8x8xbf16>
    %11 = vector.extract_strided_slice %6 {offsets = [0, 8, 0, 0], sizes = [4, 4, 8, 8], strides = [1, 1, 1, 1]} : vector<4x12x8x8xbf16> to vector<4x4x8x8xbf16>
    %12 = vector.shape_cast %11 : vector<4x4x8x8xbf16> to vector<16x8x8xbf16>
    "tpu.trace_start"() <{level = 10 : i32, message = "bqe,bke->bqk"}> : () -> ()
    %cst_3 = arith.constant dense<0.000000e+00> : vector<16x8x8xf32>
    %13 = tpu.matmul %8, %10, %cst_3 {dimension_numbers = #tpu.dot_dimension_numbers<[2], [2], [1], [1], [0, 0, 0, 1, 1, 1], [0], [0]>} : vector<16x8x8xbf16>, vector<16x8x8xbf16>, vector<16x8x8xf32> -> vector<16x8x8xf32>
    "tpu.trace_stop"() : () -> ()
    %cst_4 = arith.constant dense<0xFF800000> : vector<16x8xf32>
    %14 = vector.multi_reduction <maximumf>, %13, %cst_4 [2] : vector<16x8x8xf32> to vector<16x8xf32>
    %15 = vector.shape_cast %14 : vector<16x8xf32> to vector<16x8x1xf32>
    %16 = vector.broadcast %15 : vector<16x8x1xf32> to vector<16x8x8xf32>
    %17 = arith.subf %13, %16 : vector<16x8x8xf32>
    %18 = math.exp %17 : vector<16x8x8xf32>
    %cst_5 = arith.constant dense<0.000000e+00> : vector<16x8xf32>
    %19 = vector.multi_reduction <add>, %18, %cst_5 [2] : vector<16x8x8xf32> to vector<16x8xf32>
    %20 = vector.shape_cast %19 : vector<16x8xf32> to vector<16x8x1xf32>
    %21 = tpu.reciprocal %20 {approx = true} : vector<16x8x1xf32> -> vector<16x8x1xf32>
    %22 = arith.truncf %18 : vector<16x8x8xf32> to vector<16x8x8xbf16>
    "tpu.trace_start"() <{level = 10 : i32, message = "bqk,bke->bqe"}> : () -> ()
    %cst_6 = arith.constant dense<0.000000e+00> : vector<16x8x8xf32>
    %23 = tpu.matmul %22, %12, %cst_6 {dimension_numbers = #tpu.dot_dimension_numbers<[2], [1], [1], [2], [0, 0, 0, 1, 1, 2], [0], [0]>} : vector<16x8x8xbf16>, vector<16x8x8xbf16>, vector<16x8x8xf32> -> vector<16x8x8xf32>
    "tpu.trace_stop"() : () -> ()
    %24 = vector.broadcast %21 : vector<16x8x1xf32> to vector<16x8x8xf32>
    %25 = arith.mulf %23, %24 : vector<16x8x8xf32>
    %26 = arith.truncf %25 : vector<16x8x8xf32> to vector<16x8x8xbf16>
    %27 = vector.shape_cast %26 : vector<16x8x8xbf16> to vector<4x4x8x8xbf16>
    %28 = tpu.transpose %27, [0, 2, 1, 3] : vector<4x4x8x8xbf16> -> vector<4x8x4x8xbf16>
    %29 = vector.shape_cast %28 : vector<4x8x4x8xbf16> to vector<32x32xbf16>
    %c0_7 = arith.constant 0 : index
    %c0_8 = arith.constant 0 : index
    %30 = vector.load %arg3[%c0_7, %c0_8] : memref<32x32xbf16, #tpu.memory_space<vmem>>, vector<32x32xbf16>
    %cst_9 = arith.constant dense<0.000000e+00> : vector<32x32xf32>
    %31 = tpu.matmul %29, %30, %cst_9 {dimension_numbers = #tpu.dot_dimension_numbers<[1], [0], [0], [1], [0, 0, 1, 1], [], []>} : vector<32x32xbf16>, vector<32x32xbf16>, vector<32x32xf32> -> vector<32x32xf32>
    %c0_10 = arith.constant 0 : index
    %c0_11 = arith.constant 0 : index
    %32 = vector.load %arg4[%c0_10, %c0_11] : memref<1x32xf32, #tpu.memory_space<vmem>>, vector<1x32xf32>
    %33 = vector.broadcast %32 : vector<1x32xf32> to vector<32x32xf32>
    %34 = arith.addf %31, %33 : vector<32x32xf32>
    %c0_12 = arith.constant 0 : index
    %c0_13 = arith.constant 0 : index
    %35 = vector.load %arg5[%c0_12, %c0_13] : memref<32x32xf32, #tpu.memory_space<vmem>>, vector<32x32xf32>
    tpu.vector_store %arg5[%c0_12, %c0_13], %34 {strides = array<i32>} : memref<32x32xf32, #tpu.memory_space<vmem>>, vector<32x32xf32>,
    return
  }
  func.func @transform_0(%arg0: i32) -> (i32, i32) {
    %c0_i32 = arith.constant 0 : i32
    %c0_i32_0 = arith.constant 0 : i32
    return %arg0, %c0_i32 : i32, i32
  }
  func.func @transform_1(%arg0: i32) -> (i32, i32) {
    %c0_i32 = arith.constant 0 : i32
    %c0_i32_0 = arith.constant 0 : i32
    %c0_i32_1 = arith.constant 0 : i32
    return %c0_i32, %c0_i32_0 : i32, i32
  }
  func.func @transform_2(%arg0: i32) -> (i32, i32) {
    %c0_i32 = arith.constant 0 : i32
    %c0_i32_0 = arith.constant 0 : i32
    %c0_i32_1 = arith.constant 0 : i32
    return %c0_i32, %c0_i32_0 : i32, i32
  }
  func.func @transform_3(%arg0: i32) -> (i32, i32) {
    %c0_i32 = arith.constant 0 : i32
    %c0_i32_0 = arith.constant 0 : i32
    %c0_i32_1 = arith.constant 0 : i32
    return %c0_i32, %c0_i32_0 : i32, i32
  }
  func.func @transform_4(%arg0: i32) -> (i32, i32) {
    %c0_i32 = arith.constant 0 : i32
    %c0_i32_0 = arith.constant 0 : i32
    return %arg0, %c0_i32 : i32, i32
  }
}

</mosaic_0001>

<bundles_post_ra>
// kernel: tpu_custom_call.1
= control target key start
LH: loop header
LB: loop body
LE: loop exit
PB: predicated region body
PF: predicated region fallthrough
CT: control target
= control target key end

     0   :  { %s4547_s15 = smov 0   ;;  %s5403_s0 = inlined_call_operand.vmem [shape: f32[128,32], index: 0, kind: input, shape index: {}]   ;;  %s5404_s1 = inlined_call_operand.vmem [shape: bf16[32,96], index: 1, kind: input, shape index: {}]   ;;  %s5405_s2 = inlined_call_operand.vmem [shape: bf16[32,32], index: 2, kind: input, shape index: {}]   ;;  %s5406_s3 = inlined_call_operand.vmem [shape: f32[1,32], index: 3, kind: input, shape index: {}]   ;;  %s5407_s4 = inlined_call_operand.vmem [shape: f32[128,32], index: 4, kind: output, shape index: {}]  }
   0x1 LB: > { %s4036_s16 = sadd.s32 4294967295, %s4501_s15   ;;  %p4040_p0 = scmp.ge.s32.totalorder %s4501_s15, 1  ;;  %s4501_s15 = sphi %s4547_s15, %s14_s15  }
   0x2   : > { %p163_p1 = scmp.lt.s32.totalorder %s4501_s15, 5 }
   0x4   : > { %p164_p2 = pnand %p4040_p0, %p163_p1 }
   0x5   : > { %v4427_v0 = vld [vmem:[%s5404_s1] sm:$0xff] (!%p164_p2)   ;;  %s4041_s19 = sshll.u32 (!%p164_p2), %s4036_s16, 2  ;;  %v4428_v1 = vld [vmem:[%s5404_s1 + $0x8] sm:$0xff] (!%p164_p2)   ;;  %vm224_vm0 = vcmask (!%p164_p2), 261120   ;;  %s4503_s26 = smov (!%p164_p2), 104   ;;  %v4511_v14 = vmov (!%p164_p2), 0.0   ;;  %v435_v25 = vlaneseq (!%p164_p2) }
   0x6   : > { %167 = sbr.rel (%p164_p2) target bundleno = 1465 (0x5b9), region = 36  ;;  %p190_p3 = scmp.lt.s32.totalorder (!%p164_p2), %s4041_s19, 15  ;;  %4192 = vmatprep.subr.bf16.mxu0 (!%p164_p2), %v4427_v0  ;;  %4200 = vmatprep.subr.bf16.mxu1 (!%p164_p2), %v4511_v14  ;;  %vm4515_vm1 = vmmov (!%p164_p2), 0   ;;  %v4516_v23 = vmov (!%p164_p2), 1983009808   ;;  %vm1582_vm2 = vcmask (!%p164_p2), 64512  }
   0x7   : > { %4193 = vmatpush3.bf16.msra.mxu0 (!%p164_p2), %v4427_v0  ;;  %s4504_s27 = smov (!%p164_p2), 120   ;;  %s4505_s28 = smov (!%p164_p2), 96   ;;  %4202 = vmatprep.mubr.msk.bf16.mxu1 (!%p164_p2), %vm4515_vm1, %v4511_v14  ;;  %v433_v24 = vunpack.c.l.s4 (!%p164_p2), %v4516_v23  ;;  %v436_v32 = vshrl.u32 (!%p164_p2), %v435_v25, 7  ;;  %v4517_v38 = vmov (!%p164_p2), 1934713408   ;;  %vm2498_vm3 = vcmask (!%p164_p2), 1043456  }
   0x8   : > { %4194 = vmatprep.subr.bf16.mxu0 (!%p164_p2), %v4428_v1  ;;  %s4506_s29 = smov (!%p164_p2), 112   ;;  %s4507_s30 = smov (!%p164_p2), 80   ;;  %v495_v39 = vunpack.c.l.s4 (!%p164_p2), %v4517_v38  ;;  %vm3890_vm4 = vcmask (!%p164_p2), 130048   ;;  %vm3895_vm5 = vcmask (!%p164_p2), 195584  }
   0x9   : > { %s4508_s5 = smov (!%p164_p2), 88   ;;  %s4509_s6 = smov (!%p164_p2), 72   ;;  %v434_v31 = vunpack.c.0.s8 (!%p164_p2), %v433_v24 }
   0xa   : > { %s4510_s7 = smov (!%p164_p2), 64   ;;  %s4512_s8 = smov (!%p164_p2), 56   ;;  %v496_v54 = vunpack.c.0.s8 (!%p164_p2), %v495_v39 }
   0xb   : > { %4195 = vmatpush3.bf16.msra.mxu0 (!%p164_p2), %v4428_v1  ;;  %s4513_s9 = smov (!%p164_p2), 48   ;;  %s4514_s10 = smov (!%p164_p2), 40   ;;  %v4614_v47 = vsub.s32 (!%p164_p2), %v434_v31, %v436_v32 }
   0xc   : > { %4206 = vmatprep.subr.bf16.mxu0 (!%p164_p2), %v4511_v14  ;;  %v4624_v63 = vsub.s32 (!%p164_p2), %v496_v54, %v436_v32  ;;  %s4519_s11 = smov (!%p164_p2), 16   ;;  %s4520_s12 = smov (!%p164_p2), 8  }
   0xd   : > { %s5409_s19 = smov (!%p190_p3, %s4041_s19), 15  ;;  %s4521_s18 = smov 24  }
   0xe   : > { %s4042_s22 = sshll.u32 %s5409_s19, 3 }
   0xf   : > { %s193_s25 = scalar_lea.vmem %s5403_s0, %s4042_s22 }
  0x10   : > { %v202_v2 = vld [vmem:[%s193_s25] sm:$0xff]  ;;  %v203_v3 = vld [vmem:[%s193_s25 + $0x8] sm:$0xff]  ;;  %v204_v4 = vld [vmem:[%s193_s25 + $0x10] sm:$0xff] }
  0x11   : > { %v206_v5 = vpack.c.bf16 %v203_v3, %v202_v2  ;;  %v205_v6 = vld [vmem:[%s193_s25 + $0x18] sm:$0xff]  ;;  %s199_s25 = scalar_lea.vmem %s5407_s4, %s4042_s22 }
  0x12   : > { %v207_v7 = vpack.c.bf16 %v205_v6, %v204_v4 }
  0x13   : > { %4196 = vmatprep.mubr.msk.bf16.mxu0 %vm224_vm0, %v206_v5 }
  0x14   : > { %4197 = vmatmul.mubr.msk.bf16.vlgmr.msra.gmra.mrb[0].mxu0 %vm224_vm0, %v207_v7 }
  0x15   : > { %4208 = vmatprep.mubr.msk.bf16.mxu0 %vm4515_vm1, %v4511_v14 }
  0xe7   : > { %v4198_v8 = vpop.f32.mrb[0].mxu0 }
  0xe8   : > { %v265_v9 = vpop.f32.mrb[1].mxu0 }
  0xe9   : > { %v4199_v10 = vpop.f32.mrb[2].mxu0 }
  0xea   : > { %v4571_v11 = vpack.c.bf16 %v4199_v10, %v4198_v8  ;;  %v268_v12 = vpop.f32.mrb[3].mxu0 }
  0xeb   : > { %v4573_v13 = vpack.c.bf16 %v268_v12, %v265_v9 }
  0xec   : > { %v386_v10 = vshrl.u32 %v4571_v11, 16 }
  0xed   : > { %292 = vrot.lane.b32.xlu1 %v4573_v13, %s4503_s26  ;;  %284 = vrot.lane.b32.xlu0 %v4573_v13, %s4504_s27  ;;  %v332_v51 = vshrl.u32 %v4573_v13, 16 }
  0xf1   : > { %296 = vrot.lane.b32.xlu1 %v4573_v13, %s4505_s28  ;;  %288 = vrot.lane.b32.xlu0 %v4573_v13, %s4506_s29 }
  0xf5   : > { %304 = vrot.lane.b32.xlu1 %v4573_v13, %s4507_s30  ;;  %300 = vrot.lane.b32.xlu0 %v4573_v13, %s4508_s5 }
  0xf9   : > { %286 = vrot.lane.b32.xlu1 %v4571_v11, %s4504_s27  ;;  %308 = vrot.lane.b32.xlu0 %v4573_v13, %s4509_s6 }
  0xfd   : > { %294 = vrot.lane.b32.xlu1 %v4571_v11, %s4503_s26  ;;  %290 = vrot.lane.b32.xlu0 %v4571_v11, %s4506_s29 }
 0x101   : > { %302 = vrot.lane.b32.xlu1 %v4571_v11, %s4508_s5  ;;  %298 = vrot.lane.b32.xlu0 %v4571_v11, %s4505_s28 }
 0x105   : > { %310 = vrot.lane.b32.xlu1 %v4571_v11, %s4509_s6  ;;  %306 = vrot.lane.b32.xlu0 %v4571_v11, %s4507_s30 }
 0x109   : > { %314 = vrot.lane.b32.xlu1 %v4571_v11, %s4510_s7  ;;  %312 = vrot.lane.b32.xlu0 %v4573_v13, %s4510_s7 }
 0x10d   : > { %316 = vrot.lane.b32.xlu1 %v4573_v13, %s4512_s8  ;;  %320 = vrot.lane.b32.xlu0 %v4573_v13, %s4513_s9 }
 0x111   : > { %324 = vrot.lane.b32.xlu1 %v4573_v13, %s4514_s10 }
 0x15f   : > { %v293_v15 = vpop.permute.xlu1 %292  ;;  %v285_v16 = vpop.permute.xlu0 %284 }
 0x160   : > { %v330_v40 = vpack.i.b16 %v285_v16, %v4573_v13  ;;  %v341_v42 = vshrl.u32 %v293_v15, 16  ;;  %v333_v43 = vshrl.u32 %v285_v16, 16 }
 0x162   : > { %v334_v57 = vpack.i.b16 %v333_v43, %v332_v51 }
 0x163   : > { %v297_v17 = vpop.permute.xlu1 %296  ;;  %v289_v18 = vpop.permute.xlu0 %288 }
 0x164   : > { %v338_v30 = vpack.i.b16 %v293_v15, %v289_v18  ;;  %v340_v35 = vshrl.u32 %v289_v18, 16  ;;  %v348_v44 = vshrl.u32 %v297_v17, 16 }
 0x166   : > { %v342_v52 = vpack.i.b16 %v341_v42, %v340_v35 }
 0x167   : > { %v305_v19 = vpop.permute.xlu1 %304  ;;  %v301_v20 = vpop.permute.xlu0 %300 }
 0x168   : > { %v346_v33 = vpack.i.b16 %v301_v20, %v297_v17  ;;  %v356_v36 = vshrl.u32 %v305_v19, 16  ;;  %v349_v37 = vshrl.u32 %v301_v20, 16 }
 0x16a   : > { %v431_v48 = vcombine.high %v330_v40, %v346_v33  ;;  %v350_v53 = vpack.i.b16 %v349_v37, %v348_v44  ;;  %v430_v55 = vcombine.low %v330_v40, %v346_v33 }
 0x16b   : > { %v4603_v21 = vpop.permute.xlu1 %286  ;;  %v309_v22 = vpop.permute.xlu0 %308 }
 0x16c   : > { %v354_v28 = vpack.i.b16 %v309_v22, %v305_v19  ;;  %v357_v29 = vshrl.u32 %v309_v22, 16  ;;  %v445_v59 = vrot.slane %v431_v48, %v4614_v47  ;;  %v565_v62 = vcombine.high %v334_v57, %v350_v53 }
 0x16d   : > { %v438_v2 = vrot.slane %v430_v55, %v4614_v47  ;;  %v564_v3 = vcombine.low %v334_v57, %v350_v53  ;;  %v387_v12 = vshrl.u32 %v4603_v21, 16  ;;  %v4641_v25 = vpack.i.b16 %v4603_v21, %v4571_v11 }
 0x16e   : > { %v447_v41 = vcombine.high %v338_v30, %v354_v28  ;;  %v358_v45 = vpack.i.b16 %v357_v29, %v356_v36  ;;  %v446_v49 = vcombine.low %v338_v30, %v354_v28  ;;  %v579_v9 = vrot.slane %v565_v62, %v4614_v47 }
 0x16f   : > { %v4605_v26 = vpop.permute.xlu1 %294  ;;  %v4607_v27 = vpop.permute.xlu0 %290  ;;  %v572_v15 = vrot.slane %v564_v3, %v4614_v47  ;;  %v4518_v30 = vmov 0   ;;  %v4649_v32 = vpack.i.b16 %v387_v12, %v386_v10 }
 0x170   : > { %v461_v56 = vrot.slane %v447_v41, %v4614_v47  ;;  %v581_v58 = vcombine.high %v342_v52, %v358_v45  ;;  %v454_v60 = vrot.slane %v446_v49, %v4614_v47  ;;  %v580_v0 = vcombine.low %v342_v52, %v358_v45 }
 0x171   : > { %v395_v22 = vshrl.u32 %v4605_v26, 16  ;;  %v394_v23 = vshrl.u32 %v4607_v27, 16  ;;  %v4647_v31 = vpack.i.b16 %v4518_v30, %v4518_v30  ;;  %v4653_v36 = vpack.i.b16 %v4605_v26, %v4607_v27 }
 0x172   : > { %v508_v4 = vcombine.low %v445_v59, %v461_v56  ;;  %v509_v5 = vcombine.high %v445_v59, %v461_v56  ;;  %v595_v6 = vrot.slane %v581_v58, %v4614_v47  ;;  %v492_v7 = vcombine.low %v438_v2, %v454_v60 }
 0x173   : > { %v4609_v34 = vpop.permute.xlu1 %302  ;;  %v4612_v46 = vpop.permute.xlu0 %298  ;;  %v493_v8 = vcombine.high %v438_v2, %v454_v60  ;;  %v588_v13 = vrot.slane %v580_v0, %v4614_v47  ;;  %v4663_v42 = vpack.i.b16 %v395_v22, %v394_v23 }
 0x174   : > { %v516_v16 = vrot.slane %v508_v4, %v4624_v63  ;;  %v523_v17 = vrot.slane %v509_v5, %v4624_v63  ;;  %v642_v19 = vcombine.low %v579_v9, %v595_v6  ;;  %v643_v20 = vcombine.high %v579_v9, %v595_v6 }
 0x175   : > { %v500_v28 = vrot.slane %v492_v7, %v4624_v63  ;;  %v507_v29 = vrot.slane %v493_v8, %v4624_v63  ;;  %v626_v33 = vcombine.low %v572_v15, %v588_v13  ;;  %v627_v35 = vcombine.high %v572_v15, %v588_v13 }
 0x176   : > { %v4057_v37 = vcombine.low %v516_v16, %v523_v17  ;;  %v4059_v21 = vcombine.high %v516_v16, %v523_v17  ;;  %v400_v38 = vpack.i.b16 %v4609_v34, %v4612_v46  ;;  %v4658_v40 = vrot.slane %v642_v19, %v4624_v63 }
 0x177   : > { %v4616_v50 = vpop.permute.xlu1 %310  ;;  %v4626_v1 = vpop.permute.xlu0 %306  ;;  %v4661_v41 = vrot.slane %v643_v20, %v4624_v63  ;;  %v4049_v44 = vcombine.low %v500_v28, %v507_v29  ;;  %v403_v26 = vshrl.u32 %v4609_v34, 16  ;;  %v402_v27 = vshrl.u32 %v4612_v46, 16 }
 0x178   : > { %v634_v49 = vrot.slane %v626_v33, %v4624_v63  ;;  %v641_v51 = vrot.slane %v627_v35, %v4624_v63  ;;  %v4051_v52 = vcombine.high %v500_v28, %v507_v29  ;;  %v408_v53 = vpack.i.b16 %v4616_v50, %v4626_v1 }
 0x179   : > { %v4674_v55 = vrot.slane %v4057_v37, %v4614_v47  ;;  %v4677_v56 = vrot.slane %v4059_v21, %v4614_v47  ;;  %v698_v34 = vcombine.low %v4641_v25, %v400_v38  ;;  %v4061_v57 = vcombine.low %v4658_v40, %v4661_v41 }
 0x17a   : > { %v411_v58 = vshrl.u32 %v4616_v50, 16  ;;  %v404_v62 = vpack.i.b16 %v403_v26, %v402_v27  ;;  %v410_v0 = vshrl.u32 %v4626_v1, 16  ;;  %v4063_v4 = vcombine.high %v4658_v40, %v4661_v41 }
 0x17b   : > { %v4622_v61 = vpop.permute.xlu1 %314  ;;  %v313_v24 = vpop.permute.xlu0 %312  ;;  %v699_v5 = vcombine.high %v4641_v25, %v400_v38  ;;  %v714_v6 = vcombine.low %v4653_v36, %v408_v53  ;;  %v4698_v9 = vrot.slane %v4049_v44, %v4614_v47  ;;  %v4701_v1 = vrot.slane %v4051_v52, %v4614_v47 }
 0x17c   : > { %v364_v45 = vshrl.u32 %v313_v24, 16  ;;  %v4053_v13 = vcombine.low %v634_v49, %v641_v51  ;;  %v4055_v15 = vcombine.high %v634_v49, %v641_v51  ;;  %v1116_v16 = vcombine.low %v4674_v55, %v4677_v56 }
 0x17d   : > { %v832_v17 = vcombine.low %v4649_v32, %v404_v62  ;;  %v833_v20 = vcombine.high %v4649_v32, %v404_v62  ;;  %v715_v22 = vcombine.high %v4653_v36, %v408_v53  ;;  %v722_v25 = vrot.slane %v714_v6, %v4614_v47 }
 0x17e   : > { %v999_v33 = vcombine.high %v4698_v9, %v4701_v1  ;;  %v1033_v32 = vrot.slane %v4053_v13, %v4614_v47  ;;  %v1049_v36 = vrot.slane %v4055_v15, %v4614_v47  ;;  %v706_v21 = vrot.slane %v698_v34, %v4614_v47 }
 0x17f   : > { %v317_v18 = vpop.permute.xlu1 %316  ;;  %v321_v54 = vpop.permute.xlu0 %320  ;;  %v4728_v26 = vrot.slane %v699_v5, %v4614_v47  ;;  %v4731_v27 = vrot.slane %v715_v22, %v4614_v47  ;;  %v4746_v34 = vrot.slane %v833_v20, %v4614_v47  ;;  %v998_v13 = vcombine.low %v4698_v9, %v4701_v1 }
 0x180   : > { %v365_v39 = vshrl.u32 %v317_v18, 16  ;;  %v4665_v43 = vpack.i.b16 %v317_v18, %v313_v24  ;;  %v372_v2 = vshrl.u32 %v321_v54, 16  ;;  %v412_v18 = vpack.i.b16 %v411_v58, %v410_v0 }
 0x181   : > { %v760_v49 = vcombine.low %v706_v21, %v722_v25  ;;  %v1013_v58 = vrot.slane %v999_v33, %v4624_v63  ;;  %v761_v62 = vcombine.high %v706_v21, %v722_v25  ;;  %v777_v5 = vcombine.high %v4728_v26, %v4731_v27 }
 0x182   : > { %v4680_v46 = vpack.i.b16 %v365_v39, %v364_v45  ;;  %v462_v59 = vcombine.high %v4665_v43, %v4647_v31  ;;  %v848_v38 = vcombine.low %v4663_v42, %v412_v18  ;;  %v849_v51 = vcombine.high %v4663_v42, %v412_v18 }
 0x183   : > { %v325_v48 = vpop.permute.xlu1 %324  ;;  %v1057_v6 = vcombine.low %v1033_v32, %v1049_v36  ;;  %v469_v22 = vrot.slane %v4665_v43, %v4614_v47  ;;  %v1023_v25 = vcombine.high %v1013_v58, %v4518_v30  ;;  %v775_v43 = vrot.slane %v761_v62, %v4624_v63 }
 0x184   : > { %v370_v60 = vpack.i.b16 %v325_v48, %v321_v54  ;;  %v373_v3 = vshrl.u32 %v325_v48, 16  ;;  %v596_v50 = vcombine.high %v4680_v46, %v4647_v31  ;;  %v476_v10 = vrot.slane %v462_v59, %v4614_v47 }
 0x185   : > { %v840_v54 = vrot.slane %v832_v17, %v4614_v47  ;;  %v1058_v59 = vcombine.high %v1033_v32, %v1049_v36  ;;  %v856_v0 = vrot.slane %v848_v38, %v4614_v47  ;;  %v1453_v17 = vshrl.u32 %v1013_v58, 16 }
 0x186   : > { %v477_v7 = vcombine.high %v370_v60, %v4647_v31  ;;  %v4695_v8 = vpack.i.b16 %v373_v3, %v372_v2  ;;  %v610_v28 = vrot.slane %v596_v50, %v4614_v47  ;;  %v776_v3 = vcombine.low %v4728_v26, %v4731_v27 }
 0x187   : > { %v4760_v50 = vrot.slane %v760_v49, %v4624_v63  ;;  %v894_v20 = vcombine.low %v840_v54, %v856_v0  ;;  %v1006_v32 = vrot.slane %v998_v13, %v4624_v63  ;;  %v1459_v49 = vshrl.u32 %v1023_v25, 16 }
 0x188   : > { %v491_v12 = vrot.slane %v477_v7, %v4614_v47  ;;  %v611_v19 = vcombine.high %v4695_v8, %v4647_v31  ;;  %v1072_v7 = vrot.slane %v1058_v59, %v4624_v63  ;;  %v618_v38 = vrot.slane %v4695_v8, %v4614_v47 }
 0x189   : > { %v902_v36 = vrot.slane %v894_v20, %v4624_v63  ;;  %v1441_v8 = vshrl.u32 %v1006_v32, 16  ;;  %v4067_v20 = vcombine.high %v4760_v50, %v775_v43 }
 0x18a   : > { %v540_v23 = vcombine.low %v476_v10, %v491_v12  ;;  %v541_v24 = vcombine.high %v476_v10, %v491_v12  ;;  %v625_v29 = vrot.slane %v611_v19, %v4614_v47  ;;  %v4763_v10 = vrot.slane %v849_v51, %v4614_v47 }
 0x18b   : > { %v484_v12 = vrot.slane %v370_v60, %v4614_v47  ;;  %v1452_v15 = vpack.i.b16 %v1072_v7, %v1013_v58  ;;  %v1454_v18 = vshrl.u32 %v1072_v7, 16  ;;  %v1082_v19 = vcombine.high %v1072_v7, %v4518_v30 }
 0x18c   : > { %v4718_v35 = vrot.slane %v540_v23, %v4624_v63  ;;  %v4721_v37 = vrot.slane %v541_v24, %v4624_v63  ;;  %v674_v39 = vcombine.low %v610_v28, %v625_v29  ;;  %v675_v44 = vcombine.high %v610_v28, %v625_v29 }
 0x18d   : > { %v4775_v23 = vrot.slane %v4061_v57, %v4614_v47  ;;  %v4781_v60 = vrot.slane %v4063_v4, %v4614_v47  ;;  %v1587_v9 = vsel %vm1582_vm2, %v1452_v15, 0  ;;  %v1455_v1 = vpack.i.b16 %v1454_v18, %v1453_v17 }
 0x18e   : > { %v4058_v45 = vcombine.low %v4718_v35, %v4721_v37  ;;  %v4060_v48 = vcombine.high %v4718_v35, %v4721_v37  ;;  %v4739_v52 = vrot.slane %v674_v39, %v4624_v63  ;;  %v4742_v53 = vrot.slane %v675_v44, %v4624_v63  ;;  %4201 = vmatpush3.bf16.xpose.msra.mxu1 %v1587_v9 }
 0x18f   : > { %v1065_v24 = vrot.slane %v1057_v6, %v4624_v63  ;;  %v895_v28 = vcombine.high %v840_v54, %v856_v0  ;;  %v524_v29 = vcombine.low %v469_v22, %v484_v12  ;;  %v525_v33 = vcombine.high %v469_v22, %v484_v12  ;;  %4212 = vmatprep.subr.bf16.mxu1 %v4511_v14 }
 0x190   : > { %v4062_v42 = vcombine.low %v4739_v52, %v4742_v53  ;;  %v4064_v2 = vcombine.high %v4739_v52, %v4742_v53  ;;  %v1633_v57 = vsel %vm1582_vm2, %v1455_v1, 0  ;;  %v1460_v40 = vshrl.u32 %v1082_v19, 16 }
 0x191   : > { %v1176_v41 = vcombine.high %v4775_v23, %v4781_v60  ;;  %v4793_v4 = vrot.slane %v776_v3, %v4624_v63  ;;  %v910_v21 = vcombine.low %v4746_v34, %v4763_v10  ;;  %4207 = vmatpush3.bf16.xpose.msra.mxu0 %v1633_v57  ;;  %v1458_v39 = vpack.i.b16 %v1082_v19, %v1023_v25 }
 0x192   : > { %v1442_v44 = vshrl.u32 %v1065_v24, 16  ;;  %4218 = vmatprep.subr.bf16.mxu0 %v4511_v14  ;;  %v1117_v51 = vcombine.high %v4674_v55, %v4677_v56  ;;  %v909_v54 = vrot.slane %v895_v28, %v4624_v63  ;;  %v603_v58 = vrot.slane %v4680_v46, %v4614_v47 }
 0x193   : > { %v532_v59 = vrot.slane %v524_v29, %v4624_v63  ;;  %v539_v62 = vrot.slane %v525_v33, %v4624_v63  ;;  %v1440_v0 = vpack.i.b16 %v1065_v24, %v1006_v32  ;;  %v1461_v3 = vpack.i.b16 %v1460_v40, %v1459_v49 }
 0x194   : > { %v1190_v6 = vrot.slane %v1176_v41, %v4624_v63  ;;  %v911_v7 = vcombine.high %v4746_v34, %v4763_v10  ;;  %v4065_v12 = vcombine.low %v4760_v50, %v775_v43  ;;  %v658_v13 = vcombine.low %v603_v58, %v618_v38 }
 0x195   : > { %v659_v15 = vcombine.high %v603_v58, %v618_v38  ;;  %4203 = vmatmul.mubr.msk.bf16.vlgmr.msra.gmra.mrb[0].mxu1 %vm1582_vm2, %v1440_v0  ;;  %v1679_v46 = vsel %vm1582_vm2, %v1458_v39, 0  ;;  %v1443_v17 = vpack.i.b16 %v1442_v44, %v1441_v8  ;;  %v1081_v18 = vcombine.high %v1065_v24, %v4518_v30 }
 0x196   : > { %v1131_v19 = vrot.slane %v1117_v51, %v4624_v63  ;;  %v4069_v22 = vcombine.low %v902_v36, %v909_v54  ;;  %v4071_v9 = vcombine.high %v902_v36, %v909_v54  ;;  %4213 = vmatpush3.bf16.xpose.msra.mxu1 %v1679_v46  ;;  %4214 = vmatprep.mubr.msk.bf16.mxu1 %vm4515_vm1, %v4511_v14  ;;  %v1725_v25 = vsel %vm1582_vm2, %v1461_v3, 0 }
 0x197   : > { %v4050_v1 = vcombine.low %v532_v59, %v539_v62  ;;  %v1022_v28 = vcombine.high %v1006_v32, %v4518_v30  ;;  %4224 = vmatprep.subr.bf16.mxu1 %v4511_v14  ;;  %v1490_v24 = vshrl.u32 %v1190_v6, 16  ;;  %v666_v29 = vrot.slane %v658_v13, %v4624_v63 }
 0x198   : > { %4209 = vmatmul.mubr.msk.bf16.vlgmr.msra.gmra.mrb[4].mxu0 %vm1582_vm2, %v1443_v17  ;;  %v673_v50 = vrot.slane %v659_v15, %v4624_v63  ;;  %v4052_v43 = vcombine.high %v532_v59, %v539_v62  ;;  %v1175_v33 = vcombine.low %v4775_v23, %v4781_v60  ;;  %v1488_v57 = vpack.i.b16 %v1190_v6, %v1131_v19 }
 0x199   : > { %4219 = vmatpush3.bf16.xpose.msra.mxu0 %v1725_v25  ;;  %4220 = vmatprep.mubr.msk.bf16.mxu0 %vm4515_vm1, %v4511_v14  ;;  %v1448_v40 = vshrl.u32 %v1081_v18, 16  ;;  %v1489_v32 = vshrl.u32 %v1131_v19, 16  ;;  %v4831_v41 = vrot.slane %v4065_v12, %v4614_v47  ;;  %v4834_v36 = vrot.slane %v4067_v20, %v4614_v47 }
 0x19a   : > { %4230 = vmatprep.subr.bf16.mxu0 %v4511_v14  ;;  %v4837_v38 = vrot.slane %v4069_v22, %v4614_v47  ;;  %v4840_v39 = vrot.slane %v4071_v9, %v4614_v47  ;;  %v1446_v44 = vpack.i.b16 %v1081_v18, %v1022_v28  ;;  %v1447_v49 = vshrl.u32 %v1022_v28, 16 }
 0x19b   : > { %v1491_v23 = vpack.i.b16 %v1490_v24, %v1489_v32  ;;  %v1200_v60 = vcombine.high %v1190_v6, %v4518_v30  ;;  %v981_v51 = vrot.slane %v4050_v1, %v4614_v47  ;;  %v997_v54 = vrot.slane %v4052_v43, %v4614_v47 }
 0x19c   : > { %v4054_v58 = vcombine.low %v666_v29, %v673_v50  ;;  %v4056_v59 = vcombine.high %v666_v29, %v673_v50  ;;  %v1771_v62 = vsel %vm1582_vm2, %v1488_v57, 0  ;;  %v1449_v0 = vpack.i.b16 %v1448_v40, %v1447_v49 }
 0x19d   : > { %4215 = vmatmul.mubr.msk.bf16.vlgmr.msra.gmra.mrb[4].mxu1 %vm1582_vm2, %v1446_v44  ;;  %v1183_v8 = vrot.slane %v1175_v33, %v4624_v63  ;;  %v1141_v3 = vcombine.high %v1131_v19, %v4518_v30  ;;  %v4853_v6 = vrot.slane %v777_v5, %v4624_v63  ;;  %v1124_v12 = vrot.slane %v1116_v16, %v4624_v63 }
 0x19e   : > { %4225 = vmatpush3.bf16.xpose.msra.mxu1 %v1771_v62  ;;  %4226 = vmatprep.mubr.msk.bf16.mxu1 %vm4515_vm1, %v4511_v14  ;;  %v1294_v13 = vcombine.high %v4837_v38, %v4840_v39  ;;  %v918_v15 = vrot.slane %v910_v21, %v4624_v63  ;;  %v925_v26 = vrot.slane %v911_v7, %v4624_v63  ;;  %v1817_v27 = vsel %vm1582_vm2, %v1491_v23, 0 }
 0x19f   : > { %4236 = vmatprep.subr.bf16.mxu1 %v4511_v14  ;;  %v1496_v5 = vshrl.u32 %v1200_v60, 16  ;;  %v1040_v55 = vrot.slane %v4054_v58, %v4614_v47  ;;  %v1056_v56 = vrot.slane %v4056_v59, %v4614_v47  ;;  %v1235_v16 = vcombine.high %v4831_v41, %v4834_v36 }
 0x1a0   : > { %4221 = vmatmul.mubr.msk.bf16.vlgmr.msra.gmra.mrb[8].mxu0 %vm1582_vm2, %v1449_v0  ;;  %v1494_v34 = vpack.i.b16 %v1200_v60, %v1141_v3  ;;  %v1478_v10 = vshrl.u32 %v1183_v8, 16  ;;  %v1495_v21 = vshrl.u32 %v1141_v3, 16  ;;  %v1014_v7 = vcombine.low %v981_v51, %v997_v54 }
 0x1a1   : > { %4231 = vmatpush3.bf16.xpose.msra.mxu0 %v1817_v27  ;;  %4232 = vmatprep.mubr.msk.bf16.mxu0 %vm4515_vm1, %v4511_v14  ;;  %v4073_v46 = vcombine.low %v4793_v4, %v4853_v6  ;;  %v4075_v17 = vcombine.high %v4793_v4, %v4853_v6  ;;  %v1477_v18 = vshrl.u32 %v1124_v12, 16  ;;  %v1308_v19 = vrot.slane %v1294_v13, %v4624_v63 }
 0x1a2   : > { %4242 = vmatprep.subr.bf16.mxu0 %v4511_v14  ;;  %v1476_v20 = vpack.i.b16 %v1183_v8, %v1124_v12  ;;  %v1497_v22 = vpack.i.b16 %v1496_v5, %v1495_v21  ;;  %v1140_v9 = vcombine.high %v1124_v12, %v4518_v30  ;;  %v1199_v1 = vcombine.high %v1183_v8, %v4518_v30 }
 0x1a3   : > { %v4077_v25 = vcombine.low %v918_v15, %v925_v26  ;;  %v1249_v28 = vrot.slane %v1235_v16, %v4624_v63  ;;  %v4887_v24 = vrot.slane %v1014_v7, %v4624_v63  ;;  %v1073_v29 = vcombine.low %v1040_v55, %v1056_v56 }
 0x1a4   : > { %v1099_v4 = vrot.slane %v4058_v45, %v4614_v47  ;;  %v1115_v50 = vrot.slane %v4060_v48, %v4614_v47  ;;  %v1863_v43 = vsel %vm1582_vm2, %v1494_v34, 0  ;;  %v1479_v33 = vpack.i.b16 %v1478_v10, %v1477_v18 }
 0x1a5   : > { %4227 = vmatmul.mubr.msk.bf16.vlgmr.msra.gmra.mrb[8].mxu1 %vm1582_vm2, %v1476_v20  ;;  %v1234_v57 = vcombine.low %v4831_v41, %v4834_v36  ;;  %v4079_v40 = vcombine.high %v918_v15, %v925_v26  ;;  %v1526_v32 = vshrl.u32 %v1308_v19, 16  ;;  %v4904_v45 = vrot.slane %v1073_v29, %v4624_v63 }
 0x1a6   : > { %4237 = vmatpush3.bf16.xpose.msra.mxu1 %v1863_v43  ;;  %4238 = vmatprep.mubr.msk.bf16.mxu1 %vm4515_vm1, %v4511_v14  ;;  %v1909_v35 = vsel %vm1582_vm2, %v1497_v22, 0  ;;  %v1482_v37 = vpack.i.b16 %v1199_v1, %v1140_v9  ;;  %v1293_v48 = vcombine.low %v4837_v38, %v4840_v39  ;;  %v1483_v41 = vshrl.u32 %v1140_v9, 16 }
 0x1a7   : > { %4248 = vmatprep.subr.bf16.mxu1 %v4511_v14  ;;  %v1484_v36 = vshrl.u32 %v1199_v1, 16  ;;  %v1525_v44 = vshrl.u32 %v1249_v28, 16  ;;  %v4914_v49 = vrot.slane %v4077_v25, %v4614_v47  ;;  %v4918_v23 = vcombine.high %v4887_v24, %v4518_v30 }
 0x1a8   : > { %4233 = vmatmul.mubr.msk.bf16.vlgmr.msra.gmra.mrb[12].mxu0 %vm1582_vm2, %v1479_v33  ;;  %v1524_v60 = vpack.i.b16 %v1308_v19, %v1249_v28  ;;  %v4923_v38 = vcombine.high %v4904_v45, %v4518_v30  ;;  %v1132_v39 = vcombine.low %v1099_v4, %v1115_v50  ;;  %v1158_v51 = vrot.slane %v4062_v42, %v4614_v47 }
 0x1a9   : > { %4243 = vmatpush3.bf16.xpose.msra.mxu0 %v1909_v35  ;;  %4244 = vmatprep.mubr.msk.bf16.mxu0 %vm4515_vm1, %v4511_v14  ;;  %v1527_v54 = vpack.i.b16 %v1526_v32, %v1525_v44  ;;  %v1318_v58 = vcombine.high %v1308_v19, %v4518_v30  ;;  %v4931_v59 = vrot.slane %v4079_v40, %v4614_v47  ;;  %v1471_v8 = vshrl.u32 %v4918_v23, 16 }
 0x1aa   : > { %4254 = vmatprep.subr.bf16.mxu0 %v4511_v14  ;;  %v1174_v62 = vrot.slane %v4064_v2, %v4614_v47  ;;  %v1470_v0 = vpack.i.b16 %v4923_v38, %v4918_v23  ;;  %v1472_v3 = vshrl.u32 %v4923_v38, 16  ;;  %v4942_v42 = vrot.slane %v1132_v39, %v4624_v63 }
 0x1ab   : > { %v4945_v6 = vrot.slane %v4073_v46, %v4614_v47  ;;  %v4948_v12 = vrot.slane %v4075_v17, %v4614_v47  ;;  %v1259_v13 = vcombine.high %v1249_v28, %v4518_v30  ;;  %v1955_v53 = vsel %vm1582_vm2, %v1524_v60, 0 }
 0x1ac   : > { %v1191_v52 = vcombine.low %v1158_v51, %v1174_v62  ;;  %v1485_v2 = vpack.i.b16 %v1484_v36, %v1483_v41  ;;  %v1301_v15 = vrot.slane %v1293_v48, %v4624_v63  ;;  %v4954_v26 = vpack.i.b16 %v1472_v3, %v1471_v8 }
 0x1ad   : > { %4239 = vmatmul.mubr.msk.bf16.vlgmr.msra.gmra.mrb[12].mxu1 %vm1582_vm2, %v1482_v37  ;;  %v4963_v5 = vcombine.high %v4942_v42, %v4518_v30  ;;  %v2001_v55 = vsel %vm1582_vm2, %v1527_v54, 0  ;;  %v1242_v56 = vrot.slane %v1234_v57, %v4624_v63  ;;  %v1532_v16 = vshrl.u32 %v1318_v58, 16 }
 0x1ae   : > { %4249 = vmatpush3.bf16.xpose.msra.mxu1 %v1955_v53  ;;  %4250 = vmatprep.mubr.msk.bf16.mxu1 %vm4515_vm1, %v4511_v14  ;;  %v4959_v27 = vrot.slane %v1191_v52, %v4624_v63  ;;  %v1412_v34 = vcombine.high %v4914_v49, %v4931_v59  ;;  %v1501_v21 = vshrl.u32 %v4942_v42, 16  ;;  %v1530_v17 = vpack.i.b16 %v1318_v58, %v1259_v13 }
 0x1af   : > { %4260 = vmatprep.subr.bf16.mxu1 %v4511_v14  ;;  %v1514_v18 = vshrl.u32 %v1301_v15, 16  ;;  %v1531_v19 = vshrl.u32 %v1259_v13, 16  ;;  %v1353_v20 = vcombine.high %v4945_v6, %v4948_v12  ;;  %v1507_v1 = vshrl.u32 %v4963_v5, 16 }
 0x1b0   : > { %4245 = vmatmul.mubr.msk.bf16.vlgmr.msra.gmra.mrb[16].mxu0 %vm1582_vm2, %v1485_v2  ;;  %v1500_v10 = vpack.i.b16 %v4959_v27, %v4942_v42  ;;  %v1502_v7 = vshrl.u32 %v4959_v27, 16  ;;  %v4979_v46 = vcombine.high %v4959_v27, %v4518_v30  ;;  %v1512_v28 = vpack.i.b16 %v1301_v15, %v1242_v56 }
 0x1b1   : > { %4255 = vmatpush3.bf16.xpose.msra.mxu0 %v2001_v55  ;;  %4256 = vmatprep.mubr.msk.bf16.mxu0 %vm4515_vm1, %v4511_v14  ;;  %v1513_v29 = vshrl.u32 %v1242_v56, 16  ;;  %v1533_v4 = vpack.i.b16 %v1532_v16, %v1531_v19  ;;  %v1426_v50 = vrot.slane %v1412_v34, %v4624_v63  ;;  %v2047_v33 = vsel %vm1582_vm2, %v1530_v17, 0 }
 0x1b2   : > { %4266 = vmatprep.subr.bf16.mxu0 %v4511_v14  ;;  %v4984_v22 = vpack.i.b16 %v1502_v7, %v1501_v21  ;;  %v1506_v9 = vpack.i.b16 %v4979_v46, %v4963_v5  ;;  %v1508_v25 = vshrl.u32 %v4979_v46, 16  ;;  %v1317_v40 = vcombine.high %v1301_v15, %v4518_v30 }
 0x1b3   : > { %v1515_v57 = vpack.i.b16 %v1514_v18, %v1513_v29  ;;  %v1367_v32 = vrot.slane %v1353_v20, %v4624_v63  ;;  %v2093_v35 = vsel %vm1582_vm2, %v1533_v4, 0  ;;  %v1258_v37 = vcombine.high %v1242_v56, %v4518_v30 }
 0x1b4   : > { %v4991_v43 = vpack.i.b16 %v1508_v25, %v1507_v1  ;;  %v1562_v48 = vshrl.u32 %v1426_v50, 16  ;;  %v1411_v41 = vcombine.low %v4914_v49, %v4931_v59  ;;  %v1520_v44 = vshrl.u32 %v1317_v40, 16 }
 0x1b5   : > { %4251 = vmatmul.mubr.msk.bf16.vlgmr.msra.gmra.mrb[16].mxu1 %vm1582_vm2, %v1512_v28  ;;  %v1560_v36 = vpack.i.b16 %v1426_v50, %v1367_v32  ;;  %v1561_v60 = vshrl.u32 %v1367_v32, 16  ;;  %v1352_v39 = vcombine.low %v4945_v6, %v4948_v12  ;;  %v1518_v51 = vpack.i.b16 %v1317_v40, %v1258_v37 }
 0x1b6   : > { %4261 = vmatpush3.bf16.xpose.msra.mxu1 %v2047_v33  ;;  %4262 = vmatprep.mubr.msk.bf16.mxu1 %vm4515_vm1, %v4511_v14  ;;  %v1519_v54 = vshrl.u32 %v1258_v37, 16  ;;  %v1436_v62 = vcombine.high %v1426_v50, %v4518_v30  ;;  %v1419_v49 = vrot.slane %v1411_v41, %v4624_v63  ;;  %v1377_v59 = vcombine.high %v1367_v32, %v4518_v30 }
 0x1b7   : > { %4272 = vmatprep.subr.bf16.mxu1 %v4511_v14  ;;  %v1563_v58 = vpack.i.b16 %v1562_v48, %v1561_v60  ;;  %v2139_v8 = vsel %vm1582_vm2, %v1560_v36, 0  ;;  %v1360_v12 = vrot.slane %v1352_v39, %v4624_v63  ;;  %v1466_v18 = vshrl.u32 %v4904_v45, 16 }
 0x1b8   : > { %4257 = vmatmul.mubr.msk.bf16.vlgmr.msra.gmra.mrb[20].mxu0 %vm1582_vm2, %v1515_v57  ;;  %v1521_v3 = vpack.i.b16 %v1520_v44, %v1519_v54  ;;  %v1568_v13 = vshrl.u32 %v1436_v62, 16  ;;  %v1566_v52 = vpack.i.b16 %v1436_v62, %v1377_v59  ;;  %v1550_v53 = vshrl.u32 %v1419_v49, 16 }
 0x1b9   : > { %4267 = vmatpush3.bf16.xpose.msra.mxu0 %v2093_v35  ;;  %4268 = vmatprep.mubr.msk.bf16.mxu0 %vm4515_vm1, %v4511_v14  ;;  %v2185_v6 = vsel %vm1582_vm2, %v1563_v58, 0  ;;  %v1567_v2 = vshrl.u32 %v1377_v59, 16  ;;  %v1548_v15 = vpack.i.b16 %v1419_v49, %v1360_v12  ;;  %v1549_v55 = vshrl.u32 %v1360_v12, 16 }
 0x1ba   : > { %4278 = vmatprep.subr.bf16.mxu0 %v4511_v14  ;;  %v2231_v16 = vsel %vm1582_vm2, %v1566_v52, 0  ;;  %v1435_v21 = vcombine.high %v1419_v49, %v4518_v30  ;;  %v1376_v17 = vcombine.high %v1360_v12, %v4518_v30  ;;  %v1464_v19 = vpack.i.b16 %v4904_v45, %v4887_v24 }
 0x1bb   : > { %v1569_v56 = vpack.i.b16 %v1568_v13, %v1567_v2  ;;  %v1551_v34 = vpack.i.b16 %v1550_v53, %v1549_v55  ;;  %v1465_v1 = vshrl.u32 %v4887_v24, 16  ;;  %v2822_v5 = vsel %vm2498_vm3, %v4991_v43, 0 }
 0x1bc   : > { %v1556_v20 = vshrl.u32 %v1435_v21, 16  ;;  %v1554_v25 = vpack.i.b16 %v1435_v21, %v1376_v17  ;;  %v1555_v28 = vshrl.u32 %v1376_v17, 16  ;;  %v2500_v4 = vsel %vm2498_vm3, %v1464_v19, 0 }
 0x1bd   : > { %4263 = vmatmul.mubr.msk.bf16.vlgmr.msra.gmra.mrb[20].mxu1 %vm1582_vm2, %v1518_v51  ;;  %v2277_v7 = vsel %vm1582_vm2, %v1569_v56, 0  ;;  %v1467_v29 = vpack.i.b16 %v1466_v18, %v1465_v1 }
 0x1be   : > { %4273 = vmatpush3.bf16.xpose.msra.mxu1 %v2139_v8  ;;  %4274 = vmatprep.mubr.msk.bf16.mxu1 %vm4515_vm1, %v4511_v14  ;;  %v1557_v50 = vpack.i.b16 %v1556_v20, %v1555_v28 }
 0x1bf   : > { %4284 = vmatprep.subr.bf16.mxu1 %v4511_v14  ;;  %v2546_v45 = vsel %vm2498_vm3, %v1467_v29, 0 }
 0x1c0   : > { %4269 = vmatmul.mubr.msk.bf16.vlgmr.msra.gmra.mrb[24].mxu0 %vm1582_vm2, %v1521_v3 }
 0x1c1   : > { %4279 = vmatpush3.bf16.xpose.msra.mxu0 %v2185_v6  ;;  %4280 = vmatprep.mubr.msk.bf16.mxu0 %vm4515_vm1, %v4511_v14 }
 0x1c2   : > { %4290 = vmatprep.subr.bf16.mxu0 %v4511_v14 }
 0x1c5   : > { %4275 = vmatmul.mubr.msk.bf16.vlgmr.msra.gmra.mrb[24].mxu1 %vm1582_vm2, %v1548_v15 }
 0x1c6   : > { %4285 = vmatpush3.bf16.xpose.msra.mxu1 %v2231_v16  ;;  %4286 = vmatprep.mubr.msk.bf16.mxu1 %vm4515_vm1, %v4511_v14 }
 0x1c7   : > { %4296 = vmatprep.subr.bf16.mxu1 %v4511_v14 }
 0x1c8   : > { %4281 = vmatmul.mubr.msk.bf16.vlgmr.msra.gmra.mrb[28].mxu0 %vm1582_vm2, %v1551_v34 }
 0x1c9   : > { %4291 = vmatpush3.bf16.xpose.msra.mxu0 %v2277_v7  ;;  %4292 = vmatprep.mubr.msk.bf16.mxu0 %vm4515_vm1, %v4511_v14 }
 0x1ca   : > { %4302 = vmatprep.subr.bf16.mxu0 %v4511_v14 }
 0x1cd   : > { %4287 = vmatmul.mubr.msk.bf16.vlgmr.msra.gmra.mrb[28].mxu1 %vm1582_vm2, %v1554_v25 }
 0x1ce   : > { %4297 = vmatpush3.bf16.msra.mxu1 %v2500_v4  ;;  %4298 = vmatprep.mubr.msk.bf16.mxu1 %vm4515_vm1, %v4511_v14 }
 0x1cf   : > { %4308 = vmatprep.subr.bf16.mxu1 %v4511_v14 }
 0x1d0   : > { %4293 = vmatmul.mubr.msk.bf16.vlgmr.msra.gmra.mrb[32].mxu0 %vm1582_vm2, %v1557_v50 }
 0x1d1   : > { %4303 = vmatpush3.bf16.msra.mxu0 %v2546_v45  ;;  %4304 = vmatprep.mubr.msk.bf16.mxu0 %vm4515_vm1, %v4511_v14 }
 0x1d2   : > { %4314 = vmatprep.subr.bf16.mxu0 %v4511_v14 }
 0x268   : > { %v5050_v24 = vpop.f32.mrb[0].mxu1 }
 0x269   : > { %v4204_v33 = vpop.f32.mrb[1].mxu1  ;;  %v2319_v57 = vsel %vm1582_vm2, %v5050_v24, -inf }
 0x26a   : > { %2320 = vmax.xlane.f32.xlu0 %v2319_v57  ;;  %v1626_v32 = vpop.f32.mrb[2].mxu1 }
 0x26b   : > { %v5054_v40 = vpop.f32.mrb[4].mxu0  ;;  %v4205_v35 = vpop.f32.mrb[3].mxu1 }
 0x26c   : > { %v4210_v37 = vpop.f32.mrb[5].mxu0  ;;  %v2322_v48 = vsel %vm1582_vm2, %v5054_v40, -inf }
 0x26d   : > { %2323 = vmax.xlane.f32.xlu1 %v2322_v48  ;;  %v1672_v41 = vpop.f32.mrb[6].mxu0 }
 0x26e   : > { %v4211_v36 = vpop.f32.mrb[7].mxu0 }
 0x270   : > { %v5058_v44 = vpop.f32.mrb[4].mxu1 }
 0x271   : > { %v4216_v60 = vpop.f32.mrb[5].mxu1  ;;  %v2325_v39 = vsel %vm1582_vm2, %v5058_v44, -inf }
 0x272   : > { %2326 = vmax.xlane.f32.xlu0 %v2325_v39  ;;  %v1718_v54 = vpop.f32.mrb[6].mxu1 }
 0x273   : > { %v5062_v51 = vpop.f32.mrb[8].mxu0  ;;  %v4217_v58 = vpop.f32.mrb[7].mxu1 }
 0x274   : > { %v4222_v62 = vpop.f32.mrb[9].mxu0  ;;  %v2328_v8 = vsel %vm1582_vm2, %v5062_v51, -inf }
 0x275   : > { %2329 = vmax.xlane.f32.xlu1 %v2328_v8  ;;  %v1764_v3 = vpop.f32.mrb[10].mxu0 }
 0x276   : > { %v4223_v49 = vpop.f32.mrb[11].mxu0 }
 0x278   : > { %v5066_v59 = vpop.f32.mrb[8].mxu1 }
 0x279   : > { %v4228_v6 = vpop.f32.mrb[9].mxu1  ;;  %v2331_v12 = vsel %vm1582_vm2, %v5066_v59, -inf }
 0x27a   : > { %2332 = vmax.xlane.f32.xlu0 %v2331_v12  ;;  %v1810_v52 = vpop.f32.mrb[10].mxu1 }
 0x27b   : > { %v5070_v13 = vpop.f32.mrb[12].mxu0  ;;  %v4229_v53 = vpop.f32.mrb[11].mxu1 }
 0x27c   : > { %v4234_v2 = vpop.f32.mrb[13].mxu0  ;;  %v2334_v56 = vsel %vm1582_vm2, %v5070_v13, -inf }
 0x27d   : > { %v1856_v15 = vpop.f32.mrb[14].mxu0 }
 0x27e   : > { %v4235_v55 = vpop.f32.mrb[15].mxu0  ;;  %2335 = vmax.xlane.f32.xlu0 %v2334_v56 }
 0x280   : > { %v5074_v16 = vpop.f32.mrb[12].mxu1 }
 0x281   : > { %v4240_v34 = vpop.f32.mrb[13].mxu1  ;;  %v2337_v21 = vsel %vm1582_vm2, %v5074_v16, -inf }
 0x282   : > { %2338 = vmax.xlane.f32.xlu1 %v2337_v21  ;;  %v1902_v17 = vpop.f32.mrb[14].mxu1 }
 0x283   : > { %v5078_v7 = vpop.f32.mrb[16].mxu0  ;;  %v4241_v18 = vpop.f32.mrb[15].mxu1 }
 0x284   : > { %v4246_v19 = vpop.f32.mrb[17].mxu0  ;;  %v2340_v20 = vsel %vm1582_vm2, %v5078_v7, -inf }
 0x285   : > { %v1948_v1 = vpop.f32.mrb[18].mxu0  ;;  %2341 = vmax.xlane.f32.xlu0 %v2340_v20 }
 0x286   : > { %v4247_v25 = vpop.f32.mrb[19].mxu0 }
 0x288   : > { %v5082_v28 = vpop.f32.mrb[16].mxu1 }
 0x289   : > { %v4252_v29 = vpop.f32.mrb[17].mxu1  ;;  %v2343_v4 = vsel %vm1582_vm2, %v5082_v28, -inf }
 0x28a   : > { %2344 = vmax.xlane.f32.xlu1 %v2343_v4  ;;  %v1994_v45 = vpop.f32.mrb[18].mxu1 }
 0x28b   : > { %v5086_v50 = vpop.f32.mrb[20].mxu0  ;;  %v4253_v33 = vpop.f32.mrb[19].mxu1 }
 0x28c   : > { %v4258_v57 = vpop.f32.mrb[21].mxu0  ;;  %v2346_v32 = vsel %vm1582_vm2, %v5086_v50, -inf }
 0x28d   : > { %v2040_v35 = vpop.f32.mrb[22].mxu0  ;;  %2347 = vmax.xlane.f32.xlu0 %v2346_v32 }
 0x28e   : > { %v4259_v37 = vpop.f32.mrb[23].mxu0 }
 0x290   : > { %v5090_v48 = vpop.f32.mrb[20].mxu1 }
 0x291   : > { %v4264_v41 = vpop.f32.mrb[21].mxu1  ;;  %v2349_v20 = vsel %vm1582_vm2, %v5090_v48, -inf }
 0x292   : > { %v2086_v36 = vpop.f32.mrb[22].mxu1 }
 0x293   : > { %v5092_v60 = vpop.f32.mrb[24].mxu0  ;;  %v4265_v39 = vpop.f32.mrb[23].mxu1 }
 0x294   : > { %v4270_v54 = vpop.f32.mrb[25].mxu0  ;;  %v2352_v1 = vsel %vm1582_vm2, %v5092_v60, -inf }
 0x295   : > { %v2132_v58 = vpop.f32.mrb[26].mxu0 }
 0x296   : > { %v4271_v62 = vpop.f32.mrb[27].mxu0 }
 0x298   : > { %v5094_v8 = vpop.f32.mrb[24].mxu1 }
 0x299   : > { %v4276_v3 = vpop.f32.mrb[25].mxu1  ;;  %v2355_v25 = vsel %vm1582_vm2, %v5094_v8, -inf }
 0x29a   : > { %v2178_v49 = vpop.f32.mrb[26].mxu1 }
 0x29b   : > { %v5096_v6 = vpop.f32.mrb[28].mxu0  ;;  %322 = vrot.lane.b32.xlu1 %v4571_v11, %s4513_s9  ;;  %v4277_v52 = vpop.f32.mrb[27].mxu1 }
 0x29c   : > { %v4282_v12 = vpop.f32.mrb[29].mxu0  ;;  %v2358_v29 = vsel %vm1582_vm2, %v5096_v6, -inf }
 0x29d   : > { %v2224_v53 = vpop.f32.mrb[30].mxu0 }
 0x29e   : > { %v4283_v2 = vpop.f32.mrb[31].mxu0 }
 0x29f   : > { %326 = vrot.lane.b32.xlu1 %v4571_v11, %s4514_s10 }
 0x2a0   : > { %v5102_v15 = vpop.f32.mrb[28].mxu1 }
 0x2a1   : > { %v4288_v55 = vpop.f32.mrb[29].mxu1 }
 0x2a2   : > { %v2270_v34 = vpop.f32.mrb[30].mxu1  ;;  %v2638_v55 = vsel %vm2498_vm3, %v4954_v26, 0 }
 0x2a3   : > { %v5104_v56 = vpop.f32.mrb[32].mxu0  ;;  %318 = vrot.lane.b32.xlu0 %v4571_v11, %s4512_s8  ;;  %v4289_v21 = vpop.f32.mrb[31].mxu1  ;;  %v2361_v11 = vsel %vm1582_vm2, %v5102_v15, -inf }
 0x2a4   : > { %v4294_v17 = vpop.f32.mrb[33].mxu0  ;;  %v2364_v4 = vsel %vm1582_vm2, %v5104_v56, -inf }
 0x2a5   : > { %v2316_v18 = vpop.f32.mrb[34].mxu0 }
 0x2a6   : > { %v4295_v19 = vpop.f32.mrb[35].mxu0 }
 0x2c2   : > { %2350 = vmax.xlane.f32.xlu0 %v2349_v20 }
 0x2c3   : > { %2353 = vmax.xlane.f32.xlu1 %v2352_v1 }
 0x2c6   : > { %2356 = vmax.xlane.f32.xlu0 %v2355_v25 }
 0x2c7   : > { %2362 = vmax.xlane.f32.xlu1 %v2361_v11 }
 0x2ca   : > { %2359 = vmax.xlane.f32.xlu0 %v2358_v29 }
 0x2ce   : > { %2365 = vmax.xlane.f32.xlu0 %v2364_v4  ;;  %v2776_v4 = vsel %vm2498_vm3, %v1506_v9, 0 }
 0x2f7   : > { %v2321_v45 = vpop.xlane.xlu0 %2320 }
 0x2f8   : > { %v2367_v33 = vsub.f32 %v5050_v24, %v2321_v45 }
 0x2fa   : > { %v2324_v57 = vpop.xlane.xlu1 %2323  ;;  %v2383_v32 = vmul.f32 1.442695, %v2367_v33 }
 0x2fb   : > { %v2368_v35 = vsub.f32 %v5054_v40, %v2324_v57 }
 0x2fc   : > { %4431 = vpow2.f32 %v2383_v32 }
 0x2fd   : > { %v2385_v37 = vmul.f32 1.442695, %v2368_v35 }
 0x2ff   : > { %4433 = vpow2.f32 %v2385_v37  ;;  %v2327_v41 = vpop.xlane.xlu0 %2326 }
 0x300   : > { %v2369_v36 = vsub.f32 %v5058_v44, %v2327_v41  ;;  %v2592_v44 = vsel %vm2498_vm3, %v1470_v0, 0 }
 0x302   : > { %v2330_v39 = vpop.xlane.xlu1 %2329  ;;  %v2387_v54 = vmul.f32 1.442695, %v2369_v36  ;;  %v418_v36 = vshrl.u32 %v4622_v61, 16 }
 0x303   : > { %v2370_v58 = vsub.f32 %v5062_v51, %v2330_v39 }
 0x304   : > { %4435 = vpow2.f32 %v2387_v54 }
 0x305   : > { %v2389_v62 = vmul.f32 1.442695, %v2370_v58 }
 0x306   : > { %v4432_v3 = vpop.eup %4431 }
 0x307   : > { %4437 = vpow2.f32 %v2389_v62  ;;  %v2333_v49 = vpop.xlane.xlu0 %2332  ;;  %v2415_v24 = vsel %vm1582_vm2, %v4432_v3, 0.0  ;;  %v2479_v12 = vpack.c.bf16 %v4432_v3, %v4432_v3 }
 0x308   : > { %v2371_v40 = vsub.f32 %v5066_v59, %v2333_v49  ;;  %2416 = vadd.xlane.f32.xlu1 %v2415_v24 }
 0x309   : > { %v4434_v52 = vpop.eup %4433  ;;  %4299 = vmatmul.mubr.msk.bf16.vlgmr.msra.gmra.mrb[32].mxu1 %vm1582_vm2, %v2479_v12 }
 0x30a   : > { %v2418_v51 = vsel %vm1582_vm2, %v4434_v52, 0.0  ;;  %v2480_v53 = vpack.c.bf16 %v4434_v52, %v4434_v52  ;;  %v2391_v2 = vmul.f32 1.442695, %v2371_v40  ;;  %4309 = vmatpush3.bf16.msra.mxu1 %v2592_v44  ;;  %4310 = vmatprep.mubr.msk.bf16.mxu1 %vm4515_vm1, %v4511_v14 }
 0x30b   : > { %2419 = vadd.xlane.f32.xlu0 %v2418_v51  ;;  %v2336_v59 = vpop.xlane.xlu0 %2335  ;;  %4320 = vmatprep.subr.bf16.mxu1 %v4511_v14 }
 0x30c   : > { %4305 = vmatmul.mubr.msk.bf16.vlgmr.msra.gmra.mrb[36].mxu0 %vm1582_vm2, %v2480_v53  ;;  %4439 = vpow2.f32 %v2391_v2  ;;  %v2372_v23 = vsub.f32 %v5070_v13, %v2336_v59  ;;  %v2684_v13 = vsel %vm2498_vm3, %v1500_v10, 0 }
 0x30d   : > { %4315 = vmatpush3.bf16.msra.mxu0 %v2638_v55  ;;  %4316 = vmatprep.mubr.msk.bf16.mxu0 %vm4515_vm1, %v4511_v14 }
 0x30e   : > { %4326 = vmatprep.subr.bf16.mxu0 %v4511_v14  ;;  %v4436_v38 = vpop.eup %4435  ;;  %v2393_v0 = vmul.f32 1.442695, %v2372_v23 }
 0x30f   : > { %v2339_v34 = vpop.xlane.xlu1 %2338  ;;  %v2421_v26 = vsel %vm1582_vm2, %v4436_v38, 0.0  ;;  %v2481_v21 = vpack.c.bf16 %v4436_v38, %v4436_v38 }
 0x310   : > { %4441 = vpow2.f32 %v2393_v0  ;;  %v2373_v18 = vsub.f32 %v5074_v16, %v2339_v34  ;;  %2422 = vadd.xlane.f32.xlu1 %v2421_v26  ;;  %v2730_v16 = vsel %vm2498_vm3, %v4984_v22, 0 }
 0x311   : > { %v4438_v17 = vpop.eup %4437  ;;  %4311 = vmatmul.mubr.msk.bf16.vlgmr.msra.gmra.mrb[36].mxu1 %vm1582_vm2, %v2481_v21 }
 0x312   : > { %v2342_v19 = vpop.xlane.xlu0 %2341  ;;  %v2424_v20 = vsel %vm1582_vm2, %v4438_v17, 0.0  ;;  %v2482_v1 = vpack.c.bf16 %v4438_v17, %v4438_v17  ;;  %v2395_v25 = vmul.f32 1.442695, %v2373_v18  ;;  %4321 = vmatpush3.bf16.msra.mxu1 %v2684_v13  ;;  %4322 = vmatprep.mubr.msk.bf16.mxu1 %vm4515_vm1, %v4511_v14 }
 0x313   : > { %v2374_v11 = vsub.f32 %v5078_v7, %v2342_v19  ;;  %2425 = vadd.xlane.f32.xlu0 %v2424_v20  ;;  %4332 = vmatprep.subr.bf16.mxu1 %v4511_v14 }
 0x314   : > { %4317 = vmatmul.mubr.msk.bf16.vlgmr.msra.gmra.mrb[40].mxu0 %vm1582_vm2, %v2482_v1  ;;  %4443 = vpow2.f32 %v2395_v25 }
 0x315   : > { %v2397_v42 = vmul.f32 1.442695, %v2374_v11  ;;  %4327 = vmatpush3.bf16.msra.mxu0 %v2730_v16  ;;  %4328 = vmatprep.mubr.msk.bf16.mxu0 %vm4515_vm1, %v4511_v14 }
 0x316   : > { %4338 = vmatprep.subr.bf16.mxu0 %v4511_v14  ;;  %v4440_v27 = vpop.eup %4439 }
 0x317   : > { %4445 = vpow2.f32 %v2397_v42  ;;  %v2345_v10 = vpop.xlane.xlu1 %2344  ;;  %v2427_v7 = vsel %vm1582_vm2, %v4440_v27, 0.0  ;;  %v2483_v29 = vpack.c.bf16 %v4440_v27, %v4440_v27 }
 0x318   : > { %v2375_v22 = vsub.f32 %v5082_v28, %v2345_v10  ;;  %2428 = vadd.xlane.f32.xlu1 %v2427_v7 }
 0x319   : > { %4323 = vmatmul.mubr.msk.bf16.vlgmr.msra.gmra.mrb[40].mxu1 %vm1582_vm2, %v2483_v29 }
 0x31a   : > { %v2348_v45 = vpop.xlane.xlu0 %2347  ;;  %v4442_v33 = vpop.eup %4441  ;;  %v2399_v57 = vmul.f32 1.442695, %v2375_v22  ;;  %4333 = vmatpush3.bf16.msra.mxu1 %v2776_v4  ;;  %4334 = vmatprep.mubr.msk.bf16.mxu1 %vm4515_vm1, %v4511_v14 }
 0x31b   : > { %v2376_v32 = vsub.f32 %v5086_v50, %v2348_v45  ;;  %v323_v35 = vpop.permute.xlu1 %322  ;;  %v2430_v28 = vsel %vm1582_vm2, %v4442_v33, 0.0  ;;  %v2484_v37 = vpack.c.bf16 %v4442_v33, %v4442_v33  ;;  %4344 = vmatprep.subr.bf16.mxu1 %v4511_v14 }
 0x31c   : > { %4447 = vpow2.f32 %v2399_v57  ;;  %2431 = vadd.xlane.f32.xlu0 %v2430_v28  ;;  %v426_v49 = vshrl.u32 %v323_v35, 16 }
 0x31d   : > { %v2401_v41 = vmul.f32 1.442695, %v2376_v32  ;;  %4329 = vmatmul.mubr.msk.bf16.vlgmr.msra.gmra.mrb[44].mxu0 %vm1582_vm2, %v2484_v37 }
 0x31e   : > { %v319_v46 = vpop.permute.xlu0 %318  ;;  %v4444_v9 = vpop.eup %4443  ;;  %4339 = vmatpush3.bf16.msra.mxu0 %v2822_v5  ;;  %4340 = vmatprep.mubr.msk.bf16.mxu0 %vm4515_vm1, %v4511_v14 }
 0x31f   : > { %4449 = vpow2.f32 %v2401_v41  ;;  %v419_v50 = vshrl.u32 %v319_v46, 16  ;;  %v5179_v39 = vpack.i.b16 %v319_v46, %v4622_v61  ;;  %v327_v54 = vpop.permute.xlu1 %326  ;;  %v2433_v58 = vsel %vm1582_vm2, %v4444_v9, 0.0  ;;  %4350 = vmatprep.subr.bf16.mxu0 %v4511_v14 }
 0x320   : > { %v2485_v62 = vpack.c.bf16 %v4444_v9, %v4444_v9  ;;  %v5183_v3 = vpack.i.b16 %v327_v54, %v323_v35  ;;  %2434 = vadd.xlane.f32.xlu1 %v2433_v58  ;;  %v427_v12 = vshrl.u32 %v327_v54, 16 }
 0x321   : > { %v4446_v43 = vpop.eup %4445  ;;  %v5185_v24 = vpack.i.b16 %v419_v50, %v418_v36  ;;  %v737_v61 = vrot.slane %v5179_v39, %v4614_v47 }
 0x322   : > { %4335 = vmatmul.mubr.msk.bf16.vlgmr.msra.gmra.mrb[44].mxu1 %vm1582_vm2, %v2485_v62  ;;  %v2436_v52 = vsel %vm1582_vm2, %v4446_v43, 0.0  ;;  %v5191_v40 = vpack.i.b16 %v427_v12, %v426_v49  ;;  %v752_v44 = vrot.slane %v5183_v3, %v4614_v47  ;;  %v2486_v51 = vpack.c.bf16 %v4446_v43, %v4446_v43 }
 0x323   : > { %2437 = vadd.xlane.f32.xlu0 %v2436_v52  ;;  %4346 = vmatprep.mubr.msk.bf16.mxu1 %vm4515_vm1, %v4511_v14  ;;  %v871_v53 = vrot.slane %v5185_v24, %v4614_v47  ;;  %v864_v43 = vcombine.high %v5185_v24, %v4647_v31  ;;  %v745_v49 = vcombine.high %v5183_v3, %v4647_v31 }
 0x324   : > { %v792_v2 = vcombine.low %v737_v61, %v752_v44  ;;  %v793_v55 = vcombine.high %v737_v61, %v752_v44  ;;  %v886_v59 = vrot.slane %v5191_v40, %v4614_v47  ;;  %v879_v54 = vcombine.high %v5191_v40, %v4647_v31 }
 0x325   : > { %4341 = vmatmul.mubr.msk.bf16.vlgmr.msra.gmra.mrb[48].mxu0 %vm1582_vm2, %v2486_v51  ;;  %v730_v52 = vcombine.high %v5179_v39, %v4647_v31  ;;  %v878_v24 = vrot.slane %v864_v43, %v4614_v47  ;;  %v759_v3 = vrot.slane %v745_v49, %v4614_v47 }
 0x326   : > { %v4448_v23 = vpop.eup %4447  ;;  %4352 = vmatprep.mubr.msk.bf16.mxu0 %vm4515_vm1, %v4511_v14  ;;  %v800_v38 = vrot.slane %v792_v2, %v4624_v63  ;;  %v807_v0 = vrot.slane %v793_v55, %v4624_v63  ;;  %v926_v34 = vcombine.low %v871_v53, %v886_v59  ;;  %v927_v21 = vcombine.high %v871_v53, %v886_v59 }
 0x327   : > { %v2439_v17 = vsel %vm1582_vm2, %v4448_v23, 0.0  ;;  %v2487_v50 = vpack.c.bf16 %v4448_v23, %v4448_v23  ;;  %v893_v61 = vrot.slane %v879_v54, %v4614_v47  ;;  %v744_v40 = vrot.slane %v730_v52, %v4614_v47 }
 0x328   : > { %v934_v18 = vrot.slane %v926_v34, %v4624_v63  ;;  %v4066_v13 = vcombine.low %v800_v38, %v807_v0  ;;  %2440 = vadd.xlane.f32.xlu1 %v2439_v17  ;;  %v941_v19 = vrot.slane %v927_v21, %v4624_v63  ;;  %v4068_v20 = vcombine.high %v800_v38, %v807_v0 }
 0x329   : > { %v4450_v26 = vpop.eup %4449  ;;  %v942_v44 = vcombine.low %v878_v24, %v893_v61  ;;  %v943_v51 = vcombine.high %v878_v24, %v893_v61  ;;  %v808_v53 = vcombine.low %v744_v40, %v759_v3  ;;  %v809_v2 = vcombine.high %v744_v40, %v759_v3 }
 0x32a   : > { %v1217_v1 = vrot.slane %v4066_v13, %v4614_v47  ;;  %v2442_v25 = vsel %vm1582_vm2, %v4450_v26, 0.0  ;;  %v1233_v11 = vrot.slane %v4068_v20, %v4614_v47  ;;  %v4070_v16 = vcombine.low %v934_v18, %v941_v19 }
 0x32b   : > { %v4072_v42 = vcombine.high %v934_v18, %v941_v19  ;;  %2443 = vadd.xlane.f32.xlu0 %v2442_v25  ;;  %v2488_v62 = vpack.c.bf16 %v4450_v26, %v4450_v26  ;;  %v950_v55 = vrot.slane %v942_v44, %v4624_v63  ;;  %v957_v59 = vrot.slane %v943_v51, %v4624_v63 }
 0x32c   : > { %v1276_v27 = vrot.slane %v4070_v16, %v4614_v47  ;;  %v1250_v7 = vcombine.low %v1217_v1, %v1233_v11  ;;  %v816_v31 = vrot.slane %v808_v53, %v4624_v63  ;;  %v823_v39 = vrot.slane %v809_v2, %v4624_v63 }
 0x32d   : > { %v1292_v10 = vrot.slane %v4072_v42, %v4614_v47  ;;  %v4078_v23 = vcombine.low %v950_v55, %v957_v59  ;;  %v4080_v38 = vcombine.high %v950_v55, %v957_v59 }
 0x32e   : > { %v1257_v29 = vrot.slane %v1250_v7, %v4624_v63  ;;  %v4074_v0 = vcombine.low %v816_v31, %v823_v39  ;;  %v4076_v34 = vcombine.high %v816_v31, %v823_v39 }
 0x32f   : > { %v1309_v22 = vcombine.low %v1276_v27, %v1292_v10  ;;  %v1394_v21 = vrot.slane %v4078_v23, %v4614_v47  ;;  %v1410_v17 = vrot.slane %v4080_v38, %v4614_v47 }
 0x330   : > { %v1260_v45 = vcombine.high %v1257_v29, %v4518_v30  ;;  %v1537_v57 = vshrl.u32 %v1257_v29, 16  ;;  %v1335_v13 = vrot.slane %v4074_v0, %v4614_v47  ;;  %v1351_v19 = vrot.slane %v4076_v34, %v4614_v47 }
 0x331   : > { %v1316_v4 = vrot.slane %v1309_v22, %v4624_v63  ;;  %v1427_v16 = vcombine.low %v1394_v21, %v1410_v17 }
 0x332   : > { %v1543_v28 = vshrl.u32 %v1260_v45, 16  ;;  %v1368_v7 = vcombine.low %v1335_v13, %v1351_v19 }
 0x333   : > { %v1536_v33 = vpack.i.b16 %v1316_v4, %v1257_v29  ;;  %v1538_v32 = vshrl.u32 %v1316_v4, 16  ;;  %v1319_v35 = vcombine.high %v1316_v4, %v4518_v30  ;;  %v1434_v4 = vrot.slane %v1427_v16, %v4624_v63 }
 0x335   : > { %v2868_v37 = vsel %vm2498_vm3, %v1536_v33, 0  ;;  %v1539_v41 = vpack.i.b16 %v1538_v32, %v1537_v57  ;;  %v1542_v5 = vpack.i.b16 %v1319_v35, %v1260_v45  ;;  %v1544_v46 = vshrl.u32 %v1319_v35, 16 }
 0x336   : > { %4345 = vmatpush3.bf16.msra.mxu1 %v2868_v37  ;;  %v1574_v35 = vshrl.u32 %v1434_v4, 16 }
 0x337   : > { %v2914_v9 = vsel %vm2498_vm3, %v1539_v41, 0  ;;  %4356 = vmatprep.subr.bf16.mxu1 %v4511_v14  ;;  %v1545_v36 = vpack.i.b16 %v1544_v46, %v1543_v28  ;;  %v2960_v58 = vsel %vm2498_vm3, %v1542_v5, 0 }
 0x338   : > { %4351 = vmatpush3.bf16.msra.mxu0 %v2914_v9 }
 0x339   : > { %4347 = vmatmul.mubr.msk.bf16.vlgmr.msra.gmra.mrb[48].mxu1 %vm1582_vm2, %v2487_v50  ;;  %4362 = vmatprep.subr.bf16.mxu0 %v4511_v14  ;;  %v3006_v12 = vsel %vm2498_vm3, %v1545_v36, 0  ;;  %v1437_v50 = vcombine.high %v1434_v4, %v4518_v30 }
 0x33a   : > { %4357 = vmatpush3.bf16.msra.mxu1 %v2960_v58  ;;  %4358 = vmatprep.mubr.msk.bf16.mxu1 %vm4515_vm1, %v4511_v14 }
 0x33b   : > { %4353 = vmatmul.mubr.msk.bf16.vlgmr.msra.gmra.mrb[52].mxu0 %vm1582_vm2, %v2488_v62  ;;  %4368 = vmatprep.subr.bf16.mxu1 %v4511_v14 }
 0x33c   : > { %4363 = vmatpush3.bf16.msra.mxu0 %v3006_v12  ;;  %4364 = vmatprep.mubr.msk.bf16.mxu0 %vm4515_vm1, %v4511_v14  ;;  %v1580_v12 = vshrl.u32 %v1437_v50, 16 }
 0x33d   : > { %4374 = vmatprep.subr.bf16.mxu0 %v4511_v14 }
 0x34f   : > { %v2351_v26 = vpop.xlane.xlu0 %2350 }
 0x350   : > { %v2377_v18 = vsub.f32 %v5090_v48, %v2351_v26  ;;  %v2354_v20 = vpop.xlane.xlu1 %2353 }
 0x351   : > { %v2378_v25 = vsub.f32 %v5092_v60, %v2354_v20  ;;  %v1375_v60 = vrot.slane %v1368_v7, %v4624_v63 }
 0x352   : > { %v2403_v1 = vmul.f32 1.442695, %v2377_v18 }
 0x353   : > { %v2357_v11 = vpop.xlane.xlu0 %2356  ;;  %v2405_v42 = vmul.f32 1.442695, %v2378_v25  ;;  %v1572_v28 = vpack.i.b16 %v1434_v4, %v1375_v60  ;;  %v1573_v37 = vshrl.u32 %v1375_v60, 16  ;;  %v1378_v58 = vcombine.high %v1375_v60, %v4518_v30 }
 0x354   : > { %4451 = vpow2.f32 %v2403_v1  ;;  %v2379_v27 = vsub.f32 %v5094_v8, %v2357_v11  ;;  %v2363_v10 = vpop.xlane.xlu1 %2362 }
 0x355   : > { %4453 = vpow2.f32 %v2405_v42  ;;  %v2381_v48 = vsub.f32 %v5102_v15, %v2363_v10  ;;  %v1575_v9 = vpack.i.b16 %v1574_v35, %v1573_v37  ;;  %v3052_v36 = vsel %vm2498_vm3, %v1572_v28, 0 }
 0x356   : > { %v2407_v29 = vmul.f32 1.442695, %v2379_v27  ;;  %v1578_v61 = vpack.i.b16 %v1437_v50, %v1378_v58  ;;  %v1579_v24 = vshrl.u32 %v1378_v58, 16 }
 0x357   : > { %v2360_v22 = vpop.xlane.xlu0 %2359  ;;  %v2411_v45 = vmul.f32 1.442695, %v2381_v48  ;;  %v3098_v43 = vsel %vm2498_vm3, %v1575_v9, 0 }
 0x358   : > { %4455 = vpow2.f32 %v2407_v29  ;;  %v2380_v33 = vsub.f32 %v5096_v6, %v2360_v22  ;;  %v1581_v53 = vpack.i.b16 %v1580_v12, %v1579_v24  ;;  %v3144_v2 = vsel %vm2498_vm3, %v1578_v61, 0 }
 0x359   : > { %4457 = vpow2.f32 %v2411_v45 }
 0x35a   : > { %v2409_v57 = vmul.f32 1.442695, %v2380_v33  ;;  %v3190_v31 = vsel %vm2498_vm3, %v1581_v53, 0 }
 0x35b   : > { %v2366_v32 = vpop.xlane.xlu0 %2365 }
 0x35c   : > { %4459 = vpow2.f32 %v2409_v57  ;;  %v2382_v8 = vsub.f32 %v5104_v56, %v2366_v32 }
 0x35e   : > { %v4452_v41 = vpop.eup %4451  ;;  %v2413_v15 = vmul.f32 1.442695, %v2382_v8 }
 0x35f   : > { %v2445_v5 = vsel %vm1582_vm2, %v4452_v41, 0.0  ;;  %v2489_v46 = vpack.c.bf16 %v4452_v41, %v4452_v41  ;;  %v4454_v6 = vpop.eup %4453 }
 0x360   : > { %4461 = vpow2.f32 %v2413_v15  ;;  %2446 = vadd.xlane.f32.xlu1 %v2445_v5  ;;  %v2448_v54 = vsel %vm1582_vm2, %v4454_v6, 0.0  ;;  %v2490_v56 = vpack.c.bf16 %v4454_v6, %v4454_v6 }
 0x361   : > { %4359 = vmatmul.mubr.msk.bf16.vlgmr.msra.gmra.mrb[52].mxu1 %vm1582_vm2, %v2489_v46  ;;  %2449 = vadd.xlane.f32.xlu0 %v2448_v54 }
 0x362   : > { %v4456_v62 = vpop.eup %4455  ;;  %4369 = vmatpush3.bf16.msra.mxu1 %v3052_v36  ;;  %4365 = vmatmul.mubr.msk.bf16.vlgmr.msra.gmra.mrb[56].mxu0 %vm1582_vm2, %v2490_v56 }
 0x363   : > { %v2451_v49 = vsel %vm1582_vm2, %v4456_v62, 0.0  ;;  %4370 = vmatprep.mubr.msk.bf16.mxu1 %vm4515_vm1, %v4511_v14  ;;  %v4458_v52 = vpop.eup %4457  ;;  %4375 = vmatpush3.bf16.msra.mxu0 %v3098_v43  ;;  %v2491_v51 = vpack.c.bf16 %v4456_v62, %v4456_v62 }
 0x364   : > { %2452 = vadd.xlane.f32.xlu1 %v2451_v49  ;;  %4380 = vmatprep.subr.bf16.mxu1 %v4511_v14  ;;  %v2457_v44 = vsel %vm1582_vm2, %v4458_v52, 0.0  ;;  %v2493_v23 = vpack.c.bf16 %v4458_v52, %v4458_v52 }
 0x365   : > { %4376 = vmatprep.mubr.msk.bf16.mxu0 %vm4515_vm1, %v4511_v14  ;;  %4386 = vmatprep.subr.bf16.mxu0 %v4511_v14 }
 0x366   : > { %v4460_v3 = vpop.eup %4459 }
 0x367   : > { %v2454_v40 = vsel %vm1582_vm2, %v4460_v3, 0.0  ;;  %v2492_v55 = vpack.c.bf16 %v4460_v3, %v4460_v3 }
 0x368   : > { %2455 = vadd.xlane.f32.xlu0 %v2454_v40  ;;  %2458 = vadd.xlane.f32.xlu1 %v2457_v44 }
 0x369   : > { %4371 = vmatmul.mubr.msk.bf16.vlgmr.msra.gmra.mrb[56].mxu1 %vm1582_vm2, %v2491_v51 }
 0x36a   : > { %v4462_v59 = vpop.eup %4461  ;;  %4381 = vmatpush3.bf16.msra.mxu1 %v3144_v2  ;;  %4382 = vmatprep.mubr.msk.bf16.mxu1 %vm4515_vm1, %v4511_v14 }
 0x36b   : > { %4377 = vmatmul.mubr.msk.bf16.vlgmr.msra.gmra.mrb[60].mxu0 %vm1582_vm2, %v2492_v55  ;;  %v2460_v39 = vsel %vm1582_vm2, %v4462_v59, 0.0  ;;  %v2494_v38 = vpack.c.bf16 %v4462_v59, %v4462_v59 }
 0x36c   : > { %4387 = vmatpush3.bf16.msra.mxu0 %v3190_v31  ;;  %2461 = vadd.xlane.f32.xlu0 %v2460_v39 }
 0x36d   : > { %4388 = vmatprep.mubr.msk.bf16.mxu0 %vm4515_vm1, %v4511_v14 }
 0x371   : > { %4383 = vmatmul.mubr.msk.bf16.vlgmr.msra.gmra.mrb[60].mxu1 %vm1582_vm2, %v2493_v23 }
 0x373   : > { %4389 = vmatmul.mubr.msk.bf16.vlgmr.msra.gmra.mrb[64].mxu0 %vm1582_vm2, %v2494_v38 }
 0x395   : > { %v2417_v0 = vpop.xlane.xlu1 %2416 }
 0x396   : > { %4463 = vrcp.f32 %v2417_v0 }
 0x398   : > { %v2420_v34 = vpop.xlane.xlu0 %2419 }
 0x399   : > { %4465 = vrcp.f32 %v2420_v34 }
 0x39d   : > { %v2423_v26 = vpop.xlane.xlu1 %2422 }
 0x39e   : > { %4467 = vrcp.f32 %v2423_v26 }
 0x3a0   : > { %v2426_v21 = vpop.xlane.xlu0 %2425  ;;  %v4464_v1 = vpop.eup %4463 }
 0x3a1   : > { %4469 = vrcp.f32 %v2426_v21 }
 0x3a3   : > { %v4466_v27 = vpop.eup %4465 }
 0x3a5   : > { %v2429_v11 = vpop.xlane.xlu1 %2428 }
 0x3a6   : > { %4471 = vrcp.f32 %v2429_v11 }
 0x3a8   : > { %v4468_v7 = vpop.eup %4467 }
 0x3a9   : > { %v2432_v29 = vpop.xlane.xlu0 %2431 }
 0x3aa   : > { %4473 = vrcp.f32 %v2432_v29 }
 0x3ab   : > { %v4470_v60 = vpop.eup %4469 }
 0x3ad   : > { %v2435_v22 = vpop.xlane.xlu1 %2434 }
 0x3ae   : > { %4475 = vrcp.f32 %v2435_v22 }
 0x3b0   : > { %v2438_v6 = vpop.xlane.xlu0 %2437  ;;  %v4472_v51 = vpop.eup %4471 }
 0x3b1   : > { %4477 = vrcp.f32 %v2438_v6 }
 0x3dc   : > { %v2536_v17 = vpop.f32.mrb[32].mxu1 }
 0x3dd   : > { %v4300_v18 = vpop.f32.mrb[33].mxu1  ;;  %v3232_v16 = vmul.f32 %v4464_v1, %v2536_v17  ;;  %v4474_v17 = vpop.eup %4473 }
 0x3de   : > { %v2539_v13 = vpop.f32.mrb[34].mxu1  ;;  %v4476_v1 = vpop.eup %4475 }
 0x3df   : > { %v2582_v19 = vpop.f32.mrb[36].mxu0  ;;  %v4301_v20 = vpop.f32.mrb[35].mxu1  ;;  %v3248_v4 = vpack.c.bf16 %v3232_v16, %v3232_v16 }
 0x3e0   : > { %v4306_v14 = vpop.f32.mrb[37].mxu0  ;;  %v3233_v10 = vmul.f32 %v4466_v27, %v2582_v19 }
 0x3e1   : > { %v2585_v25 = vpop.f32.mrb[38].mxu0  ;;  %v3255_v5 = vrot.slane %v3248_v4, %v4614_v47 }
 0x3e2   : > { %v4307_v42 = vpop.f32.mrb[39].mxu0  ;;  %v3282_v35 = vpack.c.bf16 %v3233_v10, %v3233_v10 }
 0x3e4   : > { %v2628_v48 = vpop.f32.mrb[36].mxu1  ;;  %v3289_v36 = vrot.slane %v3282_v35, %v4614_v47 }
 0x3e5   : > { %v3234_v45 = vmul.f32 %v4468_v7, %v2628_v48  ;;  %v4312_v33 = vpop.f32.mrb[37].mxu1 }
 0x3e6   : > { %v2631_v57 = vpop.f32.mrb[38].mxu1 }
 0x3e7   : > { %v2674_v32 = vpop.f32.mrb[40].mxu0  ;;  %v3256_v8 = vpack.c.bf16 %v3234_v45, %v3234_v45  ;;  %v4313_v37 = vpop.f32.mrb[39].mxu1 }
 0x3e8   : > { %v3235_v28 = vmul.f32 %v4470_v60, %v2674_v32  ;;  %v4318_v41 = vpop.f32.mrb[41].mxu0 }
 0x3e9   : > { %v2677_v15 = vpop.f32.mrb[42].mxu0  ;;  %v3263_v46 = vrot.slane %v3256_v8, %v4614_v47  ;;  %v4478_v8 = vpop.eup %4477 }
 0x3ea   : > { %v3290_v9 = vpack.c.bf16 %v3235_v28, %v3235_v28  ;;  %v4319_v50 = vpop.f32.mrb[43].mxu0 }
 0x3eb   : > { %v3264_v54 = vcombine.low %v3255_v5, %v3263_v46  ;;  %v3265_v56 = vcombine.high %v3255_v5, %v3263_v46 }
 0x3ec   : > { %v3297_v58 = vrot.slane %v3290_v9, %v4614_v47  ;;  %v2720_v62 = vpop.f32.mrb[40].mxu1 }
 0x3ed   : > { %v3272_v43 = vrot.slane %v3264_v54, %v4624_v63  ;;  %v3279_v49 = vrot.slane %v3265_v56, %v4624_v63  ;;  %v4324_v61 = vpop.f32.mrb[41].mxu1  ;;  %v3236_v39 = vmul.f32 %v4472_v51, %v2720_v62 }
 0x3ee   : > { %v3298_v12 = vcombine.low %v3289_v36, %v3297_v58  ;;  %v3299_v52 = vcombine.high %v3289_v36, %v3297_v58  ;;  %v2723_v24 = vpop.f32.mrb[42].mxu1 }
 0x3ef   : > { %v3280_v3 = vcombine.high %v3272_v43, %v4518_v30  ;;  %v3281_v40 = vcombine.high %v3279_v49, %v4518_v30  ;;  %v4325_v44 = vpop.f32.mrb[43].mxu1  ;;  %v3524_v59 = vshrl.u32 %v3272_v43, 16  ;;  %v3540_v31 = vshrl.u32 %v3279_v49, 16 }
 0x3f0   : > { %v3306_v53 = vrot.slane %v3298_v12, %v4624_v63  ;;  %v3313_v2 = vrot.slane %v3299_v52, %v4624_v63  ;;  %v2766_v55 = vpop.f32.mrb[44].mxu0  ;;  %v3316_v4 = vpack.c.bf16 %v3236_v39, %v3236_v39 }
 0x3f1   : > { %v4330_v23 = vpop.f32.mrb[45].mxu0  ;;  %v3532_v18 = vshrl.u32 %v3280_v3, 16  ;;  %v3548_v13 = vshrl.u32 %v3281_v40, 16  ;;  %v3237_v29 = vmul.f32 %v4474_v17, %v2766_v55 }
 0x3f2   : > { %v3314_v38 = vcombine.high %v3306_v53, %v4518_v30  ;;  %v3315_v0 = vcombine.high %v3313_v2, %v4518_v30  ;;  %v3522_v34 = vpack.i.b16 %v3306_v53, %v3272_v43  ;;  %v3525_v26 = vshrl.u32 %v3306_v53, 16  ;;  %v2769_v21 = vpop.f32.mrb[46].mxu0 }
 0x3f3   : > { %v3538_v19 = vpack.i.b16 %v3313_v2, %v3279_v49  ;;  %v3541_v20 = vshrl.u32 %v3313_v2, 16  ;;  %v4331_v14 = vpop.f32.mrb[47].mxu0  ;;  %v3350_v46 = vpack.c.bf16 %v3237_v29, %v3237_v29  ;;  %v3323_v36 = vrot.slane %v3316_v4, %v4614_v47 }
 0x3f4   : > { %v3526_v25 = vpack.i.b16 %v3525_v26, %v3524_v59  ;;  %v3530_v11 = vpack.i.b16 %v3314_v38, %v3280_v3  ;;  %v3533_v16 = vshrl.u32 %v3314_v38, 16  ;;  %v3546_v42 = vpack.i.b16 %v3315_v0, %v3281_v40 }
 0x3f5   : > { %v3542_v27 = vpack.i.b16 %v3541_v20, %v3540_v31  ;;  %v3549_v10 = vshrl.u32 %v3315_v0, 16  ;;  %v3648_v7 = vcombine.low %v3522_v34, %v3538_v19  ;;  %v2812_v48 = vpop.f32.mrb[44].mxu1  ;;  %v3357_v24 = vrot.slane %v3350_v46, %v4614_v47 }
 0x3f6   : > { %v3534_v22 = vpack.i.b16 %v3533_v16, %v3532_v18  ;;  %v3238_v45 = vmul.f32 %v4476_v1, %v2812_v48  ;;  %v4336_v33 = vpop.f32.mrb[45].mxu1  ;;  %v3656_v60 = vcombine.low %v3530_v11, %v3546_v42 }
 0x3f7   : > { %v3550_v57 = vpack.i.b16 %v3549_v10, %v3548_v13  ;;  %v2815_v32 = vpop.f32.mrb[46].mxu1  ;;  %v3698_v35 = vcombine.low %v3526_v25, %v3542_v27  ;;  %v3655_v15 = vrot.slane %v3648_v7, %v4614_v47 }
 0x3f8   : > { %v3324_v28 = vpack.c.bf16 %v3238_v45, %v3238_v45  ;;  %v4337_v37 = vpop.f32.mrb[47].mxu1  ;;  %v2858_v41 = vpop.f32.mrb[48].mxu0  ;;  %v3663_v5 = vrot.slane %v3656_v60, %v4614_v47 }
 0x3f9   : > { %v3239_v9 = vmul.f32 %v4478_v8, %v2858_v41  ;;  %v4342_v50 = vpop.f32.mrb[49].mxu0  ;;  %v3706_v6 = vcombine.low %v3534_v22, %v3550_v57  ;;  %v3705_v49 = vrot.slane %v3698_v35, %v4614_v47 }
 0x3fa   : > { %v3331_v54 = vrot.slane %v3324_v28, %v4614_v47  ;;  %v2861_v56 = vpop.f32.mrb[50].mxu0  ;;  %v3680_v58 = vcombine.low %v3655_v15, %v3663_v5 }
 0x3fb   : > { %v3358_v62 = vpack.c.bf16 %v3239_v9, %v3239_v9  ;;  %v4343_v43 = vpop.f32.mrb[51].mxu0  ;;  %v3713_v12 = vrot.slane %v3706_v6, %v4614_v47 }
 0x3fc   : > { %v3332_v52 = vcombine.low %v3323_v36, %v3331_v54  ;;  %v3333_v61 = vcombine.high %v3323_v36, %v3331_v54  ;;  %v3687_v32 = vrot.slane %v3680_v58, %v4624_v63 }
 0x3fd   : > { %v3365_v3 = vrot.slane %v3358_v62, %v4614_v47  ;;  %v3730_v40 = vcombine.low %v3705_v49, %v3713_v12 }
 0x3fe   : > { %v3340_v44 = vrot.slane %v3332_v52, %v4624_v63  ;;  %v3347_v51 = vrot.slane %v3333_v61, %v4624_v63 }
 0x3ff   : > { %v3366_v53 = vcombine.low %v3357_v24, %v3365_v3  ;;  %v3367_v2 = vcombine.high %v3357_v24, %v3365_v3  ;;  %v3737_v50 = vrot.slane %v3730_v40, %v4624_v63  ;;  %v2441_v40 = vpop.xlane.xlu1 %2440 }
 0x400   : > { %v3348_v55 = vcombine.high %v3340_v44, %v4518_v30  ;;  %v3349_v39 = vcombine.high %v3347_v51, %v4518_v30  ;;  %v3556_v23 = vshrl.u32 %v3340_v44, 16  ;;  %v3572_v17 = vshrl.u32 %v3347_v51, 16 }
 0x401   : > { %v3374_v59 = vrot.slane %v3366_v53, %v4624_v63  ;;  %v3381_v31 = vrot.slane %v3367_v2, %v4624_v63  ;;  %4479 = vrcp.f32 %v2441_v40 }
 0x402   : > { %v3564_v21 = vshrl.u32 %v3348_v55, 16  ;;  %v3580_v25 = vshrl.u32 %v3349_v39, 16 }
 0x403   : > { %v3382_v38 = vcombine.high %v3374_v59, %v4518_v30  ;;  %v3383_v0 = vcombine.high %v3381_v31, %v4518_v30  ;;  %v3554_v34 = vpack.i.b16 %v3374_v59, %v3340_v44  ;;  %v3557_v26 = vshrl.u32 %v3374_v59, 16  ;;  %v2444_v44 = vpop.xlane.xlu0 %2443 }
 0x404   : > { %v3570_v18 = vpack.i.b16 %v3381_v31, %v3347_v51  ;;  %v3573_v13 = vshrl.u32 %v3381_v31, 16  ;;  %v2447_v51 = vpop.xlane.xlu1 %2446  ;;  %4481 = vrcp.f32 %v2444_v44 }
 0x405   : > { %v3558_v19 = vpack.i.b16 %v3557_v26, %v3556_v23  ;;  %v3562_v20 = vpack.i.b16 %v3382_v38, %v3348_v55  ;;  %v3565_v14 = vshrl.u32 %v3382_v38, 16  ;;  %v3578_v1 = vpack.i.b16 %v3383_v0, %v3349_v39 }
 0x406   : > { %v3574_v11 = vpack.i.b16 %v3573_v13, %v3572_v17  ;;  %v3581_v16 = vshrl.u32 %v3383_v0, 16  ;;  %v3664_v42 = vcombine.low %v3554_v34, %v3570_v18  ;;  %4483 = vrcp.f32 %v2447_v51 }
 0x407   : > { %v3566_v27 = vpack.i.b16 %v3565_v14, %v3564_v21  ;;  %v3672_v10 = vcombine.low %v3562_v20, %v3578_v1  ;;  %v2450_v53 = vpop.xlane.xlu0 %2449 }
 0x408   : > { %v3582_v7 = vpack.i.b16 %v3581_v16, %v3580_v25  ;;  %v3714_v29 = vcombine.low %v3558_v19, %v3574_v11  ;;  %v3671_v48 = vrot.slane %v3664_v42, %v4614_v47  ;;  %4485 = vrcp.f32 %v2450_v53  ;;  %v2453_v2 = vpop.xlane.xlu1 %2452 }
 0x409   : > { %v3679_v22 = vrot.slane %v3672_v10, %v4614_v47  ;;  %4487 = vrcp.f32 %v2453_v2 }
 0x40a   : > { %v3722_v4 = vcombine.low %v3566_v27, %v3582_v7  ;;  %v3721_v33 = vrot.slane %v3714_v29, %v4614_v47 }
 0x40b   : > { %v3688_v45 = vcombine.low %v3671_v48, %v3679_v22  ;;  %v4480_v55 = vpop.eup %4479  ;;  %v2456_v39 = vpop.xlane.xlu0 %2455 }
 0x40c   : > { %v3729_v60 = vrot.slane %v3722_v4, %v4614_v47  ;;  %v2904_v57 = vpop.f32.mrb[48].mxu1  ;;  %v2459_v34 = vpop.xlane.xlu1 %2458  ;;  %4489 = vrcp.f32 %v2456_v39 }
 0x40d   : > { %v3695_v35 = vrot.slane %v3688_v45, %v4624_v63  ;;  %v4348_v8 = vpop.f32.mrb[49].mxu1  ;;  %v3240_v59 = vmul.f32 %v4480_v55, %v2904_v57  ;;  %4491 = vrcp.f32 %v2459_v34 }
 0x40e   : > { %v3738_v28 = vcombine.low %v3721_v33, %v3729_v60  ;;  %v2907_v37 = vpop.f32.mrb[50].mxu1  ;;  %v2950_v41 = vpop.f32.mrb[52].mxu0 }
 0x40f   : > { %v3697_v15 = vcombine.high %v3687_v32, %v3695_v35  ;;  %v5322_v5 = vcombine.low %v3687_v32, %v3695_v35  ;;  %v4349_v46 = vpop.f32.mrb[51].mxu1  ;;  %v4354_v9 = vpop.f32.mrb[53].mxu0  ;;  %v3384_v26 = vpack.c.bf16 %v3240_v59, %v3240_v59 }
 0x410   : > { %v3745_v6 = vrot.slane %v3738_v28, %v4624_v63  ;;  %v2953_v36 = vpop.f32.mrb[54].mxu0  ;;  %v4482_v31 = vpop.eup %4481 }
 0x411   : > { %v4355_v54 = vpop.f32.mrb[55].mxu0  ;;  %v3851_v58 = vshrl.u32 %v5322_v5, 16  ;;  %v3857_v12 = vshrl.u32 %v3697_v15, 16  ;;  %v3241_v23 = vmul.f32 %v4482_v31, %v2950_v41  ;;  %v4484_v38 = vpop.eup %4483  ;;  %v3391_v27 = vrot.slane %v3384_v26, %v4614_v47 }
 0x412   : > { %v3747_v56 = vcombine.high %v3737_v50, %v3745_v6  ;;  %v5326_v62 = vcombine.low %v3737_v50, %v3745_v6  ;;  %v4486_v18 = vpop.eup %4485  ;;  %v2462_v42 = vpop.xlane.xlu0 %2461 }
 0x413   : > { %v3418_v20 = vpack.c.bf16 %v3241_v23, %v3241_v23  ;;  %4493 = vrcp.f32 %v2462_v42  ;;  %v4488_v9 = vpop.eup %4487 }
 0x414   : > { %v3856_v43 = vpack.i.b16 %v3747_v56, %v3697_v15  ;;  %v3852_v49 = vshrl.u32 %v5326_v62, 16  ;;  %v3858_v52 = vshrl.u32 %v3747_v56, 16  ;;  %v3850_v61 = vpack.i.b16 %v5326_v62, %v5322_v5  ;;  %v4113_v5 = vld [vmem:[%s5406_s3] ss:$0 sm:$0xff] }
 0x415   : > { %v3425_v48 = vrot.slane %v3418_v20, %v4614_v47 }
 0x416   : > { %3876 = vrot.lane.b32.xlu1 %v3856_v43, %s4519_s11  ;;  %v3853_v24 = vpack.i.b16 %v3852_v49, %v3851_v58  ;;  %v5333_v3 = vpack.i.b16 %v3858_v52, %v3857_v12  ;;  %v4490_v12 = vpop.eup %4489 }
 0x417   : > { %v4492_v59 = vpop.eup %4491 }
 0x41a   : > { %3872 = vrot.lane.b32.xlu1 %v3853_v24, %s4520_s12 }
 0x434   : > { %v2996_v0 = vpop.f32.mrb[52].mxu1 }
 0x435   : > { %v3242_v21 = vmul.f32 %v4484_v38, %v2996_v0  ;;  %v4360_v17 = vpop.f32.mrb[53].mxu1  ;;  %v3042_v19 = vpop.f32.mrb[56].mxu0 }
 0x436   : > { %v2999_v13 = vpop.f32.mrb[54].mxu1  ;;  %v3243_v1 = vmul.f32 %v4486_v18, %v3042_v19  ;;  %v4366_v11 = vpop.f32.mrb[57].mxu0 }
 0x437   : > { %v3392_v14 = vpack.c.bf16 %v3242_v21, %v3242_v21  ;;  %v4361_v25 = vpop.f32.mrb[55].mxu1  ;;  %v3045_v16 = vpop.f32.mrb[58].mxu0 }
 0x438   : > { %v3426_v7 = vpack.c.bf16 %v3243_v1, %v3243_v1  ;;  %v4367_v29 = vpop.f32.mrb[59].mxu0  ;;  %v4494_v13 = vpop.eup %4493 }
 0x439   : > { %v3399_v10 = vrot.slane %v3392_v14, %v4614_v47 }
 0x43a   : > { %v3433_v45 = vrot.slane %v3426_v7, %v4614_v47 }
 0x43b   : > { %v3400_v22 = vcombine.low %v3391_v27, %v3399_v10  ;;  %v3401_v4 = vcombine.high %v3391_v27, %v3399_v10 }
 0x43c   : > { %v3088_v33 = vpop.f32.mrb[56].mxu1  ;;  %v3434_v32 = vcombine.low %v3425_v48, %v3433_v45  ;;  %v3435_v35 = vcombine.high %v3425_v48, %v3433_v45 }
 0x43d   : > { %v3408_v60 = vrot.slane %v3400_v22, %v4624_v63  ;;  %v3415_v57 = vrot.slane %v3401_v4, %v4624_v63  ;;  %v4372_v8 = vpop.f32.mrb[57].mxu1  ;;  %v3244_v43 = vmul.f32 %v4488_v9, %v3088_v33 }
 0x43e   : > { %v3091_v28 = vpop.f32.mrb[58].mxu1  ;;  %v3134_v37 = vpop.f32.mrb[60].mxu0  ;;  %v3442_v50 = vrot.slane %v3434_v32, %v4624_v63  ;;  %v3449_v6 = vrot.slane %v3435_v35, %v4624_v63 }
 0x43f   : > { %v3416_v41 = vcombine.high %v3408_v60, %v4518_v30  ;;  %v4373_v15 = vpop.f32.mrb[59].mxu1  ;;  %v4378_v46 = vpop.f32.mrb[61].mxu0  ;;  %v3417_v54 = vcombine.high %v3415_v57, %v4518_v30  ;;  %v3588_v56 = vshrl.u32 %v3408_v60, 16  ;;  %v3604_v58 = vshrl.u32 %v3415_v57, 16 }
 0x440   : > { %v3137_v36 = vpop.f32.mrb[62].mxu0  ;;  %v3450_v52 = vcombine.high %v3442_v50, %v4518_v30  ;;  %v3451_v24 = vcombine.high %v3449_v6, %v4518_v30  ;;  %v3586_v40 = vpack.i.b16 %v3442_v50, %v3408_v60  ;;  %v3589_v44 = vshrl.u32 %v3442_v50, 16 }
 0x441   : > { %v4379_v49 = vpop.f32.mrb[63].mxu0  ;;  %v3596_v51 = vshrl.u32 %v3416_v41, 16  ;;  %v3602_v53 = vpack.i.b16 %v3449_v6, %v3415_v57  ;;  %v3605_v2 = vshrl.u32 %v3449_v6, 16  ;;  %v3245_v55 = vmul.f32 %v4490_v12, %v3134_v37 }
 0x442   : > { %v3590_v31 = vpack.i.b16 %v3589_v44, %v3588_v56  ;;  %v3594_v39 = vpack.i.b16 %v3450_v52, %v3416_v41  ;;  %v3597_v23 = vshrl.u32 %v3450_v52, 16  ;;  %v3610_v38 = vpack.i.b16 %v3451_v24, %v3417_v54 }
 0x443   : > { %v3612_v34 = vshrl.u32 %v3417_v54, 16  ;;  %v3606_v26 = vpack.i.b16 %v3605_v2, %v3604_v58  ;;  %v3613_v21 = vshrl.u32 %v3451_v24, 16  ;;  %v3748_v17 = vcombine.low %v3586_v40, %v3602_v53 }
 0x444   : > { %v3180_v0 = vpop.f32.mrb[60].mxu1  ;;  %v3598_v19 = vpack.i.b16 %v3597_v23, %v3596_v51  ;;  %v3452_v20 = vpack.c.bf16 %v3244_v43, %v3244_v43  ;;  %v3756_v11 = vcombine.low %v3594_v39, %v3610_v38  ;;  %v3486_v42 = vpack.c.bf16 %v3245_v55, %v3245_v55 }
 0x445   : > { %v4384_v18 = vpop.f32.mrb[61].mxu1  ;;  %v3246_v14 = vmul.f32 %v4492_v59, %v3180_v0  ;;  %v3614_v16 = vpack.i.b16 %v3613_v21, %v3612_v34  ;;  %v3798_v29 = vcombine.low %v3590_v31, %v3606_v26  ;;  %v3755_v4 = vrot.slane %v3748_v17, %v4614_v47 }
 0x446   : > { %v3183_v1 = vpop.f32.mrb[62].mxu1  ;;  %v3226_v25 = vpop.f32.mrb[64].mxu0  ;;  %v3763_v45 = vrot.slane %v3756_v11, %v4614_v47  ;;  %v3459_v32 = vrot.slane %v3452_v20, %v4614_v47  ;;  %v3493_v28 = vrot.slane %v3486_v42, %v4614_v47 }
 0x447   : > { %v3247_v27 = vmul.f32 %v4494_v13, %v3226_v25  ;;  %v4385_v10 = vpop.f32.mrb[63].mxu1  ;;  %v4390_v7 = vpop.f32.mrb[65].mxu0  ;;  %v3460_v48 = vpack.c.bf16 %v3246_v14, %v3246_v14  ;;  %v3806_v57 = vcombine.low %v3598_v19, %v3614_v16  ;;  %v3805_v41 = vrot.slane %v3798_v29, %v4614_v47 }
 0x448   : > { %v3229_v22 = vpop.f32.mrb[66].mxu0  ;;  %v3780_v8 = vcombine.low %v3755_v4, %v3763_v45  ;;  %v4430_v10 = vld [vmem:[%s5405_s2 + $0x8] sm:$0xff]  }
 0x449   : > { %v3494_v33 = vpack.c.bf16 %v3247_v27, %v3247_v27  ;;  %v4391_v60 = vpop.f32.mrb[67].mxu0  ;;  %v3467_v35 = vrot.slane %v3460_v48, %v4614_v47  ;;  %v3813_v15 = vrot.slane %v3806_v57, %v4614_v47 }
 0x44a   : > { %v3787_v42 = vrot.slane %v3780_v8, %v4624_v63 }
 0x44b   : > { %v3501_v37 = vrot.slane %v3494_v33, %v4614_v47  ;;  %v3468_v46 = vcombine.low %v3459_v32, %v3467_v35  ;;  %v3469_v9 = vcombine.high %v3459_v32, %v3467_v35  ;;  %v3830_v36 = vcombine.low %v3805_v41, %v3813_v15 }
 0x44d   : > { %v3502_v50 = vcombine.low %v3493_v28, %v3501_v37  ;;  %v3503_v6 = vcombine.high %v3493_v28, %v3501_v37  ;;  %v3476_v54 = vrot.slane %v3468_v46, %v4624_v63  ;;  %v3483_v56 = vrot.slane %v3469_v9, %v4624_v63 }
 0x44e   : > { %v3837_v22 = vrot.slane %v3830_v36, %v4624_v63 }
 0x44f   : > { %v3510_v58 = vrot.slane %v3502_v50, %v4624_v63  ;;  %v3517_v43 = vrot.slane %v3503_v6, %v4624_v63  ;;  %v3484_v49 = vcombine.high %v3476_v54, %v4518_v30  ;;  %v3485_v12 = vcombine.high %v3483_v56, %v4518_v30 }
 0x450   : > { %v3620_v52 = vshrl.u32 %v3476_v54, 16  ;;  %v3636_v2 = vshrl.u32 %v3483_v56, 16 }
 0x451   : > { %v3518_v24 = vcombine.high %v3510_v58, %v4518_v30  ;;  %v3519_v40 = vcombine.high %v3517_v43, %v4518_v30  ;;  %v3618_v44 = vpack.i.b16 %v3510_v58, %v3476_v54  ;;  %v3621_v51 = vshrl.u32 %v3510_v58, 16  ;;  %v4429_v30 = vld [vmem:[%s5405_s2] sm:$0xff]  }
 0x452   : > { %v3628_v53 = vshrl.u32 %v3484_v49, 16  ;;  %v3634_v55 = vpack.i.b16 %v3517_v43, %v3483_v56  ;;  %v3637_v59 = vshrl.u32 %v3517_v43, 16  ;;  %v3644_v0 = vshrl.u32 %v3485_v12, 16  ;;  %4392 = vmatprep.subr.bf16.mxu1 %v4429_v30 }
 0x453   : > { %v3622_v31 = vpack.i.b16 %v3621_v51, %v3620_v52  ;;  %v3626_v39 = vpack.i.b16 %v3518_v24, %v3484_v49  ;;  %v3629_v23 = vshrl.u32 %v3518_v24, 16  ;;  %v3642_v38 = vpack.i.b16 %v3519_v40, %v3485_v12  ;;  %4393 = vmatpush3.bf16.msra.mxu1 %v4429_v30 }
 0x454   : > { %v3638_v34 = vpack.i.b16 %v3637_v59, %v3636_v2  ;;  %v3645_v26 = vshrl.u32 %v3519_v40, 16  ;;  %v3764_v21 = vcombine.low %v3618_v44, %v3634_v55  ;;  %4394 = vmatprep.subr.bf16.mxu1 %v4430_v10 }
 0x455   : > { %v3630_v17 = vpack.i.b16 %v3629_v23, %v3628_v53  ;;  %v3772_v18 = vcombine.low %v3626_v39, %v3642_v38 }
 0x456   : > { %v3646_v13 = vpack.i.b16 %v3645_v26, %v3644_v0  ;;  %v3814_v19 = vcombine.low %v3622_v31, %v3638_v34  ;;  %v3771_v20 = vrot.slane %v3764_v21, %v4614_v47 }
 0x457   : > { %v3779_v14 = vrot.slane %v3772_v18, %v4614_v47  ;;  %4395 = vmatpush3.bf16.msra.mxu1 %v4430_v10 }
 0x458   : > { %v3822_v1 = vcombine.low %v3630_v17, %v3646_v13  ;;  %v3821_v11 = vrot.slane %v3814_v19, %v4614_v47 }
 0x459   : > { %v3788_v25 = vcombine.low %v3771_v20, %v3779_v14 }
 0x45a   : > { %v3829_v16 = vrot.slane %v3822_v1, %v4614_v47 }
 0x45b   : > { %v3795_v27 = vrot.slane %v3788_v25, %v4624_v63 }
 0x45c   : > { %v3838_v7 = vcombine.low %v3821_v11, %v3829_v16 }
 0x45d   : > { %v3797_v29 = vcombine.high %v3787_v42, %v3795_v27  ;;  %v3796_v48 = vcombine.low %v3787_v42, %v3795_v27 }
 0x45e   : > { %v3845_v4 = vrot.slane %v3838_v7, %v4624_v63 }
 0x45f   : > { %v3863_v47 = vshrl.u32 %v3796_v48, 16  ;;  %v3869_v60 = vshrl.u32 %v3797_v29, 16 }
 0x460   : > { %v3847_v45 = vcombine.high %v3837_v22, %v3845_v4  ;;  %v3846_v33 = vcombine.low %v3837_v22, %v3845_v4 }
 0x462   : > { %v3868_v57 = vpack.i.b16 %v3847_v45, %v3797_v29  ;;  %v3864_v32 = vshrl.u32 %v3846_v33, 16  ;;  %v3870_v35 = vshrl.u32 %v3847_v45, 16  ;;  %v3862_v8 = vpack.i.b16 %v3846_v33, %v3796_v48 }
 0x464   : > { %3878 = vrot.lane.b32.xlu1 %v3868_v57, %s4519_s11  ;;  %v3865_v28 = vpack.i.b16 %v3864_v32, %v3863_v47  ;;  %v3871_v37 = vpack.i.b16 %v3870_v35, %v3869_v60 }
 0x466   : > { %3874 = vrot.lane.b32.xlu0 %v3865_v28, %s4520_s12 }
 0x468   : > { %3882 = vrot.lane.b32.xlu1 %v3871_v37, %s4521_s18 }
 0x46a   : > { %3880 = vrot.lane.b32.xlu0 %v5333_v3, %s4521_s18 }
 0x488   : > { %v3877_v63 = vpop.permute.xlu1 %3876 }
 0x48c   : > { %v3873_v41 = vpop.permute.xlu1 %3872 }
 0x48d   : > { %v3886_v9 = vsel %vm1582_vm2, %v3850_v61, %v3873_v41 }
 0x48e   : > { %v3892_v54 = vsel %vm3890_vm4, %v3886_v9, %v3877_v63 }
 0x4d6   : > { %v3879_v15 = vpop.permute.xlu1 %3878 }
 0x4d8   : > { %v3875_v46 = vpop.permute.xlu0 %3874 }
 0x4d9   : > { %v3889_v50 = vsel %vm1582_vm2, %v3862_v8, %v3875_v46 }
 0x4da   : > { %v3883_v6 = vpop.permute.xlu1 %3882  ;;  %v3894_v36 = vsel %vm3890_vm4, %v3889_v50, %v3879_v15 }
 0x4db   : > { %v3899_v3 = vsel %vm3895_vm5, %v3894_v36, %v3883_v6 }
 0x4dc   : > { %v3881_v56 = vpop.permute.xlu0 %3880 }
 0x4dd   : > { %v3897_v58 = vsel %vm3895_vm5, %v3892_v54, %v3881_v56 }
 0x4de   : > { %4396 = vmatprep.mubr.msk.bf16.mxu1 %vm224_vm0, %v3897_v58 }
 0x4df   : > { %4397 = vmatmul.mubr.msk.bf16.vlgmr.msra.gmra.mrb[64].mxu1 %vm224_vm0, %v3899_v3 }
 0x5b2   : > { %v4398_v62 = vpop.f32.mrb[64].mxu1 }
 0x5b3   : > { %v3970_v61 = vadd.f32 %v4398_v62, %v4113_v5  ;;  %v3961_v43 = vpop.f32.mrb[65].mxu1 }
 0x5b4   : > { %v3962_v49 = vadd.f32 %v4113_v5, %v3961_v43  ;;  %v4399_v12 = vpop.f32.mrb[66].mxu1 }
 0x5b5   : > { %3978 = vst.msk [vmem:[%s199_s25 + $0x10] sm:$0xff] %vm224_vm0, %v3970_v61  ;;  %v3973_v52 = vadd.f32 %v4399_v12, %v4113_v5  ;;  %v3964_v24 = vpop.f32.mrb[67].mxu1 }
 0x5b6   : > { %3976 = vst.msk [vmem:[%s199_s25] sm:$0xff] %vm224_vm0, %v3962_v49  ;;  %v3965_v40 = vadd.f32 %v4113_v5, %v3964_v24 }
 0x5b7   : > { %3979 = vst.msk [vmem:[%s199_s25 + $0x18] sm:$0xff] %vm224_vm0, %v3973_v52 }
 0x5b8   : > { %3977 = vst.msk [vmem:[%s199_s25 + $0x8] sm:$0xff] %vm224_vm0, %v3965_v40 }
 0x5b9 PF: > { %s14_s15 = sadd.s32 1, %s4501_s15  }
 0x5ba   : > { %p11_p4 = scmp.ge.s32.totalorder %s14_s15, 6  }
 0x5bc   :  { %13 = sbr.rel (!%p11_p4) target bundleno = 1 (0x1), region = 66 }

// kernel: tpu_custom_call.1
= control target key start
LH: loop header
LB: loop body
LE: loop exit
PB: predicated region body
PF: predicated region fallthrough
CT: control target
= control target key end

     0   :  { %s4547_s15 = smov 0   ;;  %s5403_s0 = inlined_call_operand.vmem [shape: f32[128,32], index: 0, kind: input, shape index: {}]   ;;  %s5404_s1 = inlined_call_operand.vmem [shape: bf16[32,96], index: 1, kind: input, shape index: {}]   ;;  %s5405_s2 = inlined_call_operand.vmem [shape: bf16[32,32], index: 2, kind: input, shape index: {}]   ;;  %s5406_s3 = inlined_call_operand.vmem [shape: f32[1,32], index: 3, kind: input, shape index: {}]   ;;  %s5407_s4 = inlined_call_operand.vmem [shape: f32[128,32], index: 4, kind: output, shape index: {}]  }
   0x1 LB: > { %s4036_s16 = sadd.s32 4294967295, %s4501_s15   ;;  %p4040_p0 = scmp.ge.s32.totalorder %s4501_s15, 1  ;;  %s4501_s15 = sphi %s4547_s15, %s14_s15  }
   0x2   : > { %p163_p1 = scmp.lt.s32.totalorder %s4501_s15, 5 }
   0x4   : > { %p164_p2 = pnand %p4040_p0, %p163_p1 }
   0x5   : > { %v4427_v0 = vld [vmem:[%s5404_s1] sm:$0xff] (!%p164_p2)   ;;  %s4041_s19 = sshll.u32 (!%p164_p2), %s4036_s16, 2  ;;  %v4428_v1 = vld [vmem:[%s5404_s1 + $0x8] sm:$0xff] (!%p164_p2)   ;;  %vm224_vm0 = vcmask (!%p164_p2), 261120   ;;  %s4503_s26 = smov (!%p164_p2), 104   ;;  %v4511_v14 = vmov (!%p164_p2), 0.0   ;;  %v435_v25 = vlaneseq (!%p164_p2) }
   0x6   : > { %167 = sbr.rel (%p164_p2) target bundleno = 1465 (0x5b9), region = 36  ;;  %p190_p3 = scmp.lt.s32.totalorder (!%p164_p2), %s4041_s19, 15  ;;  %4192 = vmatprep.subr.bf16.mxu0 (!%p164_p2), %v4427_v0  ;;  %4200 = vmatprep.subr.bf16.mxu1 (!%p164_p2), %v4511_v14  ;;  %vm4515_vm1 = vmmov (!%p164_p2), 0   ;;  %v4516_v23 = vmov (!%p164_p2), 1983009808   ;;  %vm1582_vm2 = vcmask (!%p164_p2), 64512  }
   0x7   : > { %4193 = vmatpush3.bf16.msra.mxu0 (!%p164_p2), %v4427_v0  ;;  %s4504_s27 = smov (!%p164_p2), 120   ;;  %s4505_s28 = smov (!%p164_p2), 96   ;;  %4202 = vmatprep.mubr.msk.bf16.mxu1 (!%p164_p2), %vm4515_vm1, %v4511_v14  ;;  %v433_v24 = vunpack.c.l.s4 (!%p164_p2), %v4516_v23  ;;  %v436_v32 = vshrl.u32 (!%p164_p2), %v435_v25, 7  ;;  %v4517_v38 = vmov (!%p164_p2), 1934713408   ;;  %vm2498_vm3 = vcmask (!%p164_p2), 1043456  }
   0x8   : > { %4194 = vmatprep.subr.bf16.mxu0 (!%p164_p2), %v4428_v1  ;;  %s4506_s29 = smov (!%p164_p2), 112   ;;  %s4507_s30 = smov (!%p164_p2), 80   ;;  %v495_v39 = vunpack.c.l.s4 (!%p164_p2), %v4517_v38  ;;  %vm3890_vm4 = vcmask (!%p164_p2), 130048   ;;  %vm3895_vm5 = vcmask (!%p164_p2), 195584  }
   0x9   : > { %s4508_s5 = smov (!%p164_p2), 88   ;;  %s4509_s6 = smov (!%p164_p2), 72   ;;  %v434_v31 = vunpack.c.0.s8 (!%p164_p2), %v433_v24 }
   0xa   : > { %s4510_s7 = smov (!%p164_p2), 64   ;;  %s4512_s8 = smov (!%p164_p2), 56   ;;  %v496_v54 = vunpack.c.0.s8 (!%p164_p2), %v495_v39 }
   0xb   : > { %4195 = vmatpush3.bf16.msra.mxu0 (!%p164_p2), %v4428_v1  ;;  %s4513_s9 = smov (!%p164_p2), 48   ;;  %s4514_s10 = smov (!%p164_p2), 40   ;;  %v4614_v47 = vsub.s32 (!%p164_p2), %v434_v31, %v436_v32 }
   0xc   : > { %4206 = vmatprep.subr.bf16.mxu0 (!%p164_p2), %v4511_v14  ;;  %v4624_v63 = vsub.s32 (!%p164_p2), %v496_v54, %v436_v32  ;;  %s4519_s11 = smov (!%p164_p2), 16   ;;  %s4520_s12 = smov (!%p164_p2), 8  }
   0xd   : > { %s5409_s19 = smov (!%p190_p3, %s4041_s19), 15  ;;  %s4521_s18 = smov 24  }
   0xe   : > { %s4042_s22 = sshll.u32 %s5409_s19, 3 }
   0xf   : > { %s193_s25 = scalar_lea.vmem %s5403_s0, %s4042_s22 }
  0x10   : > { %v202_v2 = vld [vmem:[%s193_s25] sm:$0xff]  ;;  %v203_v3 = vld [vmem:[%s193_s25 + $0x8] sm:$0xff]  ;;  %v204_v4 = vld [vmem:[%s193_s25 + $0x10] sm:$0xff] }
  0x11   : > { %v206_v5 = vpack.c.bf16 %v203_v3, %v202_v2  ;;  %v205_v6 = vld [vmem:[%s193_s25 + $0x18] sm:$0xff]  ;;  %s199_s25 = scalar_lea.vmem %s5407_s4, %s4042_s22 }
  0x12   : > { %v207_v7 = vpack.c.bf16 %v205_v6, %v204_v4 }
  0x13   : > { %4196 = vmatprep.mubr.msk.bf16.mxu0 %vm224_vm0, %v206_v5 }
  0x14   : > { %4197 = vmatmul.mubr.msk.bf16.vlgmr.msra.gmra.mrb[0].mxu0 %vm224_vm0, %v207_v7 }
  0x15   : > { %4208 = vmatprep.mubr.msk.bf16.mxu0 %vm4515_vm1, %v4511_v14 }
  0xe7   : > { %v4198_v8 = vpop.f32.mrb[0].mxu0 }
  0xe8   : > { %v265_v9 = vpop.f32.mrb[1].mxu0 }
  0xe9   : > { %v4199_v10 = vpop.f32.mrb[2].mxu0 }
  0xea   : > { %v4571_v11 = vpack.c.bf16 %v4199_v10, %v4198_v8  ;;  %v268_v12 = vpop.f32.mrb[3].mxu0 }
  0xeb   : > { %v4573_v13 = vpack.c.bf16 %v268_v12, %v265_v9 }
  0xec   : > { %v386_v10 = vshrl.u32 %v4571_v11, 16 }
  0xed   : > { %292 = vrot.lane.b32.xlu1 %v4573_v13, %s4503_s26  ;;  %284 = vrot.lane.b32.xlu0 %v4573_v13, %s4504_s27  ;;  %v332_v51 = vshrl.u32 %v4573_v13, 16 }
  0xf1   : > { %296 = vrot.lane.b32.xlu1 %v4573_v13, %s4505_s28  ;;  %288 = vrot.lane.b32.xlu0 %v4573_v13, %s4506_s29 }
  0xf5   : > { %304 = vrot.lane.b32.xlu1 %v4573_v13, %s4507_s30  ;;  %300 = vrot.lane.b32.xlu0 %v4573_v13, %s4508_s5 }
  0xf9   : > { %286 = vrot.lane.b32.xlu1 %v4571_v11, %s4504_s27  ;;  %308 = vrot.lane.b32.xlu0 %v4573_v13, %s4509_s6 }
  0xfd   : > { %294 = vrot.lane.b32.xlu1 %v4571_v11, %s4503_s26  ;;  %290 = vrot.lane.b32.xlu0 %v4571_v11, %s4506_s29 }
 0x101   : > { %302 = vrot.lane.b32.xlu1 %v4571_v11, %s4508_s5  ;;  %298 = vrot.lane.b32.xlu0 %v4571_v11, %s4505_s28 }
 0x105   : > { %310 = vrot.lane.b32.xlu1 %v4571_v11, %s4509_s6  ;;  %306 = vrot.lane.b32.xlu0 %v4571_v11, %s4507_s30 }
 0x109   : > { %314 = vrot.lane.b32.xlu1 %v4571_v11, %s4510_s7  ;;  %312 = vrot.lane.b32.xlu0 %v4573_v13, %s4510_s7 }
 0x10d   : > { %316 = vrot.lane.b32.xlu1 %v4573_v13, %s4512_s8  ;;  %320 = vrot.lane.b32.xlu0 %v4573_v13, %s4513_s9 }
 0x111   : > { %324 = vrot.lane.b32.xlu1 %v4573_v13, %s4514_s10 }
 0x15f   : > { %v293_v15 = vpop.permute.xlu1 %292  ;;  %v285_v16 = vpop.permute.xlu0 %284 }
 0x160   : > { %v330_v40 = vpack.i.b16 %v285_v16, %v4573_v13  ;;  %v341_v42 = vshrl.u32 %v293_v15, 16  ;;  %v333_v43 = vshrl.u32 %v285_v16, 16 }
 0x162   : > { %v334_v57 = vpack.i.b16 %v333_v43, %v332_v51 }
 0x163   : > { %v297_v17 = vpop.permute.xlu1 %296  ;;  %v289_v18 = vpop.permute.xlu0 %288 }
 0x164   : > { %v338_v30 = vpack.i.b16 %v293_v15, %v289_v18  ;;  %v340_v35 = vshrl.u32 %v289_v18, 16  ;;  %v348_v44 = vshrl.u32 %v297_v17, 16 }
 0x166   : > { %v342_v52 = vpack.i.b16 %v341_v42, %v340_v35 }
 0x167   : > { %v305_v19 = vpop.permute.xlu1 %304  ;;  %v301_v20 = vpop.permute.xlu0 %300 }
 0x168   : > { %v346_v33 = vpack.i.b16 %v301_v20, %v297_v17  ;;  %v356_v36 = vshrl.u32 %v305_v19, 16  ;;  %v349_v37 = vshrl.u32 %v301_v20, 16 }
 0x16a   : > { %v431_v48 = vcombine.high %v330_v40, %v346_v33  ;;  %v350_v53 = vpack.i.b16 %v349_v37, %v348_v44  ;;  %v430_v55 = vcombine.low %v330_v40, %v346_v33 }
 0x16b   : > { %v4603_v21 = vpop.permute.xlu1 %286  ;;  %v309_v22 = vpop.permute.xlu0 %308 }
 0x16c   : > { %v354_v28 = vpack.i.b16 %v309_v22, %v305_v19  ;;  %v357_v29 = vshrl.u32 %v309_v22, 16  ;;  %v445_v59 = vrot.slane %v431_v48, %v4614_v47  ;;  %v565_v62 = vcombine.high %v334_v57, %v350_v53 }
 0x16d   : > { %v438_v2 = vrot.slane %v430_v55, %v4614_v47  ;;  %v564_v3 = vcombine.low %v334_v57, %v350_v53  ;;  %v387_v12 = vshrl.u32 %v4603_v21, 16  ;;  %v4641_v25 = vpack.i.b16 %v4603_v21, %v4571_v11 }
 0x16e   : > { %v447_v41 = vcombine.high %v338_v30, %v354_v28  ;;  %v358_v45 = vpack.i.b16 %v357_v29, %v356_v36  ;;  %v446_v49 = vcombine.low %v338_v30, %v354_v28  ;;  %v579_v9 = vrot.slane %v565_v62, %v4614_v47 }
 0x16f   : > { %v4605_v26 = vpop.permute.xlu1 %294  ;;  %v4607_v27 = vpop.permute.xlu0 %290  ;;  %v572_v15 = vrot.slane %v564_v3, %v4614_v47  ;;  %v4518_v30 = vmov 0   ;;  %v4649_v32 = vpack.i.b16 %v387_v12, %v386_v10 }
 0x170   : > { %v461_v56 = vrot.slane %v447_v41, %v4614_v47  ;;  %v581_v58 = vcombine.high %v342_v52, %v358_v45  ;;  %v454_v60 = vrot.slane %v446_v49, %v4614_v47  ;;  %v580_v0 = vcombine.low %v342_v52, %v358_v45 }
 0x171   : > { %v395_v22 = vshrl.u32 %v4605_v26, 16  ;;  %v394_v23 = vshrl.u32 %v4607_v27, 16  ;;  %v4647_v31 = vpack.i.b16 %v4518_v30, %v4518_v30  ;;  %v4653_v36 = vpack.i.b16 %v4605_v26, %v4607_v27 }
 0x172   : > { %v508_v4 = vcombine.low %v445_v59, %v461_v56  ;;  %v509_v5 = vcombine.high %v445_v59, %v461_v56  ;;  %v595_v6 = vrot.slane %v581_v58, %v4614_v47  ;;  %v492_v7 = vcombine.low %v438_v2, %v454_v60 }
 0x173   : > { %v4609_v34 = vpop.permute.xlu1 %302  ;;  %v4612_v46 = vpop.permute.xlu0 %298  ;;  %v493_v8 = vcombine.high %v438_v2, %v454_v60  ;;  %v588_v13 = vrot.slane %v580_v0, %v4614_v47  ;;  %v4663_v42 = vpack.i.b16 %v395_v22, %v394_v23 }
 0x174   : > { %v516_v16 = vrot.slane %v508_v4, %v4624_v63  ;;  %v523_v17 = vrot.slane %v509_v5, %v4624_v63  ;;  %v642_v19 = vcombine.low %v579_v9, %v595_v6  ;;  %v643_v20 = vcombine.high %v579_v9, %v595_v6 }
 0x175   : > { %v500_v28 = vrot.slane %v492_v7, %v4624_v63  ;;  %v507_v29 = vrot.slane %v493_v8, %v4624_v63  ;;  %v626_v33 = vcombine.low %v572_v15, %v588_v13  ;;  %v627_v35 = vcombine.high %v572_v15, %v588_v13 }
 0x176   : > { %v4057_v37 = vcombine.low %v516_v16, %v523_v17  ;;  %v4059_v21 = vcombine.high %v516_v16, %v523_v17  ;;  %v400_v38 = vpack.i.b16 %v4609_v34, %v4612_v46  ;;  %v4658_v40 = vrot.slane %v642_v19, %v4624_v63 }
 0x177   : > { %v4616_v50 = vpop.permute.xlu1 %310  ;;  %v4626_v1 = vpop.permute.xlu0 %306  ;;  %v4661_v41 = vrot.slane %v643_v20, %v4624_v63  ;;  %v4049_v44 = vcombine.low %v500_v28, %v507_v29  ;;  %v403_v26 = vshrl.u32 %v4609_v34, 16  ;;  %v402_v27 = vshrl.u32 %v4612_v46, 16 }
 0x178   : > { %v634_v49 = vrot.slane %v626_v33, %v4624_v63  ;;  %v641_v51 = vrot.slane %v627_v35, %v4624_v63  ;;  %v4051_v52 = vcombine.high %v500_v28, %v507_v29  ;;  %v408_v53 = vpack.i.b16 %v4616_v50, %v4626_v1 }
 0x179   : > { %v4674_v55 = vrot.slane %v4057_v37, %v4614_v47  ;;  %v4677_v56 = vrot.slane %v4059_v21, %v4614_v47  ;;  %v698_v34 = vcombine.low %v4641_v25, %v400_v38  ;;  %v4061_v57 = vcombine.low %v4658_v40, %v4661_v41 }
 0x17a   : > { %v411_v58 = vshrl.u32 %v4616_v50, 16  ;;  %v404_v62 = vpack.i.b16 %v403_v26, %v402_v27  ;;  %v410_v0 = vshrl.u32 %v4626_v1, 16  ;;  %v4063_v4 = vcombine.high %v4658_v40, %v4661_v41 }
 0x17b   : > { %v4622_v61 = vpop.permute.xlu1 %314  ;;  %v313_v24 = vpop.permute.xlu0 %312  ;;  %v699_v5 = vcombine.high %v4641_v25, %v400_v38  ;;  %v714_v6 = vcombine.low %v4653_v36, %v408_v53  ;;  %v4698_v9 = vrot.slane %v4049_v44, %v4614_v47  ;;  %v4701_v1 = vrot.slane %v4051_v52, %v4614_v47 }
 0x17c   : > { %v364_v45 = vshrl.u32 %v313_v24, 16  ;;  %v4053_v13 = vcombine.low %v634_v49, %v641_v51  ;;  %v4055_v15 = vcombine.high %v634_v49, %v641_v51  ;;  %v1116_v16 = vcombine.low %v4674_v55, %v4677_v56 }
 0x17d   : > { %v832_v17 = vcombine.low %v4649_v32, %v404_v62  ;;  %v833_v20 = vcombine.high %v4649_v32, %v404_v62  ;;  %v715_v22 = vcombine.high %v4653_v36, %v408_v53  ;;  %v722_v25 = vrot.slane %v714_v6, %v4614_v47 }
 0x17e   : > { %v999_v33 = vcombine.high %v4698_v9, %v4701_v1  ;;  %v1033_v32 = vrot.slane %v4053_v13, %v4614_v47  ;;  %v1049_v36 = vrot.slane %v4055_v15, %v4614_v47  ;;  %v706_v21 = vrot.slane %v698_v34, %v4614_v47 }
 0x17f   : > { %v317_v18 = vpop.permute.xlu1 %316  ;;  %v321_v54 = vpop.permute.xlu0 %320  ;;  %v4728_v26 = vrot.slane %v699_v5, %v4614_v47  ;;  %v4731_v27 = vrot.slane %v715_v22, %v4614_v47  ;;  %v4746_v34 = vrot.slane %v833_v20, %v4614_v47  ;;  %v998_v13 = vcombine.low %v4698_v9, %v4701_v1 }
 0x180   : > { %v365_v39 = vshrl.u32 %v317_v18, 16  ;;  %v4665_v43 = vpack.i.b16 %v317_v18, %v313_v24  ;;  %v372_v2 = vshrl.u32 %v321_v54, 16  ;;  %v412_v18 = vpack.i.b16 %v411_v58, %v410_v0 }
 0x181   : > { %v760_v49 = vcombine.low %v706_v21, %v722_v25  ;;  %v1013_v58 = vrot.slane %v999_v33, %v4624_v63  ;;  %v761_v62 = vcombine.high %v706_v21, %v722_v25  ;;  %v777_v5 = vcombine.high %v4728_v26, %v4731_v27 }
 0x182   : > { %v4680_v46 = vpack.i.b16 %v365_v39, %v364_v45  ;;  %v462_v59 = vcombine.high %v4665_v43, %v4647_v31  ;;  %v848_v38 = vcombine.low %v4663_v42, %v412_v18  ;;  %v849_v51 = vcombine.high %v4663_v42, %v412_v18 }
 0x183   : > { %v325_v48 = vpop.permute.xlu1 %324  ;;  %v1057_v6 = vcombine.low %v1033_v32, %v1049_v36  ;;  %v469_v22 = vrot.slane %v4665_v43, %v4614_v47  ;;  %v1023_v25 = vcombine.high %v1013_v58, %v4518_v30  ;;  %v775_v43 = vrot.slane %v761_v62, %v4624_v63 }
 0x184   : > { %v370_v60 = vpack.i.b16 %v325_v48, %v321_v54  ;;  %v373_v3 = vshrl.u32 %v325_v48, 16  ;;  %v596_v50 = vcombine.high %v4680_v46, %v4647_v31  ;;  %v476_v10 = vrot.slane %v462_v59, %v4614_v47 }
 0x185   : > { %v840_v54 = vrot.slane %v832_v17, %v4614_v47  ;;  %v1058_v59 = vcombine.high %v1033_v32, %v1049_v36  ;;  %v856_v0 = vrot.slane %v848_v38, %v4614_v47  ;;  %v1453_v17 = vshrl.u32 %v1013_v58, 16 }
 0x186   : > { %v477_v7 = vcombine.high %v370_v60, %v4647_v31  ;;  %v4695_v8 = vpack.i.b16 %v373_v3, %v372_v2  ;;  %v610_v28 = vrot.slane %v596_v50, %v4614_v47  ;;  %v776_v3 = vcombine.low %v4728_v26, %v4731_v27 }
 0x187   : > { %v4760_v50 = vrot.slane %v760_v49, %v4624_v63  ;;  %v894_v20 = vcombine.low %v840_v54, %v856_v0  ;;  %v1006_v32 = vrot.slane %v998_v13, %v4624_v63  ;;  %v1459_v49 = vshrl.u32 %v1023_v25, 16 }
 0x188   : > { %v491_v12 = vrot.slane %v477_v7, %v4614_v47  ;;  %v611_v19 = vcombine.high %v4695_v8, %v4647_v31  ;;  %v1072_v7 = vrot.slane %v1058_v59, %v4624_v63  ;;  %v618_v38 = vrot.slane %v4695_v8, %v4614_v47 }
 0x189   : > { %v902_v36 = vrot.slane %v894_v20, %v4624_v63  ;;  %v1441_v8 = vshrl.u32 %v1006_v32, 16  ;;  %v4067_v20 = vcombine.high %v4760_v50, %v775_v43 }
 0x18a   : > { %v540_v23 = vcombine.low %v476_v10, %v491_v12  ;;  %v541_v24 = vcombine.high %v476_v10, %v491_v12  ;;  %v625_v29 = vrot.slane %v611_v19, %v4614_v47  ;;  %v4763_v10 = vrot.slane %v849_v51, %v4614_v47 }
 0x18b   : > { %v484_v12 = vrot.slane %v370_v60, %v4614_v47  ;;  %v1452_v15 = vpack.i.b16 %v1072_v7, %v1013_v58  ;;  %v1454_v18 = vshrl.u32 %v1072_v7, 16  ;;  %v1082_v19 = vcombine.high %v1072_v7, %v4518_v30 }
 0x18c   : > { %v4718_v35 = vrot.slane %v540_v23, %v4624_v63  ;;  %v4721_v37 = vrot.slane %v541_v24, %v4624_v63  ;;  %v674_v39 = vcombine.low %v610_v28, %v625_v29  ;;  %v675_v44 = vcombine.high %v610_v28, %v625_v29 }
 0x18d   : > { %v4775_v23 = vrot.slane %v4061_v57, %v4614_v47  ;;  %v4781_v60 = vrot.slane %v4063_v4, %v4614_v47  ;;  %v1587_v9 = vsel %vm1582_vm2, %v1452_v15, 0  ;;  %v1455_v1 = vpack.i.b16 %v1454_v18, %v1453_v17 }
 0x18e   : > { %v4058_v45 = vcombine.low %v4718_v35, %v4721_v37  ;;  %v4060_v48 = vcombine.high %v4718_v35, %v4721_v37  ;;  %v4739_v52 = vrot.slane %v674_v39, %v4624_v63  ;;  %v4742_v53 = vrot.slane %v675_v44, %v4624_v63  ;;  %4201 = vmatpush3.bf16.xpose.msra.mxu1 %v1587_v9 }
 0x18f   : > { %v1065_v24 = vrot.slane %v1057_v6, %v4624_v63  ;;  %v895_v28 = vcombine.high %v840_v54, %v856_v0  ;;  %v524_v29 = vcombine.low %v469_v22, %v484_v12  ;;  %v525_v33 = vcombine.high %v469_v22, %v484_v12  ;;  %4212 = vmatprep.subr.bf16.mxu1 %v4511_v14 }
 0x190   : > { %v4062_v42 = vcombine.low %v4739_v52, %v4742_v53  ;;  %v4064_v2 = vcombine.high %v4739_v52, %v4742_v53  ;;  %v1633_v57 = vsel %vm1582_vm2, %v1455_v1, 0  ;;  %v1460_v40 = vshrl.u32 %v1082_v19, 16 }
 0x191   : > { %v1176_v41 = vcombine.high %v4775_v23, %v4781_v60  ;;  %v4793_v4 = vrot.slane %v776_v3, %v4624_v63  ;;  %v910_v21 = vcombine.low %v4746_v34, %v4763_v10  ;;  %4207 = vmatpush3.bf16.xpose.msra.mxu0 %v1633_v57  ;;  %v1458_v39 = vpack.i.b16 %v1082_v19, %v1023_v25 }
 0x192   : > { %v1442_v44 = vshrl.u32 %v1065_v24, 16  ;;  %4218 = vmatprep.subr.bf16.mxu0 %v4511_v14  ;;  %v1117_v51 = vcombine.high %v4674_v55, %v4677_v56  ;;  %v909_v54 = vrot.slane %v895_v28, %v4624_v63  ;;  %v603_v58 = vrot.slane %v4680_v46, %v4614_v47 }
 0x193   : > { %v532_v59 = vrot.slane %v524_v29, %v4624_v63  ;;  %v539_v62 = vrot.slane %v525_v33, %v4624_v63  ;;  %v1440_v0 = vpack.i.b16 %v1065_v24, %v1006_v32  ;;  %v1461_v3 = vpack.i.b16 %v1460_v40, %v1459_v49 }
 0x194   : > { %v1190_v6 = vrot.slane %v1176_v41, %v4624_v63  ;;  %v911_v7 = vcombine.high %v4746_v34, %v4763_v10  ;;  %v4065_v12 = vcombine.low %v4760_v50, %v775_v43  ;;  %v658_v13 = vcombine.low %v603_v58, %v618_v38 }
 0x195   : > { %v659_v15 = vcombine.high %v603_v58, %v618_v38  ;;  %4203 = vmatmul.mubr.msk.bf16.vlgmr.msra.gmra.mrb[0].mxu1 %vm1582_vm2, %v1440_v0  ;;  %v1679_v46 = vsel %vm1582_vm2, %v1458_v39, 0  ;;  %v1443_v17 = vpack.i.b16 %v1442_v44, %v1441_v8  ;;  %v1081_v18 = vcombine.high %v1065_v24, %v4518_v30 }
 0x196   : > { %v1131_v19 = vrot.slane %v1117_v51, %v4624_v63  ;;  %v4069_v22 = vcombine.low %v902_v36, %v909_v54  ;;  %v4071_v9 = vcombine.high %v902_v36, %v909_v54  ;;  %4213 = vmatpush3.bf16.xpose.msra.mxu1 %v1679_v46  ;;  %4214 = vmatprep.mubr.msk.bf16.mxu1 %vm4515_vm1, %v4511_v14  ;;  %v1725_v25 = vsel %vm1582_vm2, %v1461_v3, 0 }
 0x197   : > { %v4050_v1 = vcombine.low %v532_v59, %v539_v62  ;;  %v1022_v28 = vcombine.high %v1006_v32, %v4518_v30  ;;  %4224 = vmatprep.subr.bf16.mxu1 %v4511_v14  ;;  %v1490_v24 = vshrl.u32 %v1190_v6, 16  ;;  %v666_v29 = vrot.slane %v658_v13, %v4624_v63 }
 0x198   : > { %4209 = vmatmul.mubr.msk.bf16.vlgmr.msra.gmra.mrb[4].mxu0 %vm1582_vm2, %v1443_v17  ;;  %v673_v50 = vrot.slane %v659_v15, %v4624_v63  ;;  %v4052_v43 = vcombine.high %v532_v59, %v539_v62  ;;  %v1175_v33 = vcombine.low %v4775_v23, %v4781_v60  ;;  %v1488_v57 = vpack.i.b16 %v1190_v6, %v1131_v19 }
 0x199   : > { %4219 = vmatpush3.bf16.xpose.msra.mxu0 %v1725_v25  ;;  %4220 = vmatprep.mubr.msk.bf16.mxu0 %vm4515_vm1, %v4511_v14  ;;  %v1448_v40 = vshrl.u32 %v1081_v18, 16  ;;  %v1489_v32 = vshrl.u32 %v1131_v19, 16  ;;  %v4831_v41 = vrot.slane %v4065_v12, %v4614_v47  ;;  %v4834_v36 = vrot.slane %v4067_v20, %v4614_v47 }
 0x19a   : > { %4230 = vmatprep.subr.bf16.mxu0 %v4511_v14  ;;  %v4837_v38 = vrot.slane %v4069_v22, %v4614_v47  ;;  %v4840_v39 = vrot.slane %v4071_v9, %v4614_v47  ;;  %v1446_v44 = vpack.i.b16 %v1081_v18, %v1022_v28  ;;  %v1447_v49 = vshrl.u32 %v1022_v28, 16 }
 0x19b   : > { %v1491_v23 = vpack.i.b16 %v1490_v24, %v1489_v32  ;;  %v1200_v60 = vcombine.high %v1190_v6, %v4518_v30  ;;  %v981_v51 = vrot.slane %v4050_v1, %v4614_v47  ;;  %v997_v54 = vrot.slane %v4052_v43, %v4614_v47 }
 0x19c   : > { %v4054_v58 = vcombine.low %v666_v29, %v673_v50  ;;  %v4056_v59 = vcombine.high %v666_v29, %v673_v50  ;;  %v1771_v62 = vsel %vm1582_vm2, %v1488_v57, 0  ;;  %v1449_v0 = vpack.i.b16 %v1448_v40, %v1447_v49 }
 0x19d   : > { %4215 = vmatmul.mubr.msk.bf16.vlgmr.msra.gmra.mrb[4].mxu1 %vm1582_vm2, %v1446_v44  ;;  %v1183_v8 = vrot.slane %v1175_v33, %v4624_v63  ;;  %v1141_v3 = vcombine.high %v1131_v19, %v4518_v30  ;;  %v4853_v6 = vrot.slane %v777_v5, %v4624_v63  ;;  %v1124_v12 = vrot.slane %v1116_v16, %v4624_v63 }
 0x19e   : > { %4225 = vmatpush3.bf16.xpose.msra.mxu1 %v1771_v62  ;;  %4226 = vmatprep.mubr.msk.bf16.mxu1 %vm4515_vm1, %v4511_v14  ;;  %v1294_v13 = vcombine.high %v4837_v38, %v4840_v39  ;;  %v918_v15 = vrot.slane %v910_v21, %v4624_v63  ;;  %v925_v26 = vrot.slane %v911_v7, %v4624_v63  ;;  %v1817_v27 = vsel %vm1582_vm2, %v1491_v23, 0 }
 0x19f   : > { %4236 = vmatprep.subr.bf16.mxu1 %v4511_v14  ;;  %v1496_v5 = vshrl.u32 %v1200_v60, 16  ;;  %v1040_v55 = vrot.slane %v4054_v58, %v4614_v47  ;;  %v1056_v56 = vrot.slane %v4056_v59, %v4614_v47  ;;  %v1235_v16 = vcombine.high %v4831_v41, %v4834_v36 }
 0x1a0   : > { %4221 = vmatmul.mubr.msk.bf16.vlgmr.msra.gmra.mrb[8].mxu0 %vm1582_vm2, %v1449_v0  ;;  %v1494_v34 = vpack.i.b16 %v1200_v60, %v1141_v3  ;;  %v1478_v10 = vshrl.u32 %v1183_v8, 16  ;;  %v1495_v21 = vshrl.u32 %v1141_v3, 16  ;;  %v1014_v7 = vcombine.low %v981_v51, %v997_v54 }
 0x1a1   : > { %4231 = vmatpush3.bf16.xpose.msra.mxu0 %v1817_v27  ;;  %4232 = vmatprep.mubr.msk.bf16.mxu0 %vm4515_vm1, %v4511_v14  ;;  %v4073_v46 = vcombine.low %v4793_v4, %v4853_v6  ;;  %v4075_v17 = vcombine.high %v4793_v4, %v4853_v6  ;;  %v1477_v18 = vshrl.u32 %v1124_v12, 16  ;;  %v1308_v19 = vrot.slane %v1294_v13, %v4624_v63 }
 0x1a2   : > { %4242 = vmatprep.subr.bf16.mxu0 %v4511_v14  ;;  %v1476_v20 = vpack.i.b16 %v1183_v8, %v1124_v12  ;;  %v1497_v22 = vpack.i.b16 %v1496_v5, %v1495_v21  ;;  %v1140_v9 = vcombine.high %v1124_v12, %v4518_v30  ;;  %v1199_v1 = vcombine.high %v1183_v8, %v4518_v30 }
 0x1a3   : > { %v4077_v25 = vcombine.low %v918_v15, %v925_v26  ;;  %v1249_v28 = vrot.slane %v1235_v16, %v4624_v63  ;;  %v4887_v24 = vrot.slane %v1014_v7, %v4624_v63  ;;  %v1073_v29 = vcombine.low %v1040_v55, %v1056_v56 }
 0x1a4   : > { %v1099_v4 = vrot.slane %v4058_v45, %v4614_v47  ;;  %v1115_v50 = vrot.slane %v4060_v48, %v4614_v47  ;;  %v1863_v43 = vsel %vm1582_vm2, %v1494_v34, 0  ;;  %v1479_v33 = vpack.i.b16 %v1478_v10, %v1477_v18 }
 0x1a5   : > { %4227 = vmatmul.mubr.msk.bf16.vlgmr.msra.gmra.mrb[8].mxu1 %vm1582_vm2, %v1476_v20  ;;  %v1234_v57 = vcombine.low %v4831_v41, %v4834_v36  ;;  %v4079_v40 = vcombine.high %v918_v15, %v925_v26  ;;  %v1526_v32 = vshrl.u32 %v1308_v19, 16  ;;  %v4904_v45 = vrot.slane %v1073_v29, %v4624_v63 }
 0x1a6   : > { %4237 = vmatpush3.bf16.xpose.msra.mxu1 %v1863_v43  ;;  %4238 = vmatprep.mubr.msk.bf16.mxu1 %vm4515_vm1, %v4511_v14  ;;  %v1909_v35 = vsel %vm1582_vm2, %v1497_v22, 0  ;;  %v1482_v37 = vpack.i.b16 %v1199_v1, %v1140_v9  ;;  %v1293_v48 = vcombine.low %v4837_v38, %v4840_v39  ;;  %v1483_v41 = vshrl.u32 %v1140_v9, 16 }
 0x1a7   : > { %4248 = vmatprep.subr.bf16.mxu1 %v4511_v14  ;;  %v1484_v36 = vshrl.u32 %v1199_v1, 16  ;;  %v1525_v44 = vshrl.u32 %v1249_v28, 16  ;;  %v4914_v49 = vrot.slane %v4077_v25, %v4614_v47  ;;  %v4918_v23 = vcombine.high %v4887_v24, %v4518_v30 }
 0x1a8   : > { %4233 = vmatmul.mubr.msk.bf16.vlgmr.msra.gmra.mrb[12].mxu0 %vm1582_vm2, %v1479_v33  ;;  %v1524_v60 = vpack.i.b16 %v1308_v19, %v1249_v28  ;;  %v4923_v38 = vcombine.high %v4904_v45, %v4518_v30  ;;  %v1132_v39 = vcombine.low %v1099_v4, %v1115_v50  ;;  %v1158_v51 = vrot.slane %v4062_v42, %v4614_v47 }
 0x1a9   : > { %4243 = vmatpush3.bf16.xpose.msra.mxu0 %v1909_v35  ;;  %4244 = vmatprep.mubr.msk.bf16.mxu0 %vm4515_vm1, %v4511_v14  ;;  %v1527_v54 = vpack.i.b16 %v1526_v32, %v1525_v44  ;;  %v1318_v58 = vcombine.high %v1308_v19, %v4518_v30  ;;  %v4931_v59 = vrot.slane %v4079_v40, %v4614_v47  ;;  %v1471_v8 = vshrl.u32 %v4918_v23, 16 }
 0x1aa   : > { %4254 = vmatprep.subr.bf16.mxu0 %v4511_v14  ;;  %v1174_v62 = vrot.slane %v4064_v2, %v4614_v47  ;;  %v1470_v0 = vpack.i.b16 %v4923_v38, %v4918_v23  ;;  %v1472_v3 = vshrl.u32 %v4923_v38, 16  ;;  %v4942_v42 = vrot.slane %v1132_v39, %v4624_v63 }
 0x1ab   : > { %v4945_v6 = vrot.slane %v4073_v46, %v4614_v47  ;;  %v4948_v12 = vrot.slane %v4075_v17, %v4614_v47  ;;  %v1259_v13 = vcombine.high %v1249_v28, %v4518_v30  ;;  %v1955_v53 = vsel %vm1582_vm2, %v1524_v60, 0 }
 0x1ac   : > { %v1191_v52 = vcombine.low %v1158_v51, %v1174_v62  ;;  %v1485_v2 = vpack.i.b16 %v1484_v36, %v1483_v41  ;;  %v1301_v15 = vrot.slane %v1293_v48, %v4624_v63  ;;  %v4954_v26 = vpack.i.b16 %v1472_v3, %v1471_v8 }
 0x1ad   : > { %4239 = vmatmul.mubr.msk.bf16.vlgmr.msra.gmra.mrb[12].mxu1 %vm1582_vm2, %v1482_v37  ;;  %v4963_v5 = vcombine.high %v4942_v42, %v4518_v30  ;;  %v2001_v55 = vsel %vm1582_vm2, %v1527_v54, 0  ;;  %v1242_v56 = vrot.slane %v1234_v57, %v4624_v63  ;;  %v1532_v16 = vshrl.u32 %v1318_v58, 16 }
 0x1ae   : > { %4249 = vmatpush3.bf16.xpose.msra.mxu1 %v1955_v53  ;;  %4250 = vmatprep.mubr.msk.bf16.mxu1 %vm4515_vm1, %v4511_v14  ;;  %v4959_v27 = vrot.slane %v1191_v52, %v4624_v63  ;;  %v1412_v34 = vcombine.high %v4914_v49, %v4931_v59  ;;  %v1501_v21 = vshrl.u32 %v4942_v42, 16  ;;  %v1530_v17 = vpack.i.b16 %v1318_v58, %v1259_v13 }
 0x1af   : > { %4260 = vmatprep.subr.bf16.mxu1 %v4511_v14  ;;  %v1514_v18 = vshrl.u32 %v1301_v15, 16  ;;  %v1531_v19 = vshrl.u32 %v1259_v13, 16  ;;  %v1353_v20 = vcombine.high %v4945_v6, %v4948_v12  ;;  %v1507_v1 = vshrl.u32 %v4963_v5, 16 }
 0x1b0   : > { %4245 = vmatmul.mubr.msk.bf16.vlgmr.msra.gmra.mrb[16].mxu0 %vm1582_vm2, %v1485_v2  ;;  %v1500_v10 = vpack.i.b16 %v4959_v27, %v4942_v42  ;;  %v1502_v7 = vshrl.u32 %v4959_v27, 16  ;;  %v4979_v46 = vcombine.high %v4959_v27, %v4518_v30  ;;  %v1512_v28 = vpack.i.b16 %v1301_v15, %v1242_v56 }
 0x1b1   : > { %4255 = vmatpush3.bf16.xpose.msra.mxu0 %v2001_v55  ;;  %4256 = vmatprep.mubr.msk.bf16.mxu0 %vm4515_vm1, %v4511_v14  ;;  %v1513_v29 = vshrl.u32 %v1242_v56, 16  ;;  %v1533_v4 = vpack.i.b16 %v1532_v16, %v1531_v19  ;;  %v1426_v50 = vrot.slane %v1412_v34, %v4624_v63  ;;  %v2047_v33 = vsel %vm1582_vm2, %v1530_v17, 0 }
 0x1b2   : > { %4266 = vmatprep.subr.bf16.mxu0 %v4511_v14  ;;  %v4984_v22 = vpack.i.b16 %v1502_v7, %v1501_v21  ;;  %v1506_v9 = vpack.i.b16 %v4979_v46, %v4963_v5  ;;  %v1508_v25 = vshrl.u32 %v4979_v46, 16  ;;  %v1317_v40 = vcombine.high %v1301_v15, %v4518_v30 }
 0x1b3   : > { %v1515_v57 = vpack.i.b16 %v1514_v18, %v1513_v29  ;;  %v1367_v32 = vrot.slane %v1353_v20, %v4624_v63  ;;  %v2093_v35 = vsel %vm1582_vm2, %v1533_v4, 0  ;;  %v1258_v37 = vcombine.high %v1242_v56, %v4518_v30 }
 0x1b4   : > { %v4991_v43 = vpack.i.b16 %v1508_v25, %v1507_v1  ;;  %v1562_v48 = vshrl.u32 %v1426_v50, 16  ;;  %v1411_v41 = vcombine.low %v4914_v49, %v4931_v59  ;;  %v1520_v44 = vshrl.u32 %v1317_v40, 16 }
 0x1b5   : > { %4251 = vmatmul.mubr.msk.bf16.vlgmr.msra.gmra.mrb[16].mxu1 %vm1582_vm2, %v1512_v28  ;;  %v1560_v36 = vpack.i.b16 %v1426_v50, %v1367_v32  ;;  %v1561_v60 = vshrl.u32 %v1367_v32, 16  ;;  %v1352_v39 = vcombine.low %v4945_v6, %v4948_v12  ;;  %v1518_v51 = vpack.i.b16 %v1317_v40, %v1258_v37 }
 0x1b6   : > { %4261 = vmatpush3.bf16.xpose.msra.mxu1 %v2047_v33  ;;  %4262 = vmatprep.mubr.msk.bf16.mxu1 %vm4515_vm1, %v4511_v14  ;;  %v1519_v54 = vshrl.u32 %v1258_v37, 16  ;;  %v1436_v62 = vcombine.high %v1426_v50, %v4518_v30  ;;  %v1419_v49 = vrot.slane %v1411_v41, %v4624_v63  ;;  %v1377_v59 = vcombine.high %v1367_v32, %v4518_v30 }
 0x1b7   : > { %4272 = vmatprep.subr.bf16.mxu1 %v4511_v14  ;;  %v1563_v58 = vpack.i.b16 %v1562_v48, %v1561_v60  ;;  %v2139_v8 = vsel %vm1582_vm2, %v1560_v36, 0  ;;  %v1360_v12 = vrot.slane %v1352_v39, %v4624_v63  ;;  %v1466_v18 = vshrl.u32 %v4904_v45, 16 }
 0x1b8   : > { %4257 = vmatmul.mubr.msk.bf16.vlgmr.msra.gmra.mrb[20].mxu0 %vm1582_vm2, %v1515_v57  ;;  %v1521_v3 = vpack.i.b16 %v1520_v44, %v1519_v54  ;;  %v1568_v13 = vshrl.u32 %v1436_v62, 16  ;;  %v1566_v52 = vpack.i.b16 %v1436_v62, %v1377_v59  ;;  %v1550_v53 = vshrl.u32 %v1419_v49, 16 }
 0x1b9   : > { %4267 = vmatpush3.bf16.xpose.msra.mxu0 %v2093_v35  ;;  %4268 = vmatprep.mubr.msk.bf16.mxu0 %vm4515_vm1, %v4511_v14  ;;  %v2185_v6 = vsel %vm1582_vm2, %v1563_v58, 0  ;;  %v1567_v2 = vshrl.u32 %v1377_v59, 16  ;;  %v1548_v15 = vpack.i.b16 %v1419_v49, %v1360_v12  ;;  %v1549_v55 = vshrl.u32 %v1360_v12, 16 }
 0x1ba   : > { %4278 = vmatprep.subr.bf16.mxu0 %v4511_v14  ;;  %v2231_v16 = vsel %vm1582_vm2, %v1566_v52, 0  ;;  %v1435_v21 = vcombine.high %v1419_v49, %v4518_v30  ;;  %v1376_v17 = vcombine.high %v1360_v12, %v4518_v30  ;;  %v1464_v19 = vpack.i.b16 %v4904_v45, %v4887_v24 }
 0x1bb   : > { %v1569_v56 = vpack.i.b16 %v1568_v13, %v1567_v2  ;;  %v1551_v34 = vpack.i.b16 %v1550_v53, %v1549_v55  ;;  %v1465_v1 = vshrl.u32 %v4887_v24, 16  ;;  %v2822_v5 = vsel %vm2498_vm3, %v4991_v43, 0 }
 0x1bc   : > { %v1556_v20 = vshrl.u32 %v1435_v21, 16  ;;  %v1554_v25 = vpack.i.b16 %v1435_v21, %v1376_v17  ;;  %v1555_v28 = vshrl.u32 %v1376_v17, 16  ;;  %v2500_v4 = vsel %vm2498_vm3, %v1464_v19, 0 }
 0x1bd   : > { %4263 = vmatmul.mubr.msk.bf16.vlgmr.msra.gmra.mrb[20].mxu1 %vm1582_vm2, %v1518_v51  ;;  %v2277_v7 = vsel %vm1582_vm2, %v1569_v56, 0  ;;  %v1467_v29 = vpack.i.b16 %v1466_v18, %v1465_v1 }
 0x1be   : > { %4273 = vmatpush3.bf16.xpose.msra.mxu1 %v2139_v8  ;;  %4274 = vmatprep.mubr.msk.bf16.mxu1 %vm4515_vm1, %v4511_v14  ;;  %v1557_v50 = vpack.i.b16 %v1556_v20, %v1555_v28 }
 0x1bf   : > { %4284 = vmatprep.subr.bf16.mxu1 %v4511_v14  ;;  %v2546_v45 = vsel %vm2498_vm3, %v1467_v29, 0 }
 0x1c0   : > { %4269 = vmatmul.mubr.msk.bf16.vlgmr.msra.gmra.mrb[24].mxu0 %vm1582_vm2, %v1521_v3 }
 0x1c1   : > { %4279 = vmatpush3.bf16.xpose.msra.mxu0 %v2185_v6  ;;  %4280 = vmatprep.mubr.msk.bf16.mxu0 %vm4515_vm1, %v4511_v14 }
 0x1c2   : > { %4290 = vmatprep.subr.bf16.mxu0 %v4511_v14 }
 0x1c5   : > { %4275 = vmatmul.mubr.msk.bf16.vlgmr.msra.gmra.mrb[24].mxu1 %vm1582_vm2, %v1548_v15 }
 0x1c6   : > { %4285 = vmatpush3.bf16.xpose.msra.mxu1 %v2231_v16  ;;  %4286 = vmatprep.mubr.msk.bf16.mxu1 %vm4515_vm1, %v4511_v14 }
 0x1c7   : > { %4296 = vmatprep.subr.bf16.mxu1 %v4511_v14 }
 0x1c8   : > { %4281 = vmatmul.mubr.msk.bf16.vlgmr.msra.gmra.mrb[28].mxu0 %vm1582_vm2, %v1551_v34 }
 0x1c9   : > { %4291 = vmatpush3.bf16.xpose.msra.mxu0 %v2277_v7  ;;  %4292 = vmatprep.mubr.msk.bf16.mxu0 %vm4515_vm1, %v4511_v14 }
 0x1ca   : > { %4302 = vmatprep.subr.bf16.mxu0 %v4511_v14 }
 0x1cd   : > { %4287 = vmatmul.mubr.msk.bf16.vlgmr.msra.gmra.mrb[28].mxu1 %vm1582_vm2, %v1554_v25 }
 0x1ce   : > { %4297 = vmatpush3.bf16.msra.mxu1 %v2500_v4  ;;  %4298 = vmatprep.mubr.msk.bf16.mxu1 %vm4515_vm1, %v4511_v14 }
 0x1cf   : > { %4308 = vmatprep.subr.bf16.mxu1 %v4511_v14 }
 0x1d0   : > { %4293 = vmatmul.mubr.msk.bf16.vlgmr.msra.gmra.mrb[32].mxu0 %vm1582_vm2, %v1557_v50 }
 0x1d1   : > { %4303 = vmatpush3.bf16.msra.mxu0 %v2546_v45  ;;  %4304 = vmatprep.mubr.msk.bf16.mxu0 %vm4515_vm1, %v4511_v14 }
 0x1d2   : > { %4314 = vmatprep.subr.bf16.mxu0 %v4511_v14 }
 0x268   : > { %v5050_v24 = vpop.f32.mrb[0].mxu1 }
 0x269   : > { %v4204_v33 = vpop.f32.mrb[1].mxu1  ;;  %v2319_v57 = vsel %vm1582_vm2, %v5050_v24, -inf }
 0x26a   : > { %2320 = vmax.xlane.f32.xlu0 %v2319_v57  ;;  %v1626_v32 = vpop.f32.mrb[2].mxu1 }
 0x26b   : > { %v5054_v40 = vpop.f32.mrb[4].mxu0  ;;  %v4205_v35 = vpop.f32.mrb[3].mxu1 }
 0x26c   : > { %v4210_v37 = vpop.f32.mrb[5].mxu0  ;;  %v2322_v48 = vsel %vm1582_vm2, %v5054_v40, -inf }
 0x26d   : > { %2323 = vmax.xlane.f32.xlu1 %v2322_v48  ;;  %v1672_v41 = vpop.f32.mrb[6].mxu0 }
 0x26e   : > { %v4211_v36 = vpop.f32.mrb[7].mxu0 }
 0x270   : > { %v5058_v44 = vpop.f32.mrb[4].mxu1 }
 0x271   : > { %v4216_v60 = vpop.f32.mrb[5].mxu1  ;;  %v2325_v39 = vsel %vm1582_vm2, %v5058_v44, -inf }
 0x272   : > { %2326 = vmax.xlane.f32.xlu0 %v2325_v39  ;;  %v1718_v54 = vpop.f32.mrb[6].mxu1 }
 0x273   : > { %v5062_v51 = vpop.f32.mrb[8].mxu0  ;;  %v4217_v58 = vpop.f32.mrb[7].mxu1 }
 0x274   : > { %v4222_v62 = vpop.f32.mrb[9].mxu0  ;;  %v2328_v8 = vsel %vm1582_vm2, %v5062_v51, -inf }
 0x275   : > { %2329 = vmax.xlane.f32.xlu1 %v2328_v8  ;;  %v1764_v3 = vpop.f32.mrb[10].mxu0 }
 0x276   : > { %v4223_v49 = vpop.f32.mrb[11].mxu0 }
 0x278   : > { %v5066_v59 = vpop.f32.mrb[8].mxu1 }
 0x279   : > { %v4228_v6 = vpop.f32.mrb[9].mxu1  ;;  %v2331_v12 = vsel %vm1582_vm2, %v5066_v59, -inf }
 0x27a   : > { %2332 = vmax.xlane.f32.xlu0 %v2331_v12  ;;  %v1810_v52 = vpop.f32.mrb[10].mxu1 }
 0x27b   : > { %v5070_v13 = vpop.f32.mrb[12].mxu0  ;;  %v4229_v53 = vpop.f32.mrb[11].mxu1 }
 0x27c   : > { %v4234_v2 = vpop.f32.mrb[13].mxu0  ;;  %v2334_v56 = vsel %vm1582_vm2, %v5070_v13, -inf }
 0x27d   : > { %v1856_v15 = vpop.f32.mrb[14].mxu0 }
 0x27e   : > { %v4235_v55 = vpop.f32.mrb[15].mxu0  ;;  %2335 = vmax.xlane.f32.xlu0 %v2334_v56 }
 0x280   : > { %v5074_v16 = vpop.f32.mrb[12].mxu1 }
 0x281   : > { %v4240_v34 = vpop.f32.mrb[13].mxu1  ;;  %v2337_v21 = vsel %vm1582_vm2, %v5074_v16, -inf }
 0x282   : > { %2338 = vmax.xlane.f32.xlu1 %v2337_v21  ;;  %v1902_v17 = vpop.f32.mrb[14].mxu1 }
 0x283   : > { %v5078_v7 = vpop.f32.mrb[16].mxu0  ;;  %v4241_v18 = vpop.f32.mrb[15].mxu1 }
 0x284   : > { %v4246_v19 = vpop.f32.mrb[17].mxu0  ;;  %v2340_v20 = vsel %vm1582_vm2, %v5078_v7, -inf }
 0x285   : > { %v1948_v1 = vpop.f32.mrb[18].mxu0  ;;  %2341 = vmax.xlane.f32.xlu0 %v2340_v20 }
 0x286   : > { %v4247_v25 = vpop.f32.mrb[19].mxu0 }
 0x288   : > { %v5082_v28 = vpop.f32.mrb[16].mxu1 }
 0x289   : > { %v4252_v29 = vpop.f32.mrb[17].mxu1  ;;  %v2343_v4 = vsel %vm1582_vm2, %v5082_v28, -inf }
 0x28a   : > { %2344 = vmax.xlane.f32.xlu1 %v2343_v4  ;;  %v1994_v45 = vpop.f32.mrb[18].mxu1 }
 0x28b   : > { %v5086_v50 = vpop.f32.mrb[20].mxu0  ;;  %v4253_v33 = vpop.f32.mrb[19].mxu1 }
 0x28c   : > { %v4258_v57 = vpop.f32.mrb[21].mxu0  ;;  %v2346_v32 = vsel %vm1582_vm2, %v5086_v50, -inf }
 0x28d   : > { %v2040_v35 = vpop.f32.mrb[22].mxu0  ;;  %2347 = vmax.xlane.f32.xlu0 %v2346_v32 }
 0x28e   : > { %v4259_v37 = vpop.f32.mrb[23].mxu0 }
 0x290   : > { %v5090_v48 = vpop.f32.mrb[20].mxu1 }
 0x291   : > { %v4264_v41 = vpop.f32.mrb[21].mxu1  ;;  %v2349_v20 = vsel %vm1582_vm2, %v5090_v48, -inf }
 0x292   : > { %v2086_v36 = vpop.f32.mrb[22].mxu1 }
 0x293   : > { %v5092_v60 = vpop.f32.mrb[24].mxu0  ;;  %v4265_v39 = vpop.f32.mrb[23].mxu1 }
 0x294   : > { %v4270_v54 = vpop.f32.mrb[25].mxu0  ;;  %v2352_v1 = vsel %vm1582_vm2, %v5092_v60, -inf }
 0x295   : > { %v2132_v58 = vpop.f32.mrb[26].mxu0 }
 0x296   : > { %v4271_v62 = vpop.f32.mrb[27].mxu0 }
 0x298   : > { %v5094_v8 = vpop.f32.mrb[24].mxu1 }
 0x299   : > { %v4276_v3 = vpop.f32.mrb[25].mxu1  ;;  %v2355_v25 = vsel %vm1582_vm2, %v5094_v8, -inf }
 0x29a   : > { %v2178_v49 = vpop.f32.mrb[26].mxu1 }
 0x29b   : > { %v5096_v6 = vpop.f32.mrb[28].mxu0  ;;  %322 = vrot.lane.b32.xlu1 %v4571_v11, %s4513_s9  ;;  %v4277_v52 = vpop.f32.mrb[27].mxu1 }
 0x29c   : > { %v4282_v12 = vpop.f32.mrb[29].mxu0  ;;  %v2358_v29 = vsel %vm1582_vm2, %v5096_v6, -inf }
 0x29d   : > { %v2224_v53 = vpop.f32.mrb[30].mxu0 }
 0x29e   : > { %v4283_v2 = vpop.f32.mrb[31].mxu0 }
 0x29f   : > { %326 = vrot.lane.b32.xlu1 %v4571_v11, %s4514_s10 }
 0x2a0   : > { %v5102_v15 = vpop.f32.mrb[28].mxu1 }
 0x2a1   : > { %v4288_v55 = vpop.f32.mrb[29].mxu1 }
 0x2a2   : > { %v2270_v34 = vpop.f32.mrb[30].mxu1  ;;  %v2638_v55 = vsel %vm2498_vm3, %v4954_v26, 0 }
 0x2a3   : > { %v5104_v56 = vpop.f32.mrb[32].mxu0  ;;  %318 = vrot.lane.b32.xlu0 %v4571_v11, %s4512_s8  ;;  %v4289_v21 = vpop.f32.mrb[31].mxu1  ;;  %v2361_v11 = vsel %vm1582_vm2, %v5102_v15, -inf }
 0x2a4   : > { %v4294_v17 = vpop.f32.mrb[33].mxu0  ;;  %v2364_v4 = vsel %vm1582_vm2, %v5104_v56, -inf }
 0x2a5   : > { %v2316_v18 = vpop.f32.mrb[34].mxu0 }
 0x2a6   : > { %v4295_v19 = vpop.f32.mrb[35].mxu0 }
 0x2c2   : > { %2350 = vmax.xlane.f32.xlu0 %v2349_v20 }
 0x2c3   : > { %2353 = vmax.xlane.f32.xlu1 %v2352_v1 }
 0x2c6   : > { %2356 = vmax.xlane.f32.xlu0 %v2355_v25 }
 0x2c7   : > { %2362 = vmax.xlane.f32.xlu1 %v2361_v11 }
 0x2ca   : > { %2359 = vmax.xlane.f32.xlu0 %v2358_v29 }
 0x2ce   : > { %2365 = vmax.xlane.f32.xlu0 %v2364_v4  ;;  %v2776_v4 = vsel %vm2498_vm3, %v1506_v9, 0 }
 0x2f7   : > { %v2321_v45 = vpop.xlane.xlu0 %2320 }
 0x2f8   : > { %v2367_v33 = vsub.f32 %v5050_v24, %v2321_v45 }
 0x2fa   : > { %v2324_v57 = vpop.xlane.xlu1 %2323  ;;  %v2383_v32 = vmul.f32 1.442695, %v2367_v33 }
 0x2fb   : > { %v2368_v35 = vsub.f32 %v5054_v40, %v2324_v57 }
 0x2fc   : > { %4431 = vpow2.f32 %v2383_v32 }
 0x2fd   : > { %v2385_v37 = vmul.f32 1.442695, %v2368_v35 }
 0x2ff   : > { %4433 = vpow2.f32 %v2385_v37  ;;  %v2327_v41 = vpop.xlane.xlu0 %2326 }
 0x300   : > { %v2369_v36 = vsub.f32 %v5058_v44, %v2327_v41  ;;  %v2592_v44 = vsel %vm2498_vm3, %v1470_v0, 0 }
 0x302   : > { %v2330_v39 = vpop.xlane.xlu1 %2329  ;;  %v2387_v54 = vmul.f32 1.442695, %v2369_v36  ;;  %v418_v36 = vshrl.u32 %v4622_v61, 16 }
 0x303   : > { %v2370_v58 = vsub.f32 %v5062_v51, %v2330_v39 }
 0x304   : > { %4435 = vpow2.f32 %v2387_v54 }
 0x305   : > { %v2389_v62 = vmul.f32 1.442695, %v2370_v58 }
 0x306   : > { %v4432_v3 = vpop.eup %4431 }
 0x307   : > { %4437 = vpow2.f32 %v2389_v62  ;;  %v2333_v49 = vpop.xlane.xlu0 %2332  ;;  %v2415_v24 = vsel %vm1582_vm2, %v4432_v3, 0.0  ;;  %v2479_v12 = vpack.c.bf16 %v4432_v3, %v4432_v3 }
 0x308   : > { %v2371_v40 = vsub.f32 %v5066_v59, %v2333_v49  ;;  %2416 = vadd.xlane.f32.xlu1 %v2415_v24 }
 0x309   : > { %v4434_v52 = vpop.eup %4433  ;;  %4299 = vmatmul.mubr.msk.bf16.vlgmr.msra.gmra.mrb[32].mxu1 %vm1582_vm2, %v2479_v12 }
 0x30a   : > { %v2418_v51 = vsel %vm1582_vm2, %v4434_v52, 0.0  ;;  %v2480_v53 = vpack.c.bf16 %v4434_v52, %v4434_v52  ;;  %v2391_v2 = vmul.f32 1.442695, %v2371_v40  ;;  %4309 = vmatpush3.bf16.msra.mxu1 %v2592_v44  ;;  %4310 = vmatprep.mubr.msk.bf16.mxu1 %vm4515_vm1, %v4511_v14 }
 0x30b   : > { %2419 = vadd.xlane.f32.xlu0 %v2418_v51  ;;  %v2336_v59 = vpop.xlane.xlu0 %2335  ;;  %4320 = vmatprep.subr.bf16.mxu1 %v4511_v14 }
 0x30c   : > { %4305 = vmatmul.mubr.msk.bf16.vlgmr.msra.gmra.mrb[36].mxu0 %vm1582_vm2, %v2480_v53  ;;  %4439 = vpow2.f32 %v2391_v2  ;;  %v2372_v23 = vsub.f32 %v5070_v13, %v2336_v59  ;;  %v2684_v13 = vsel %vm2498_vm3, %v1500_v10, 0 }
 0x30d   : > { %4315 = vmatpush3.bf16.msra.mxu0 %v2638_v55  ;;  %4316 = vmatprep.mubr.msk.bf16.mxu0 %vm4515_vm1, %v4511_v14 }
 0x30e   : > { %4326 = vmatprep.subr.bf16.mxu0 %v4511_v14  ;;  %v4436_v38 = vpop.eup %4435  ;;  %v2393_v0 = vmul.f32 1.442695, %v2372_v23 }
 0x30f   : > { %v2339_v34 = vpop.xlane.xlu1 %2338  ;;  %v2421_v26 = vsel %vm1582_vm2, %v4436_v38, 0.0  ;;  %v2481_v21 = vpack.c.bf16 %v4436_v38, %v4436_v38 }
 0x310   : > { %4441 = vpow2.f32 %v2393_v0  ;;  %v2373_v18 = vsub.f32 %v5074_v16, %v2339_v34  ;;  %2422 = vadd.xlane.f32.xlu1 %v2421_v26  ;;  %v2730_v16 = vsel %vm2498_vm3, %v4984_v22, 0 }
 0x311   : > { %v4438_v17 = vpop.eup %4437  ;;  %4311 = vmatmul.mubr.msk.bf16.vlgmr.msra.gmra.mrb[36].mxu1 %vm1582_vm2, %v2481_v21 }
 0x312   : > { %v2342_v19 = vpop.xlane.xlu0 %2341  ;;  %v2424_v20 = vsel %vm1582_vm2, %v4438_v17, 0.0  ;;  %v2482_v1 = vpack.c.bf16 %v4438_v17, %v4438_v17  ;;  %v2395_v25 = vmul.f32 1.442695, %v2373_v18  ;;  %4321 = vmatpush3.bf16.msra.mxu1 %v2684_v13  ;;  %4322 = vmatprep.mubr.msk.bf16.mxu1 %vm4515_vm1, %v4511_v14 }
 0x313   : > { %v2374_v11 = vsub.f32 %v5078_v7, %v2342_v19  ;;  %2425 = vadd.xlane.f32.xlu0 %v2424_v20  ;;  %4332 = vmatprep.subr.bf16.mxu1 %v4511_v14 }
 0x314   : > { %4317 = vmatmul.mubr.msk.bf16.vlgmr.msra.gmra.mrb[40].mxu0 %vm1582_vm2, %v2482_v1  ;;  %4443 = vpow2.f32 %v2395_v25 }
 0x315   : > { %v2397_v42 = vmul.f32 1.442695, %v2374_v11  ;;  %4327 = vmatpush3.bf16.msra.mxu0 %v2730_v16  ;;  %4328 = vmatprep.mubr.msk.bf16.mxu0 %vm4515_vm1, %v4511_v14 }
 0x316   : > { %4338 = vmatprep.subr.bf16.mxu0 %v4511_v14  ;;  %v4440_v27 = vpop.eup %4439 }
 0x317   : > { %4445 = vpow2.f32 %v2397_v42  ;;  %v2345_v10 = vpop.xlane.xlu1 %2344  ;;  %v2427_v7 = vsel %vm1582_vm2, %v4440_v27, 0.0  ;;  %v2483_v29 = vpack.c.bf16 %v4440_v27, %v4440_v27 }
 0x318   : > { %v2375_v22 = vsub.f32 %v5082_v28, %v2345_v10  ;;  %2428 = vadd.xlane.f32.xlu1 %v2427_v7 }
 0x319   : > { %4323 = vmatmul.mubr.msk.bf16.vlgmr.msra.gmra.mrb[40].mxu1 %vm1582_vm2, %v2483_v29 }
 0x31a   : > { %v2348_v45 = vpop.xlane.xlu0 %2347  ;;  %v4442_v33 = vpop.eup %4441  ;;  %v2399_v57 = vmul.f32 1.442695, %v2375_v22  ;;  %4333 = vmatpush3.bf16.msra.mxu1 %v2776_v4  ;;  %4334 = vmatprep.mubr.msk.bf16.mxu1 %vm4515_vm1, %v4511_v14 }
 0x31b   : > { %v2376_v32 = vsub.f32 %v5086_v50, %v2348_v45  ;;  %v323_v35 = vpop.permute.xlu1 %322  ;;  %v2430_v28 = vsel %vm1582_vm2, %v4442_v33, 0.0  ;;  %v2484_v37 = vpack.c.bf16 %v4442_v33, %v4442_v33  ;;  %4344 = vmatprep.subr.bf16.mxu1 %v4511_v14 }
 0x31c   : > { %4447 = vpow2.f32 %v2399_v57  ;;  %2431 = vadd.xlane.f32.xlu0 %v2430_v28  ;;  %v426_v49 = vshrl.u32 %v323_v35, 16 }
 0x31d   : > { %v2401_v41 = vmul.f32 1.442695, %v2376_v32  ;;  %4329 = vmatmul.mubr.msk.bf16.vlgmr.msra.gmra.mrb[44].mxu0 %vm1582_vm2, %v2484_v37 }
 0x31e   : > { %v319_v46 = vpop.permute.xlu0 %318  ;;  %v4444_v9 = vpop.eup %4443  ;;  %4339 = vmatpush3.bf16.msra.mxu0 %v2822_v5  ;;  %4340 = vmatprep.mubr.msk.bf16.mxu0 %vm4515_vm1, %v4511_v14 }
 0x31f   : > { %4449 = vpow2.f32 %v2401_v41  ;;  %v419_v50 = vshrl.u32 %v319_v46, 16  ;;  %v5179_v39 = vpack.i.b16 %v319_v46, %v4622_v61  ;;  %v327_v54 = vpop.permute.xlu1 %326  ;;  %v2433_v58 = vsel %vm1582_vm2, %v4444_v9, 0.0  ;;  %4350 = vmatprep.subr.bf16.mxu0 %v4511_v14 }
 0x320   : > { %v2485_v62 = vpack.c.bf16 %v4444_v9, %v4444_v9  ;;  %v5183_v3 = vpack.i.b16 %v327_v54, %v323_v35  ;;  %2434 = vadd.xlane.f32.xlu1 %v2433_v58  ;;  %v427_v12 = vshrl.u32 %v327_v54, 16 }
 0x321   : > { %v4446_v43 = vpop.eup %4445  ;;  %v5185_v24 = vpack.i.b16 %v419_v50, %v418_v36  ;;  %v737_v61 = vrot.slane %v5179_v39, %v4614_v47 }
 0x322   : > { %4335 = vmatmul.mubr.msk.bf16.vlgmr.msra.gmra.mrb[44].mxu1 %vm1582_vm2, %v2485_v62  ;;  %v2436_v52 = vsel %vm1582_vm2, %v4446_v43, 0.0  ;;  %v5191_v40 = vpack.i.b16 %v427_v12, %v426_v49  ;;  %v752_v44 = vrot.slane %v5183_v3, %v4614_v47  ;;  %v2486_v51 = vpack.c.bf16 %v4446_v43, %v4446_v43 }
 0x323   : > { %2437 = vadd.xlane.f32.xlu0 %v2436_v52  ;;  %4346 = vmatprep.mubr.msk.bf16.mxu1 %vm4515_vm1, %v4511_v14  ;;  %v871_v53 = vrot.slane %v5185_v24, %v4614_v47  ;;  %v864_v43 = vcombine.high %v5185_v24, %v4647_v31  ;;  %v745_v49 = vcombine.high %v5183_v3, %v4647_v31 }
 0x324   : > { %v792_v2 = vcombine.low %v737_v61, %v752_v44  ;;  %v793_v55 = vcombine.high %v737_v61, %v752_v44  ;;  %v886_v59 = vrot.slane %v5191_v40, %v4614_v47  ;;  %v879_v54 = vcombine.high %v5191_v40, %v4647_v31 }
 0x325   : > { %4341 = vmatmul.mubr.msk.bf16.vlgmr.msra.gmra.mrb[48].mxu0 %vm1582_vm2, %v2486_v51  ;;  %v730_v52 = vcombine.high %v5179_v39, %v4647_v31  ;;  %v878_v24 = vrot.slane %v864_v43, %v4614_v47  ;;  %v759_v3 = vrot.slane %v745_v49, %v4614_v47 }
 0x326   : > { %v4448_v23 = vpop.eup %4447  ;;  %4352 = vmatprep.mubr.msk.bf16.mxu0 %vm4515_vm1, %v4511_v14  ;;  %v800_v38 = vrot.slane %v792_v2, %v4624_v63  ;;  %v807_v0 = vrot.slane %v793_v55, %v4624_v63  ;;  %v926_v34 = vcombine.low %v871_v53, %v886_v59  ;;  %v927_v21 = vcombine.high %v871_v53, %v886_v59 }
 0x327   : > { %v2439_v17 = vsel %vm1582_vm2, %v4448_v23, 0.0  ;;  %v2487_v50 = vpack.c.bf16 %v4448_v23, %v4448_v23  ;;  %v893_v61 = vrot.slane %v879_v54, %v4614_v47  ;;  %v744_v40 = vrot.slane %v730_v52, %v4614_v47 }
 0x328   : > { %v934_v18 = vrot.slane %v926_v34, %v4624_v63  ;;  %v4066_v13 = vcombine.low %v800_v38, %v807_v0  ;;  %2440 = vadd.xlane.f32.xlu1 %v2439_v17  ;;  %v941_v19 = vrot.slane %v927_v21, %v4624_v63  ;;  %v4068_v20 = vcombine.high %v800_v38, %v807_v0 }
 0x329   : > { %v4450_v26 = vpop.eup %4449  ;;  %v942_v44 = vcombine.low %v878_v24, %v893_v61  ;;  %v943_v51 = vcombine.high %v878_v24, %v893_v61  ;;  %v808_v53 = vcombine.low %v744_v40, %v759_v3  ;;  %v809_v2 = vcombine.high %v744_v40, %v759_v3 }
 0x32a   : > { %v1217_v1 = vrot.slane %v4066_v13, %v4614_v47  ;;  %v2442_v25 = vsel %vm1582_vm2, %v4450_v26, 0.0  ;;  %v1233_v11 = vrot.slane %v4068_v20, %v4614_v47  ;;  %v4070_v16 = vcombine.low %v934_v18, %v941_v19 }
 0x32b   : > { %v4072_v42 = vcombine.high %v934_v18, %v941_v19  ;;  %2443 = vadd.xlane.f32.xlu0 %v2442_v25  ;;  %v2488_v62 = vpack.c.bf16 %v4450_v26, %v4450_v26  ;;  %v950_v55 = vrot.slane %v942_v44, %v4624_v63  ;;  %v957_v59 = vrot.slane %v943_v51, %v4624_v63 }
 0x32c   : > { %v1276_v27 = vrot.slane %v4070_v16, %v4614_v47  ;;  %v1250_v7 = vcombine.low %v1217_v1, %v1233_v11  ;;  %v816_v31 = vrot.slane %v808_v53, %v4624_v63  ;;  %v823_v39 = vrot.slane %v809_v2, %v4624_v63 }
 0x32d   : > { %v1292_v10 = vrot.slane %v4072_v42, %v4614_v47  ;;  %v4078_v23 = vcombine.low %v950_v55, %v957_v59  ;;  %v4080_v38 = vcombine.high %v950_v55, %v957_v59 }
 0x32e   : > { %v1257_v29 = vrot.slane %v1250_v7, %v4624_v63  ;;  %v4074_v0 = vcombine.low %v816_v31, %v823_v39  ;;  %v4076_v34 = vcombine.high %v816_v31, %v823_v39 }
 0x32f   : > { %v1309_v22 = vcombine.low %v1276_v27, %v1292_v10  ;;  %v1394_v21 = vrot.slane %v4078_v23, %v4614_v47  ;;  %v1410_v17 = vrot.slane %v4080_v38, %v4614_v47 }
 0x330   : > { %v1260_v45 = vcombine.high %v1257_v29, %v4518_v30  ;;  %v1537_v57 = vshrl.u32 %v1257_v29, 16  ;;  %v1335_v13 = vrot.slane %v4074_v0, %v4614_v47  ;;  %v1351_v19 = vrot.slane %v4076_v34, %v4614_v47 }
 0x331   : > { %v1316_v4 = vrot.slane %v1309_v22, %v4624_v63  ;;  %v1427_v16 = vcombine.low %v1394_v21, %v1410_v17 }
 0x332   : > { %v1543_v28 = vshrl.u32 %v1260_v45, 16  ;;  %v1368_v7 = vcombine.low %v1335_v13, %v1351_v19 }
 0x333   : > { %v1536_v33 = vpack.i.b16 %v1316_v4, %v1257_v29  ;;  %v1538_v32 = vshrl.u32 %v1316_v4, 16  ;;  %v1319_v35 = vcombine.high %v1316_v4, %v4518_v30  ;;  %v1434_v4 = vrot.slane %v1427_v16, %v4624_v63 }
 0x335   : > { %v2868_v37 = vsel %vm2498_vm3, %v1536_v33, 0  ;;  %v1539_v41 = vpack.i.b16 %v1538_v32, %v1537_v57  ;;  %v1542_v5 = vpack.i.b16 %v1319_v35, %v1260_v45  ;;  %v1544_v46 = vshrl.u32 %v1319_v35, 16 }
 0x336   : > { %4345 = vmatpush3.bf16.msra.mxu1 %v2868_v37  ;;  %v1574_v35 = vshrl.u32 %v1434_v4, 16 }
 0x337   : > { %v2914_v9 = vsel %vm2498_vm3, %v1539_v41, 0  ;;  %4356 = vmatprep.subr.bf16.mxu1 %v4511_v14  ;;  %v1545_v36 = vpack.i.b16 %v1544_v46, %v1543_v28  ;;  %v2960_v58 = vsel %vm2498_vm3, %v1542_v5, 0 }
 0x338   : > { %4351 = vmatpush3.bf16.msra.mxu0 %v2914_v9 }
 0x339   : > { %4347 = vmatmul.mubr.msk.bf16.vlgmr.msra.gmra.mrb[48].mxu1 %vm1582_vm2, %v2487_v50  ;;  %4362 = vmatprep.subr.bf16.mxu0 %v4511_v14  ;;  %v3006_v12 = vsel %vm2498_vm3, %v1545_v36, 0  ;;  %v1437_v50 = vcombine.high %v1434_v4, %v4518_v30 }
 0x33a   : > { %4357 = vmatpush3.bf16.msra.mxu1 %v2960_v58  ;;  %4358 = vmatprep.mubr.msk.bf16.mxu1 %vm4515_vm1, %v4511_v14 }
 0x33b   : > { %4353 = vmatmul.mubr.msk.bf16.vlgmr.msra.gmra.mrb[52].mxu0 %vm1582_vm2, %v2488_v62  ;;  %4368 = vmatprep.subr.bf16.mxu1 %v4511_v14 }
 0x33c   : > { %4363 = vmatpush3.bf16.msra.mxu0 %v3006_v12  ;;  %4364 = vmatprep.mubr.msk.bf16.mxu0 %vm4515_vm1, %v4511_v14  ;;  %v1580_v12 = vshrl.u32 %v1437_v50, 16 }
 0x33d   : > { %4374 = vmatprep.subr.bf16.mxu0 %v4511_v14 }
 0x34f   : > { %v2351_v26 = vpop.xlane.xlu0 %2350 }
 0x350   : > { %v2377_v18 = vsub.f32 %v5090_v48, %v2351_v26  ;;  %v2354_v20 = vpop.xlane.xlu1 %2353 }
 0x351   : > { %v2378_v25 = vsub.f32 %v5092_v60, %v2354_v20  ;;  %v1375_v60 = vrot.slane %v1368_v7, %v4624_v63 }
 0x352   : > { %v2403_v1 = vmul.f32 1.442695, %v2377_v18 }
 0x353   : > { %v2357_v11 = vpop.xlane.xlu0 %2356  ;;  %v2405_v42 = vmul.f32 1.442695, %v2378_v25  ;;  %v1572_v28 = vpack.i.b16 %v1434_v4, %v1375_v60  ;;  %v1573_v37 = vshrl.u32 %v1375_v60, 16  ;;  %v1378_v58 = vcombine.high %v1375_v60, %v4518_v30 }
 0x354   : > { %4451 = vpow2.f32 %v2403_v1  ;;  %v2379_v27 = vsub.f32 %v5094_v8, %v2357_v11  ;;  %v2363_v10 = vpop.xlane.xlu1 %2362 }
 0x355   : > { %4453 = vpow2.f32 %v2405_v42  ;;  %v2381_v48 = vsub.f32 %v5102_v15, %v2363_v10  ;;  %v1575_v9 = vpack.i.b16 %v1574_v35, %v1573_v37  ;;  %v3052_v36 = vsel %vm2498_vm3, %v1572_v28, 0 }
 0x356   : > { %v2407_v29 = vmul.f32 1.442695, %v2379_v27  ;;  %v1578_v61 = vpack.i.b16 %v1437_v50, %v1378_v58  ;;  %v1579_v24 = vshrl.u32 %v1378_v58, 16 }
 0x357   : > { %v2360_v22 = vpop.xlane.xlu0 %2359  ;;  %v2411_v45 = vmul.f32 1.442695, %v2381_v48  ;;  %v3098_v43 = vsel %vm2498_vm3, %v1575_v9, 0 }
 0x358   : > { %4455 = vpow2.f32 %v2407_v29  ;;  %v2380_v33 = vsub.f32 %v5096_v6, %v2360_v22  ;;  %v1581_v53 = vpack.i.b16 %v1580_v12, %v1579_v24  ;;  %v3144_v2 = vsel %vm2498_vm3, %v1578_v61, 0 }
 0x359   : > { %4457 = vpow2.f32 %v2411_v45 }
 0x35a   : > { %v2409_v57 = vmul.f32 1.442695, %v2380_v33  ;;  %v3190_v31 = vsel %vm2498_vm3, %v1581_v53, 0 }
 0x35b   : > { %v2366_v32 = vpop.xlane.xlu0 %2365 }
 0x35c   : > { %4459 = vpow2.f32 %v2409_v57  ;;  %v2382_v8 = vsub.f32 %v5104_v56, %v2366_v32 }
 0x35e   : > { %v4452_v41 = vpop.eup %4451  ;;  %v2413_v15 = vmul.f32 1.442695, %v2382_v8 }
 0x35f   : > { %v2445_v5 = vsel %vm1582_vm2, %v4452_v41, 0.0  ;;  %v2489_v46 = vpack.c.bf16 %v4452_v41, %v4452_v41  ;;  %v4454_v6 = vpop.eup %4453 }
 0x360   : > { %4461 = vpow2.f32 %v2413_v15  ;;  %2446 = vadd.xlane.f32.xlu1 %v2445_v5  ;;  %v2448_v54 = vsel %vm1582_vm2, %v4454_v6, 0.0  ;;  %v2490_v56 = vpack.c.bf16 %v4454_v6, %v4454_v6 }
 0x361   : > { %4359 = vmatmul.mubr.msk.bf16.vlgmr.msra.gmra.mrb[52].mxu1 %vm1582_vm2, %v2489_v46  ;;  %2449 = vadd.xlane.f32.xlu0 %v2448_v54 }
 0x362   : > { %v4456_v62 = vpop.eup %4455  ;;  %4369 = vmatpush3.bf16.msra.mxu1 %v3052_v36  ;;  %4365 = vmatmul.mubr.msk.bf16.vlgmr.msra.gmra.mrb[56].mxu0 %vm1582_vm2, %v2490_v56 }
 0x363   : > { %v2451_v49 = vsel %vm1582_vm2, %v4456_v62, 0.0  ;;  %4370 = vmatprep.mubr.msk.bf16.mxu1 %vm4515_vm1, %v4511_v14  ;;  %v4458_v52 = vpop.eup %4457  ;;  %4375 = vmatpush3.bf16.msra.mxu0 %v3098_v43  ;;  %v2491_v51 = vpack.c.bf16 %v4456_v62, %v4456_v62 }
 0x364   : > { %2452 = vadd.xlane.f32.xlu1 %v2451_v49  ;;  %4380 = vmatprep.subr.bf16.mxu1 %v4511_v14  ;;  %v2457_v44 = vsel %vm1582_vm2, %v4458_v52, 0.0  ;;  %v2493_v23 = vpack.c.bf16 %v4458_v52, %v4458_v52 }
 0x365   : > { %4376 = vmatprep.mubr.msk.bf16.mxu0 %vm4515_vm1, %v4511_v14  ;;  %4386 = vmatprep.subr.bf16.mxu0 %v4511_v14 }
 0x366   : > { %v4460_v3 = vpop.eup %4459 }
 0x367   : > { %v2454_v40 = vsel %vm1582_vm2, %v4460_v3, 0.0  ;;  %v2492_v55 = vpack.c.bf16 %v4460_v3, %v4460_v3 }
 0x368   : > { %2455 = vadd.xlane.f32.xlu0 %v2454_v40  ;;  %2458 = vadd.xlane.f32.xlu1 %v2457_v44 }
 0x369   : > { %4371 = vmatmul.mubr.msk.bf16.vlgmr.msra.gmra.mrb[56].mxu1 %vm1582_vm2, %v2491_v51 }
 0x36a   : > { %v4462_v59 = vpop.eup %4461  ;;  %4381 = vmatpush3.bf16.msra.mxu1 %v3144_v2  ;;  %4382 = vmatprep.mubr.msk.bf16.mxu1 %vm4515_vm1, %v4511_v14 }
 0x36b   : > { %4377 = vmatmul.mubr.msk.bf16.vlgmr.msra.gmra.mrb[60].mxu0 %vm1582_vm2, %v2492_v55  ;;  %v2460_v39 = vsel %vm1582_vm2, %v4462_v59, 0.0  ;;  %v2494_v38 = vpack.c.bf16 %v4462_v59, %v4462_v59 }
 0x36c   : > { %4387 = vmatpush3.bf16.msra.mxu0 %v3190_v31  ;;  %2461 = vadd.xlane.f32.xlu0 %v2460_v39 }
 0x36d   : > { %4388 = vmatprep.mubr.msk.bf16.mxu0 %vm4515_vm1, %v4511_v14 }
 0x371   : > { %4383 = vmatmul.mubr.msk.bf16.vlgmr.msra.gmra.mrb[60].mxu1 %vm1582_vm2, %v2493_v23 }
 0x373   : > { %4389 = vmatmul.mubr.msk.bf16.vlgmr.msra.gmra.mrb[64].mxu0 %vm1582_vm2, %v2494_v38 }
 0x395   : > { %v2417_v0 = vpop.xlane.xlu1 %2416 }
 0x396   : > { %4463 = vrcp.f32 %v2417_v0 }
 0x398   : > { %v2420_v34 = vpop.xlane.xlu0 %2419 }
 0x399   : > { %4465 = vrcp.f32 %v2420_v34 }
 0x39d   : > { %v2423_v26 = vpop.xlane.xlu1 %2422 }
 0x39e   : > { %4467 = vrcp.f32 %v2423_v26 }
 0x3a0   : > { %v2426_v21 = vpop.xlane.xlu0 %2425  ;;  %v4464_v1 = vpop.eup %4463 }
 0x3a1   : > { %4469 = vrcp.f32 %v2426_v21 }
 0x3a3   : > { %v4466_v27 = vpop.eup %4465 }
 0x3a5   : > { %v2429_v11 = vpop.xlane.xlu1 %2428 }
 0x3a6   : > { %4471 = vrcp.f32 %v2429_v11 }
 0x3a8   : > { %v4468_v7 = vpop.eup %4467 }
 0x3a9   : > { %v2432_v29 = vpop.xlane.xlu0 %2431 }
 0x3aa   : > { %4473 = vrcp.f32 %v2432_v29 }
 0x3ab   : > { %v4470_v60 = vpop.eup %4469 }
 0x3ad   : > { %v2435_v22 = vpop.xlane.xlu1 %2434 }
 0x3ae   : > { %4475 = vrcp.f32 %v2435_v22 }
 0x3b0   : > { %v2438_v6 = vpop.xlane.xlu0 %2437  ;;  %v4472_v51 = vpop.eup %4471 }
 0x3b1   : > { %4477 = vrcp.f32 %v2438_v6 }
 0x3dc   : > { %v2536_v17 = vpop.f32.mrb[32].mxu1 }
 0x3dd   : > { %v4300_v18 = vpop.f32.mrb[33].mxu1  ;;  %v3232_v16 = vmul.f32 %v4464_v1, %v2536_v17  ;;  %v4474_v17 = vpop.eup %4473 }
 0x3de   : > { %v2539_v13 = vpop.f32.mrb[34].mxu1  ;;  %v4476_v1 = vpop.eup %4475 }
 0x3df   : > { %v2582_v19 = vpop.f32.mrb[36].mxu0  ;;  %v4301_v20 = vpop.f32.mrb[35].mxu1  ;;  %v3248_v4 = vpack.c.bf16 %v3232_v16, %v3232_v16 }
 0x3e0   : > { %v4306_v14 = vpop.f32.mrb[37].mxu0  ;;  %v3233_v10 = vmul.f32 %v4466_v27, %v2582_v19 }
 0x3e1   : > { %v2585_v25 = vpop.f32.mrb[38].mxu0  ;;  %v3255_v5 = vrot.slane %v3248_v4, %v4614_v47 }
 0x3e2   : > { %v4307_v42 = vpop.f32.mrb[39].mxu0  ;;  %v3282_v35 = vpack.c.bf16 %v3233_v10, %v3233_v10 }
 0x3e4   : > { %v2628_v48 = vpop.f32.mrb[36].mxu1  ;;  %v3289_v36 = vrot.slane %v3282_v35, %v4614_v47 }
 0x3e5   : > { %v3234_v45 = vmul.f32 %v4468_v7, %v2628_v48  ;;  %v4312_v33 = vpop.f32.mrb[37].mxu1 }
 0x3e6   : > { %v2631_v57 = vpop.f32.mrb[38].mxu1 }
 0x3e7   : > { %v2674_v32 = vpop.f32.mrb[40].mxu0  ;;  %v3256_v8 = vpack.c.bf16 %v3234_v45, %v3234_v45  ;;  %v4313_v37 = vpop.f32.mrb[39].mxu1 }
 0x3e8   : > { %v3235_v28 = vmul.f32 %v4470_v60, %v2674_v32  ;;  %v4318_v41 = vpop.f32.mrb[41].mxu0 }
 0x3e9   : > { %v2677_v15 = vpop.f32.mrb[42].mxu0  ;;  %v3263_v46 = vrot.slane %v3256_v8, %v4614_v47  ;;  %v4478_v8 = vpop.eup %4477 }
 0x3ea   : > { %v3290_v9 = vpack.c.bf16 %v3235_v28, %v3235_v28  ;;  %v4319_v50 = vpop.f32.mrb[43].mxu0 }
 0x3eb   : > { %v3264_v54 = vcombine.low %v3255_v5, %v3263_v46  ;;  %v3265_v56 = vcombine.high %v3255_v5, %v3263_v46 }
 0x3ec   : > { %v3297_v58 = vrot.slane %v3290_v9, %v4614_v47  ;;  %v2720_v62 = vpop.f32.mrb[40].mxu1 }
 0x3ed   : > { %v3272_v43 = vrot.slane %v3264_v54, %v4624_v63  ;;  %v3279_v49 = vrot.slane %v3265_v56, %v4624_v63  ;;  %v4324_v61 = vpop.f32.mrb[41].mxu1  ;;  %v3236_v39 = vmul.f32 %v4472_v51, %v2720_v62 }
 0x3ee   : > { %v3298_v12 = vcombine.low %v3289_v36, %v3297_v58  ;;  %v3299_v52 = vcombine.high %v3289_v36, %v3297_v58  ;;  %v2723_v24 = vpop.f32.mrb[42].mxu1 }
 0x3ef   : > { %v3280_v3 = vcombine.high %v3272_v43, %v4518_v30  ;;  %v3281_v40 = vcombine.high %v3279_v49, %v4518_v30  ;;  %v4325_v44 = vpop.f32.mrb[43].mxu1  ;;  %v3524_v59 = vshrl.u32 %v3272_v43, 16  ;;  %v3540_v31 = vshrl.u32 %v3279_v49, 16 }
 0x3f0   : > { %v3306_v53 = vrot.slane %v3298_v12, %v4624_v63  ;;  %v3313_v2 = vrot.slane %v3299_v52, %v4624_v63  ;;  %v2766_v55 = vpop.f32.mrb[44].mxu0  ;;  %v3316_v4 = vpack.c.bf16 %v3236_v39, %v3236_v39 }
 0x3f1   : > { %v4330_v23 = vpop.f32.mrb[45].mxu0  ;;  %v3532_v18 = vshrl.u32 %v3280_v3, 16  ;;  %v3548_v13 = vshrl.u32 %v3281_v40, 16  ;;  %v3237_v29 = vmul.f32 %v4474_v17, %v2766_v55 }
 0x3f2   : > { %v3314_v38 = vcombine.high %v3306_v53, %v4518_v30  ;;  %v3315_v0 = vcombine.high %v3313_v2, %v4518_v30  ;;  %v3522_v34 = vpack.i.b16 %v3306_v53, %v3272_v43  ;;  %v3525_v26 = vshrl.u32 %v3306_v53, 16  ;;  %v2769_v21 = vpop.f32.mrb[46].mxu0 }
 0x3f3   : > { %v3538_v19 = vpack.i.b16 %v3313_v2, %v3279_v49  ;;  %v3541_v20 = vshrl.u32 %v3313_v2, 16  ;;  %v4331_v14 = vpop.f32.mrb[47].mxu0  ;;  %v3350_v46 = vpack.c.bf16 %v3237_v29, %v3237_v29  ;;  %v3323_v36 = vrot.slane %v3316_v4, %v4614_v47 }
 0x3f4   : > { %v3526_v25 = vpack.i.b16 %v3525_v26, %v3524_v59  ;;  %v3530_v11 = vpack.i.b16 %v3314_v38, %v3280_v3  ;;  %v3533_v16 = vshrl.u32 %v3314_v38, 16  ;;  %v3546_v42 = vpack.i.b16 %v3315_v0, %v3281_v40 }
 0x3f5   : > { %v3542_v27 = vpack.i.b16 %v3541_v20, %v3540_v31  ;;  %v3549_v10 = vshrl.u32 %v3315_v0, 16  ;;  %v3648_v7 = vcombine.low %v3522_v34, %v3538_v19  ;;  %v2812_v48 = vpop.f32.mrb[44].mxu1  ;;  %v3357_v24 = vrot.slane %v3350_v46, %v4614_v47 }
 0x3f6   : > { %v3534_v22 = vpack.i.b16 %v3533_v16, %v3532_v18  ;;  %v3238_v45 = vmul.f32 %v4476_v1, %v2812_v48  ;;  %v4336_v33 = vpop.f32.mrb[45].mxu1  ;;  %v3656_v60 = vcombine.low %v3530_v11, %v3546_v42 }
 0x3f7   : > { %v3550_v57 = vpack.i.b16 %v3549_v10, %v3548_v13  ;;  %v2815_v32 = vpop.f32.mrb[46].mxu1  ;;  %v3698_v35 = vcombine.low %v3526_v25, %v3542_v27  ;;  %v3655_v15 = vrot.slane %v3648_v7, %v4614_v47 }
 0x3f8   : > { %v3324_v28 = vpack.c.bf16 %v3238_v45, %v3238_v45  ;;  %v4337_v37 = vpop.f32.mrb[47].mxu1  ;;  %v2858_v41 = vpop.f32.mrb[48].mxu0  ;;  %v3663_v5 = vrot.slane %v3656_v60, %v4614_v47 }
 0x3f9   : > { %v3239_v9 = vmul.f32 %v4478_v8, %v2858_v41  ;;  %v4342_v50 = vpop.f32.mrb[49].mxu0  ;;  %v3706_v6 = vcombine.low %v3534_v22, %v3550_v57  ;;  %v3705_v49 = vrot.slane %v3698_v35, %v4614_v47 }
 0x3fa   : > { %v3331_v54 = vrot.slane %v3324_v28, %v4614_v47  ;;  %v2861_v56 = vpop.f32.mrb[50].mxu0  ;;  %v3680_v58 = vcombine.low %v3655_v15, %v3663_v5 }
 0x3fb   : > { %v3358_v62 = vpack.c.bf16 %v3239_v9, %v3239_v9  ;;  %v4343_v43 = vpop.f32.mrb[51].mxu0  ;;  %v3713_v12 = vrot.slane %v3706_v6, %v4614_v47 }
 0x3fc   : > { %v3332_v52 = vcombine.low %v3323_v36, %v3331_v54  ;;  %v3333_v61 = vcombine.high %v3323_v36, %v3331_v54  ;;  %v3687_v32 = vrot.slane %v3680_v58, %v4624_v63 }
 0x3fd   : > { %v3365_v3 = vrot.slane %v3358_v62, %v4614_v47  ;;  %v3730_v40 = vcombine.low %v3705_v49, %v3713_v12 }
 0x3fe   : > { %v3340_v44 = vrot.slane %v3332_v52, %v4624_v63  ;;  %v3347_v51 = vrot.slane %v3333_v61, %v4624_v63 }
 0x3ff   : > { %v3366_v53 = vcombine.low %v3357_v24, %v3365_v3  ;;  %v3367_v2 = vcombine.high %v3357_v24, %v3365_v3  ;;  %v3737_v50 = vrot.slane %v3730_v40, %v4624_v63  ;;  %v2441_v40 = vpop.xlane.xlu1 %2440 }
 0x400   : > { %v3348_v55 = vcombine.high %v3340_v44, %v4518_v30  ;;  %v3349_v39 = vcombine.high %v3347_v51, %v4518_v30  ;;  %v3556_v23 = vshrl.u32 %v3340_v44, 16  ;;  %v3572_v17 = vshrl.u32 %v3347_v51, 16 }
 0x401   : > { %v3374_v59 = vrot.slane %v3366_v53, %v4624_v63  ;;  %v3381_v31 = vrot.slane %v3367_v2, %v4624_v63  ;;  %4479 = vrcp.f32 %v2441_v40 }
 0x402   : > { %v3564_v21 = vshrl.u32 %v3348_v55, 16  ;;  %v3580_v25 = vshrl.u32 %v3349_v39, 16 }
 0x403   : > { %v3382_v38 = vcombine.high %v3374_v59, %v4518_v30  ;;  %v3383_v0 = vcombine.high %v3381_v31, %v4518_v30  ;;  %v3554_v34 = vpack.i.b16 %v3374_v59, %v3340_v44  ;;  %v3557_v26 = vshrl.u32 %v3374_v59, 16  ;;  %v2444_v44 = vpop.xlane.xlu0 %2443 }
 0x404   : > { %v3570_v18 = vpack.i.b16 %v3381_v31, %v3347_v51  ;;  %v3573_v13 = vshrl.u32 %v3381_v31, 16  ;;  %v2447_v51 = vpop.xlane.xlu1 %2446  ;;  %4481 = vrcp.f32 %v2444_v44 }
 0x405   : > { %v3558_v19 = vpack.i.b16 %v3557_v26, %v3556_v23  ;;  %v3562_v20 = vpack.i.b16 %v3382_v38, %v3348_v55  ;;  %v3565_v14 = vshrl.u32 %v3382_v38, 16  ;;  %v3578_v1 = vpack.i.b16 %v3383_v0, %v3349_v39 }
 0x406   : > { %v3574_v11 = vpack.i.b16 %v3573_v13, %v3572_v17  ;;  %v3581_v16 = vshrl.u32 %v3383_v0, 16  ;;  %v3664_v42 = vcombine.low %v3554_v34, %v3570_v18  ;;  %4483 = vrcp.f32 %v2447_v51 }
 0x407   : > { %v3566_v27 = vpack.i.b16 %v3565_v14, %v3564_v21  ;;  %v3672_v10 = vcombine.low %v3562_v20, %v3578_v1  ;;  %v2450_v53 = vpop.xlane.xlu0 %2449 }
 0x408   : > { %v3582_v7 = vpack.i.b16 %v3581_v16, %v3580_v25  ;;  %v3714_v29 = vcombine.low %v3558_v19, %v3574_v11  ;;  %v3671_v48 = vrot.slane %v3664_v42, %v4614_v47  ;;  %4485 = vrcp.f32 %v2450_v53  ;;  %v2453_v2 = vpop.xlane.xlu1 %2452 }
 0x409   : > { %v3679_v22 = vrot.slane %v3672_v10, %v4614_v47  ;;  %4487 = vrcp.f32 %v2453_v2 }
 0x40a   : > { %v3722_v4 = vcombine.low %v3566_v27, %v3582_v7  ;;  %v3721_v33 = vrot.slane %v3714_v29, %v4614_v47 }
 0x40b   : > { %v3688_v45 = vcombine.low %v3671_v48, %v3679_v22  ;;  %v4480_v55 = vpop.eup %4479  ;;  %v2456_v39 = vpop.xlane.xlu0 %2455 }
 0x40c   : > { %v3729_v60 = vrot.slane %v3722_v4, %v4614_v47  ;;  %v2904_v57 = vpop.f32.mrb[48].mxu1  ;;  %v2459_v34 = vpop.xlane.xlu1 %2458  ;;  %4489 = vrcp.f32 %v2456_v39 }
 0x40d   : > { %v3695_v35 = vrot.slane %v3688_v45, %v4624_v63  ;;  %v4348_v8 = vpop.f32.mrb[49].mxu1  ;;  %v3240_v59 = vmul.f32 %v4480_v55, %v2904_v57  ;;  %4491 = vrcp.f32 %v2459_v34 }
 0x40e   : > { %v3738_v28 = vcombine.low %v3721_v33, %v3729_v60  ;;  %v2907_v37 = vpop.f32.mrb[50].mxu1  ;;  %v2950_v41 = vpop.f32.mrb[52].mxu0 }
 0x40f   : > { %v3697_v15 = vcombine.high %v3687_v32, %v3695_v35  ;;  %v5322_v5 = vcombine.low %v3687_v32, %v3695_v35  ;;  %v4349_v46 = vpop.f32.mrb[51].mxu1  ;;  %v4354_v9 = vpop.f32.mrb[53].mxu0  ;;  %v3384_v26 = vpack.c.bf16 %v3240_v59, %v3240_v59 }
 0x410   : > { %v3745_v6 = vrot.slane %v3738_v28, %v4624_v63  ;;  %v2953_v36 = vpop.f32.mrb[54].mxu0  ;;  %v4482_v31 = vpop.eup %4481 }
 0x411   : > { %v4355_v54 = vpop.f32.mrb[55].mxu0  ;;  %v3851_v58 = vshrl.u32 %v5322_v5, 16  ;;  %v3857_v12 = vshrl.u32 %v3697_v15, 16  ;;  %v3241_v23 = vmul.f32 %v4482_v31, %v2950_v41  ;;  %v4484_v38 = vpop.eup %4483  ;;  %v3391_v27 = vrot.slane %v3384_v26, %v4614_v47 }
 0x412   : > { %v3747_v56 = vcombine.high %v3737_v50, %v3745_v6  ;;  %v5326_v62 = vcombine.low %v3737_v50, %v3745_v6  ;;  %v4486_v18 = vpop.eup %4485  ;;  %v2462_v42 = vpop.xlane.xlu0 %2461 }
 0x413   : > { %v3418_v20 = vpack.c.bf16 %v3241_v23, %v3241_v23  ;;  %4493 = vrcp.f32 %v2462_v42  ;;  %v4488_v9 = vpop.eup %4487 }
 0x414   : > { %v3856_v43 = vpack.i.b16 %v3747_v56, %v3697_v15  ;;  %v3852_v49 = vshrl.u32 %v5326_v62, 16  ;;  %v3858_v52 = vshrl.u32 %v3747_v56, 16  ;;  %v3850_v61 = vpack.i.b16 %v5326_v62, %v5322_v5  ;;  %v4113_v5 = vld [vmem:[%s5406_s3] ss:$0 sm:$0xff] }
 0x415   : > { %v3425_v48 = vrot.slane %v3418_v20, %v4614_v47 }
 0x416   : > { %3876 = vrot.lane.b32.xlu1 %v3856_v43, %s4519_s11  ;;  %v3853_v24 = vpack.i.b16 %v3852_v49, %v3851_v58  ;;  %v5333_v3 = vpack.i.b16 %v3858_v52, %v3857_v12  ;;  %v4490_v12 = vpop.eup %4489 }
 0x417   : > { %v4492_v59 = vpop.eup %4491 }
 0x41a   : > { %3872 = vrot.lane.b32.xlu1 %v3853_v24, %s4520_s12 }
 0x434   : > { %v2996_v0 = vpop.f32.mrb[52].mxu1 }
 0x435   : > { %v3242_v21 = vmul.f32 %v4484_v38, %v2996_v0  ;;  %v4360_v17 = vpop.f32.mrb[53].mxu1  ;;  %v3042_v19 = vpop.f32.mrb[56].mxu0 }
 0x436   : > { %v2999_v13 = vpop.f32.mrb[54].mxu1  ;;  %v3243_v1 = vmul.f32 %v4486_v18, %v3042_v19  ;;  %v4366_v11 = vpop.f32.mrb[57].mxu0 }
 0x437   : > { %v3392_v14 = vpack.c.bf16 %v3242_v21, %v3242_v21  ;;  %v4361_v25 = vpop.f32.mrb[55].mxu1  ;;  %v3045_v16 = vpop.f32.mrb[58].mxu0 }
 0x438   : > { %v3426_v7 = vpack.c.bf16 %v3243_v1, %v3243_v1  ;;  %v4367_v29 = vpop.f32.mrb[59].mxu0  ;;  %v4494_v13 = vpop.eup %4493 }
 0x439   : > { %v3399_v10 = vrot.slane %v3392_v14, %v4614_v47 }
 0x43a   : > { %v3433_v45 = vrot.slane %v3426_v7, %v4614_v47 }
 0x43b   : > { %v3400_v22 = vcombine.low %v3391_v27, %v3399_v10  ;;  %v3401_v4 = vcombine.high %v3391_v27, %v3399_v10 }
 0x43c   : > { %v3088_v33 = vpop.f32.mrb[56].mxu1  ;;  %v3434_v32 = vcombine.low %v3425_v48, %v3433_v45  ;;  %v3435_v35 = vcombine.high %v3425_v48, %v3433_v45 }
 0x43d   : > { %v3408_v60 = vrot.slane %v3400_v22, %v4624_v63  ;;  %v3415_v57 = vrot.slane %v3401_v4, %v4624_v63  ;;  %v4372_v8 = vpop.f32.mrb[57].mxu1  ;;  %v3244_v43 = vmul.f32 %v4488_v9, %v3088_v33 }
 0x43e   : > { %v3091_v28 = vpop.f32.mrb[58].mxu1  ;;  %v3134_v37 = vpop.f32.mrb[60].mxu0  ;;  %v3442_v50 = vrot.slane %v3434_v32, %v4624_v63  ;;  %v3449_v6 = vrot.slane %v3435_v35, %v4624_v63 }
 0x43f   : > { %v3416_v41 = vcombine.high %v3408_v60, %v4518_v30  ;;  %v4373_v15 = vpop.f32.mrb[59].mxu1  ;;  %v4378_v46 = vpop.f32.mrb[61].mxu0  ;;  %v3417_v54 = vcombine.high %v3415_v57, %v4518_v30  ;;  %v3588_v56 = vshrl.u32 %v3408_v60, 16  ;;  %v3604_v58 = vshrl.u32 %v3415_v57, 16 }
 0x440   : > { %v3137_v36 = vpop.f32.mrb[62].mxu0  ;;  %v3450_v52 = vcombine.high %v3442_v50, %v4518_v30  ;;  %v3451_v24 = vcombine.high %v3449_v6, %v4518_v30  ;;  %v3586_v40 = vpack.i.b16 %v3442_v50, %v3408_v60  ;;  %v3589_v44 = vshrl.u32 %v3442_v50, 16 }
 0x441   : > { %v4379_v49 = vpop.f32.mrb[63].mxu0  ;;  %v3596_v51 = vshrl.u32 %v3416_v41, 16  ;;  %v3602_v53 = vpack.i.b16 %v3449_v6, %v3415_v57  ;;  %v3605_v2 = vshrl.u32 %v3449_v6, 16  ;;  %v3245_v55 = vmul.f32 %v4490_v12, %v3134_v37 }
 0x442   : > { %v3590_v31 = vpack.i.b16 %v3589_v44, %v3588_v56  ;;  %v3594_v39 = vpack.i.b16 %v3450_v52, %v3416_v41  ;;  %v3597_v23 = vshrl.u32 %v3450_v52, 16  ;;  %v3610_v38 = vpack.i.b16 %v3451_v24, %v3417_v54 }
 0x443   : > { %v3612_v34 = vshrl.u32 %v3417_v54, 16  ;;  %v3606_v26 = vpack.i.b16 %v3605_v2, %v3604_v58  ;;  %v3613_v21 = vshrl.u32 %v3451_v24, 16  ;;  %v3748_v17 = vcombine.low %v3586_v40, %v3602_v53 }
 0x444   : > { %v3180_v0 = vpop.f32.mrb[60].mxu1  ;;  %v3598_v19 = vpack.i.b16 %v3597_v23, %v3596_v51  ;;  %v3452_v20 = vpack.c.bf16 %v3244_v43, %v3244_v43  ;;  %v3756_v11 = vcombine.low %v3594_v39, %v3610_v38  ;;  %v3486_v42 = vpack.c.bf16 %v3245_v55, %v3245_v55 }
 0x445   : > { %v4384_v18 = vpop.f32.mrb[61].mxu1  ;;  %v3246_v14 = vmul.f32 %v4492_v59, %v3180_v0  ;;  %v3614_v16 = vpack.i.b16 %v3613_v21, %v3612_v34  ;;  %v3798_v29 = vcombine.low %v3590_v31, %v3606_v26  ;;  %v3755_v4 = vrot.slane %v3748_v17, %v4614_v47 }
 0x446   : > { %v3183_v1 = vpop.f32.mrb[62].mxu1  ;;  %v3226_v25 = vpop.f32.mrb[64].mxu0  ;;  %v3763_v45 = vrot.slane %v3756_v11, %v4614_v47  ;;  %v3459_v32 = vrot.slane %v3452_v20, %v4614_v47  ;;  %v3493_v28 = vrot.slane %v3486_v42, %v4614_v47 }
 0x447   : > { %v3247_v27 = vmul.f32 %v4494_v13, %v3226_v25  ;;  %v4385_v10 = vpop.f32.mrb[63].mxu1  ;;  %v4390_v7 = vpop.f32.mrb[65].mxu0  ;;  %v3460_v48 = vpack.c.bf16 %v3246_v14, %v3246_v14  ;;  %v3806_v57 = vcombine.low %v3598_v19, %v3614_v16  ;;  %v3805_v41 = vrot.slane %v3798_v29, %v4614_v47 }
 0x448   : > { %v3229_v22 = vpop.f32.mrb[66].mxu0  ;;  %v3780_v8 = vcombine.low %v3755_v4, %v3763_v45  ;;  %v4430_v10 = vld [vmem:[%s5405_s2 + $0x8] sm:$0xff]  }
 0x449   : > { %v3494_v33 = vpack.c.bf16 %v3247_v27, %v3247_v27  ;;  %v4391_v60 = vpop.f32.mrb[67].mxu0  ;;  %v3467_v35 = vrot.slane %v3460_v48, %v4614_v47  ;;  %v3813_v15 = vrot.slane %v3806_v57, %v4614_v47 }
 0x44a   : > { %v3787_v42 = vrot.slane %v3780_v8, %v4624_v63 }
 0x44b   : > { %v3501_v37 = vrot.slane %v3494_v33, %v4614_v47  ;;  %v3468_v46 = vcombine.low %v3459_v32, %v3467_v35  ;;  %v3469_v9 = vcombine.high %v3459_v32, %v3467_v35  ;;  %v3830_v36 = vcombine.low %v3805_v41, %v3813_v15 }
 0x44d   : > { %v3502_v50 = vcombine.low %v3493_v28, %v3501_v37  ;;  %v3503_v6 = vcombine.high %v3493_v28, %v3501_v37  ;;  %v3476_v54 = vrot.slane %v3468_v46, %v4624_v63  ;;  %v3483_v56 = vrot.slane %v3469_v9, %v4624_v63 }
 0x44e   : > { %v3837_v22 = vrot.slane %v3830_v36, %v4624_v63 }
 0x44f   : > { %v3510_v58 = vrot.slane %v3502_v50, %v4624_v63  ;;  %v3517_v43 = vrot.slane %v3503_v6, %v4624_v63  ;;  %v3484_v49 = vcombine.high %v3476_v54, %v4518_v30  ;;  %v3485_v12 = vcombine.high %v3483_v56, %v4518_v30 }
 0x450   : > { %v3620_v52 = vshrl.u32 %v3476_v54, 16  ;;  %v3636_v2 = vshrl.u32 %v3483_v56, 16 }
 0x451   : > { %v3518_v24 = vcombine.high %v3510_v58, %v4518_v30  ;;  %v3519_v40 = vcombine.high %v3517_v43, %v4518_v30  ;;  %v3618_v44 = vpack.i.b16 %v3510_v58, %v3476_v54  ;;  %v3621_v51 = vshrl.u32 %v3510_v58, 16  ;;  %v4429_v30 = vld [vmem:[%s5405_s2] sm:$0xff]  }
 0x452   : > { %v3628_v53 = vshrl.u32 %v3484_v49, 16  ;;  %v3634_v55 = vpack.i.b16 %v3517_v43, %v3483_v56  ;;  %v3637_v59 = vshrl.u32 %v3517_v43, 16  ;;  %v3644_v0 = vshrl.u32 %v3485_v12, 16  ;;  %4392 = vmatprep.subr.bf16.mxu1 %v4429_v30 }
 0x453   : > { %v3622_v31 = vpack.i.b16 %v3621_v51, %v3620_v52  ;;  %v3626_v39 = vpack.i.b16 %v3518_v24, %v3484_v49  ;;  %v3629_v23 = vshrl.u32 %v3518_v24, 16  ;;  %v3642_v38 = vpack.i.b16 %v3519_v40, %v3485_v12  ;;  %4393 = vmatpush3.bf16.msra.mxu1 %v4429_v30 }
 0x454   : > { %v3638_v34 = vpack.i.b16 %v3637_v59, %v3636_v2  ;;  %v3645_v26 = vshrl.u32 %v3519_v40, 16  ;;  %v3764_v21 = vcombine.low %v3618_v44, %v3634_v55  ;;  %4394 = vmatprep.subr.bf16.mxu1 %v4430_v10 }
 0x455   : > { %v3630_v17 = vpack.i.b16 %v3629_v23, %v3628_v53  ;;  %v3772_v18 = vcombine.low %v3626_v39, %v3642_v38 }
 0x456   : > { %v3646_v13 = vpack.i.b16 %v3645_v26, %v3644_v0  ;;  %v3814_v19 = vcombine.low %v3622_v31, %v3638_v34  ;;  %v3771_v20 = vrot.slane %v3764_v21, %v4614_v47 }
 0x457   : > { %v3779_v14 = vrot.slane %v3772_v18, %v4614_v47  ;;  %4395 = vmatpush3.bf16.msra.mxu1 %v4430_v10 }
 0x458   : > { %v3822_v1 = vcombine.low %v3630_v17, %v3646_v13  ;;  %v3821_v11 = vrot.slane %v3814_v19, %v4614_v47 }
 0x459   : > { %v3788_v25 = vcombine.low %v3771_v20, %v3779_v14 }
 0x45a   : > { %v3829_v16 = vrot.slane %v3822_v1, %v4614_v47 }
 0x45b   : > { %v3795_v27 = vrot.slane %v3788_v25, %v4624_v63 }
 0x45c   : > { %v3838_v7 = vcombine.low %v3821_v11, %v3829_v16 }
 0x45d   : > { %v3797_v29 = vcombine.high %v3787_v42, %v3795_v27  ;;  %v3796_v48 = vcombine.low %v3787_v42, %v3795_v27 }
 0x45e   : > { %v3845_v4 = vrot.slane %v3838_v7, %v4624_v63 }
 0x45f   : > { %v3863_v47 = vshrl.u32 %v3796_v48, 16  ;;  %v3869_v60 = vshrl.u32 %v3797_v29, 16 }
 0x460   : > { %v3847_v45 = vcombine.high %v3837_v22, %v3845_v4  ;;  %v3846_v33 = vcombine.low %v3837_v22, %v3845_v4 }
 0x462   : > { %v3868_v57 = vpack.i.b16 %v3847_v45, %v3797_v29  ;;  %v3864_v32 = vshrl.u32 %v3846_v33, 16  ;;  %v3870_v35 = vshrl.u32 %v3847_v45, 16  ;;  %v3862_v8 = vpack.i.b16 %v3846_v33, %v3796_v48 }
 0x464   : > { %3878 = vrot.lane.b32.xlu1 %v3868_v57, %s4519_s11  ;;  %v3865_v28 = vpack.i.b16 %v3864_v32, %v3863_v47  ;;  %v3871_v37 = vpack.i.b16 %v3870_v35, %v3869_v60 }
 0x466   : > { %3874 = vrot.lane.b32.xlu0 %v3865_v28, %s4520_s12 }
 0x468   : > { %3882 = vrot.lane.b32.xlu1 %v3871_v37, %s4521_s18 }
 0x46a   : > { %3880 = vrot.lane.b32.xlu0 %v5333_v3, %s4521_s18 }
 0x488   : > { %v3877_v63 = vpop.permute.xlu1 %3876 }
 0x48c   : > { %v3873_v41 = vpop.permute.xlu1 %3872 }
 0x48d   : > { %v3886_v9 = vsel %vm1582_vm2, %v3850_v61, %v3873_v41 }
 0x48e   : > { %v3892_v54 = vsel %vm3890_vm4, %v3886_v9, %v3877_v63 }
 0x4d6   : > { %v3879_v15 = vpop.permute.xlu1 %3878 }
 0x4d8   : > { %v3875_v46 = vpop.permute.xlu0 %3874 }
 0x4d9   : > { %v3889_v50 = vsel %vm1582_vm2, %v3862_v8, %v3875_v46 }
 0x4da   : > { %v3883_v6 = vpop.permute.xlu1 %3882  ;;  %v3894_v36 = vsel %vm3890_vm4, %v3889_v50, %v3879_v15 }
 0x4db   : > { %v3899_v3 = vsel %vm3895_vm5, %v3894_v36, %v3883_v6 }
 0x4dc   : > { %v3881_v56 = vpop.permute.xlu0 %3880 }
 0x4dd   : > { %v3897_v58 = vsel %vm3895_vm5, %v3892_v54, %v3881_v56 }
 0x4de   : > { %4396 = vmatprep.mubr.msk.bf16.mxu1 %vm224_vm0, %v3897_v58 }
 0x4df   : > { %4397 = vmatmul.mubr.msk.bf16.vlgmr.msra.gmra.mrb[64].mxu1 %vm224_vm0, %v3899_v3 }
 0x5b2   : > { %v4398_v62 = vpop.f32.mrb[64].mxu1 }
 0x5b3   : > { %v3970_v61 = vadd.f32 %v4398_v62, %v4113_v5  ;;  %v3961_v43 = vpop.f32.mrb[65].mxu1 }
 0x5b4   : > { %v3962_v49 = vadd.f32 %v4113_v5, %v3961_v43  ;;  %v4399_v12 = vpop.f32.mrb[66].mxu1 }
 0x5b5   : > { %3978 = vst.msk [vmem:[%s199_s25 + $0x10] sm:$0xff] %vm224_vm0, %v3970_v61  ;;  %v3973_v52 = vadd.f32 %v4399_v12, %v4113_v5  ;;  %v3964_v24 = vpop.f32.mrb[67].mxu1 }
 0x5b6   : > { %3976 = vst.msk [vmem:[%s199_s25] sm:$0xff] %vm224_vm0, %v3962_v49  ;;  %v3965_v40 = vadd.f32 %v4113_v5, %v3964_v24 }
 0x5b7   : > { %3979 = vst.msk [vmem:[%s199_s25 + $0x18] sm:$0xff] %vm224_vm0, %v3973_v52 }
 0x5b8   : > { %3977 = vst.msk [vmem:[%s199_s25 + $0x8] sm:$0xff] %vm224_vm0, %v3965_v40 }
 0x5b9 PF: > { %s14_s15 = sadd.s32 1, %s4501_s15  }
 0x5ba   : > { %p11_p4 = scmp.ge.s32.totalorder %s14_s15, 6  }
 0x5bc   :  { %13 = sbr.rel (!%p11_p4) target bundleno = 1 (0x1), region = 66 }

</bundles_post_ra>
